<compile_context>
chip_gen: v6e
topology: v6e:2x2x1
jax: 0.10.0
libtpu: 0.0.40
codegen_flags: <defaults>
</compile_context>

<pallas_src>
import math

import jax
import jax.numpy as jnp
from jax.experimental import pallas as pl
from jax.experimental.pallas import tpu as pltpu

D_MODEL = 32            # fixed by position parameter (1, 32, 32)
SEQ = 32                # fixed by position parameter
N_LAYERS = 6
N_HEADS = 6
D_HEAD = D_MODEL // N_HEADS      # = 5 (true head dim used for scaling)
D_HEAD_P = 8                     # padded head dim (zero-padded, exact math)
HDP = N_HEADS * D_HEAD_P         # = 48
D_FF = 4 * D_MODEL               # = 128
EPS = 1e-5
K1 = 3                           # conv1 kernel size


# ----------------------------------------------------------------------------
# Single fused kernel: conv1 + position (layer 0), encoder layer (every step),
# conv2 (last layer).
# ----------------------------------------------------------------------------
def fused_forward_kernel(xcol_ref, w1c_ref, b1c_ref, pos_ref,
                         wqkv_ref, bqkv_ref, wo_ref, bo_ref, ln_ref,
                         wf1_ref, bf1_ref, wf2_ref, bf2_ref,
                         w2c_ref, b2c_ref,
                         out_ref, attn_ref,
                         h_ref):
    l = pl.program_id(1)
    n_layers = pl.num_programs(1)
    scale = 1.0 / math.sqrt(D_HEAD)     # scale uses the true head dim (5)

    # ---- layer 0 only: conv1 as one im2col matmul + positional embedding ----
    @pl.when(l == 0)
    def _():
        conv = jnp.dot(w1c_ref[...], xcol_ref[0],
                       preferred_element_type=jnp.float32)        # (D, L)
        h_ref[...] = conv + b1c_ref[...] + pos_ref[0]
        # dropout(0.1): identity in eval mode.

    x = h_ref[...]                    # (S, D)
    wqkv = wqkv_ref[0]                # (D, 3*H*dkp)
    bqkv = bqkv_ref[0]                # (1, 3*H*dkp)
    wo = wo_ref[0]                    # (H*dkp, D)
    bo = bo_ref[0]                    # (1, D)
    ln = ln_ref[0]                    # (4, D): [gamma1, beta1, gamma2, beta2]

    # ---- multi-head attention: fused QKV projection (one matmul) ----
    qkv = jnp.dot(x, wqkv, preferred_element_type=jnp.float32) + bqkv   # (S, 144)

    head_outs = []
    for h in range(N_HEADS):
        q = qkv[:, h * D_HEAD_P:(h + 1) * D_HEAD_P]
        k = qkv[:, HDP + h * D_HEAD_P:HDP + (h + 1) * D_HEAD_P]
        v = qkv[:, 2 * HDP + h * D_HEAD_P:2 * HDP + (h + 1) * D_HEAD_P]
        s = jnp.dot(q, k.T, preferred_element_type=jnp.float32) * scale     # (S, S)
        s = s - jnp.max(s, axis=-1, keepdims=True)
        e = jnp.exp(s)
        p = e * pl.reciprocal(jnp.sum(e, axis=-1, keepdims=True), approx=True)
        attn_ref[0, h] = p
        head_outs.append(jnp.dot(p, v, preferred_element_type=jnp.float32))  # (S, dkp)

    ho = jnp.concatenate(head_outs, axis=-1)                     # (S, H*dkp)
    mha = jnp.dot(ho, wo, preferred_element_type=jnp.float32) + bo

    # ---- residual + LayerNorm 1 (post-LN) ----
    h1 = x + mha
    mu1 = jnp.mean(h1, axis=-1, keepdims=True)
    var1 = jnp.mean((h1 - mu1) ** 2, axis=-1, keepdims=True)
    x1 = (h1 - mu1) * jax.lax.rsqrt(var1 + EPS) * ln[0:1] + ln[1:2]

    # ---- FFN (ReLU) ----
    f = jnp.maximum(
        jnp.dot(x1, wf1_ref[0], preferred_element_type=jnp.float32) + bf1_ref[0], 0.0)
    f = jnp.dot(f, wf2_ref[0], preferred_element_type=jnp.float32) + bf2_ref[0]

    # ---- residual + LayerNorm 2 ----
    h2 = x1 + f
    mu2 = jnp.mean(h2, axis=-1, keepdims=True)
    var2 = jnp.mean((h2 - mu2) ** 2, axis=-1, keepdims=True)
    h_new = (h2 - mu2) * jax.lax.rsqrt(var2 + EPS) * ln[2:3] + ln[3:4]
    h_ref[...] = h_new

    # ---- last layer only: conv2 (kernel_size=1, 1 output channel) ----
    @pl.when(l == n_layers - 1)
    def _():
        out_ref[0] = (jnp.dot(w2c_ref[...], h_new, preferred_element_type=jnp.float32)
                      + b2c_ref[...])


# ----------------------------------------------------------------------------
# Forward wrapper: layout plumbing (im2col) + single pallas_call.
# ----------------------------------------------------------------------------
def adaptive_transformer_forward(x, params):
    B, c_in, L = x.shape
    assert L == SEQ
    kcin = K1 * c_in

    # conv1 'same' padding, im2col: row ordering = k*Cin + cin
    xp = jnp.pad(x, ((0, 0), (0, 0), (1, 1)))
    xcol = jnp.concatenate([xp[:, :, k:k + L] for k in range(K1)], axis=1)  # (B, 3*Cin, L)

    out, attn_flat = pl.pallas_call(
        fused_forward_kernel,
        out_shape=(
            jax.ShapeDtypeStruct((B, 1, L), jnp.float32),
            jax.ShapeDtypeStruct((N_LAYERS * B, N_HEADS, SEQ, SEQ), jnp.float32),
        ),
        grid=(B, N_LAYERS),
        in_specs=[
            pl.BlockSpec((1, kcin, L), lambda b, l: (b, 0, 0)),          # xcol
            pl.BlockSpec((D_MODEL, kcin), lambda b, l: (0, 0)),          # conv1 W (im2col)
            pl.BlockSpec((D_MODEL, 1), lambda b, l: (0, 0)),             # conv1 b
            pl.BlockSpec((1, SEQ, D_MODEL), lambda b, l: (0, 0, 0)),     # position
            pl.BlockSpec((1, D_MODEL, 3 * HDP), lambda b, l: (l, 0, 0)), # Wqkv (per layer)
            pl.BlockSpec((1, 1, 3 * HDP), lambda b, l: (l, 0, 0)),       # bqkv
            pl.BlockSpec((1, HDP, D_MODEL), lambda b, l: (l, 0, 0)),     # Wo
            pl.BlockSpec((1, 1, D_MODEL), lambda b, l: (l, 0, 0)),       # bo
            pl.BlockSpec((1, 4, D_MODEL), lambda b, l: (l, 0, 0)),       # LN params
            pl.BlockSpec((1, D_MODEL, D_FF), lambda b, l: (l, 0, 0)),    # W1 (FFN)
            pl.BlockSpec((1, 1, D_FF), lambda b, l: (l, 0, 0)),          # b1
            pl.BlockSpec((1, D_FF, D_MODEL), lambda b, l: (l, 0, 0)),    # W2
            pl.BlockSpec((1, 1, D_MODEL), lambda b, l: (l, 0, 0)),       # b2
            pl.BlockSpec((1, D_MODEL), lambda b, l: (0, 0)),             # conv2 W
            pl.BlockSpec((1, 1), lambda b, l: (0, 0)),                   # conv2 b
        ],
        out_specs=(
            pl.BlockSpec((1, 1, L), lambda b, l: (b, 0, 0)),
            pl.BlockSpec((1, N_HEADS, SEQ, SEQ), lambda b, l: (l * B + b, 0, 0, 0)),
        ),
        scratch_shapes=[pltpu.VMEM((SEQ, D_MODEL), jnp.float32)],   # activation carry
        compiler_params=pltpu.CompilerParams(
            dimension_semantics=("parallel", "arbitrary")),
    )(
        xcol, params["conv1_w_col"], params["conv1_b"], params["position"],
        params["wqkv"], params["bqkv"], params["wo"], params["bo"], params["ln"],
        params["w1"], params["b1"], params["w2"], params["b2"],
        params["conv2_w"], params["conv2_b"],
    )
    weights = attn_flat.reshape(N_LAYERS, B, N_HEADS, SEQ, SEQ)
    return out, weights


# ----------------------------------------------------------------------------
# Parameter init (deterministic, synthetic), pre-packed for the fused kernel.
# ----------------------------------------------------------------------------
def init_params(key, c_in):
    keys = jax.random.split(key, 2 + N_LAYERS)
    s = 0.02

    conv1_w = jax.random.normal(keys[0], (D_MODEL, c_in, K1), jnp.float32) * s
    # im2col layout: column index = k*Cin + cin, matching xcol row ordering.
    conv1_w_col = jnp.transpose(conv1_w, (0, 2, 1)).reshape(D_MODEL, K1 * c_in)

    wqkv_l, wo_l, ln_l, w1_l, w2_l = [], [], [], [], []
    for i in range(N_LAYERS):
        lk = jax.random.split(keys[2 + i], 4)
        # true per-head projection width is D_HEAD=5; zero-pad to D_HEAD_P=8 (exact).
        wqkv = jax.random.normal(lk[0], (3, N_HEADS, D_MODEL, D_HEAD), jnp.float32) * s
        wqkv = jnp.pad(wqkv, ((0, 0), (0, 0), (0, 0), (0, D_HEAD_P - D_HEAD)))
        # pack -> (D, 3*H*dkp), column = qkv*H*dkp + head*dkp + d
        wqkv_l.append(jnp.transpose(wqkv, (2, 0, 1, 3)).reshape(D_MODEL, 3 * HDP))

        wo = jax.random.normal(lk[1], (N_HEADS, D_HEAD, D_MODEL), jnp.float32) * s
        wo = jnp.pad(wo, ((0, 0), (0, D_HEAD_P - D_HEAD), (0, 0)))   # zero rows for pad dims
        wo_l.append(wo.reshape(HDP, D_MODEL))

        ln_l.append(jnp.stack([jnp.ones(D_MODEL), jnp.zeros(D_MODEL),
                               jnp.ones(D_MODEL), jnp.zeros(D_MODEL)]).astype(jnp.float32))
        w1_l.append(jax.random.normal(lk[2], (D_MODEL, D_FF), jnp.float32) * s)
        w2_l.append(jax.random.normal(lk[3], (D_FF, D_MODEL), jnp.float32) * s)

    return {
        "conv1_w_col": conv1_w_col,                                   # (32, 3*Cin)
        "conv1_b": jnp.zeros((D_MODEL, 1), jnp.float32),
        "position": jnp.zeros((1, SEQ, D_MODEL), jnp.float32),        # torch.zeros(1,32,32)
        "conv2_w": jax.random.normal(keys[1], (1, D_MODEL), jnp.float32) * s,
        "conv2_b": jnp.zeros((1, 1), jnp.float32),
        "wqkv": jnp.stack(wqkv_l),                                    # (L, 32, 144)
        "bqkv": jnp.zeros((N_LAYERS, 1, 3 * HDP), jnp.float32),
        "wo": jnp.stack(wo_l),                                        # (L, 48, 32)
        "bo": jnp.zeros((N_LAYERS, 1, D_MODEL), jnp.float32),
        "ln": jnp.stack(ln_l),                                        # (L, 4, 32)
        "w1": jnp.stack(w1_l),                                        # (L, 32, 128)
        "b1": jnp.zeros((N_LAYERS, 1, D_FF), jnp.float32),
        "w2": jnp.stack(w2_l),                                        # (L, 128, 32)
        "b2": jnp.zeros((N_LAYERS, 1, D_MODEL), jnp.float32),
    }


if __name__ == "__main__":
    key = jax.random.PRNGKey(0)
    k_param, k_in = jax.random.split(key)

    B, C_IN = 2, 4
    x = jax.random.normal(k_in, (B, C_IN, SEQ), jnp.float32)
    params = init_params(k_param, C_IN)

    forward = jax.jit(adaptive_transformer_forward)
    out, weights = forward(x, params)
    jax.block_until_ready((out, weights))

    assert out.shape == (B, 1, SEQ)
    assert weights.shape == (N_LAYERS, B, N_HEADS, SEQ, SEQ)
    print("KERNEL_OK")
</pallas_src>

<mosaic_0001>
module attributes {stable_mosaic.version = 11 : i64} {
  func.func @fused_forward_kernel(%arg0: i32, %arg1: i32, %arg2: memref<1x12x32xf32, #tpu.memory_space<vmem>>, %arg3: memref<32x12xf32, #tpu.memory_space<vmem>>, %arg4: memref<32x1xf32, #tpu.memory_space<vmem>>, %arg5: memref<1x32x32xf32, #tpu.memory_space<vmem>>, %arg6: memref<1x32x144xf32, #tpu.memory_space<vmem>>, %arg7: memref<1x1x144xf32, #tpu.memory_space<vmem>>, %arg8: memref<1x48x32xf32, #tpu.memory_space<vmem>>, %arg9: memref<1x1x32xf32, #tpu.memory_space<vmem>>, %arg10: memref<1x4x32xf32, #tpu.memory_space<vmem>>, %arg11: memref<1x32x128xf32, #tpu.memory_space<vmem>>, %arg12: memref<1x1x128xf32, #tpu.memory_space<vmem>>, %arg13: memref<1x128x32xf32, #tpu.memory_space<vmem>>, %arg14: memref<1x1x32xf32, #tpu.memory_space<vmem>>, %arg15: memref<1x32xf32, #tpu.memory_space<vmem>>, %arg16: memref<1x1xf32, #tpu.memory_space<vmem>>, %arg17: memref<1x1x32xf32, #tpu.memory_space<vmem>>, %arg18: memref<1x6x32x32xf32, #tpu.memory_space<vmem>>, %arg19: memref<32x32xf32, #tpu.memory_space<vmem>>) attributes {dimension_semantics = [#tpu.dimension_semantics<parallel>, #tpu.dimension_semantics<arbitrary>], iteration_bounds = array<i64: 2, 6>, scalar_prefetch = 0 : i64, scratch_operands = 1 : i64, tpu.core_type = #tpu.core_type<tc>, window_params = [{transform_indices = @transform_0, window_bounds = array<i64: 1, 12, 32>}, {pipeline_mode = #tpu.pipeline_mode<synchronous>, transform_indices = @transform_1, window_bounds = array<i64: 32, 12>}, {pipeline_mode = #tpu.pipeline_mode<synchronous>, transform_indices = @transform_2, window_bounds = array<i64: 32, 1>}, {pipeline_mode = #tpu.pipeline_mode<synchronous>, transform_indices = @transform_3, window_bounds = array<i64: 1, 32, 32>}, {transform_indices = @transform_4, window_bounds = array<i64: 1, 32, 144>}, {transform_indices = @transform_5, window_bounds = array<i64: 1, 1, 144>}, {transform_indices = @transform_6, window_bounds = array<i64: 1, 48, 32>}, {transform_indices = @transform_7, window_bounds = array<i64: 1, 1, 32>}, {transform_indices = @transform_8, window_bounds = array<i64: 1, 4, 32>}, {transform_indices = @transform_9, window_bounds = array<i64: 1, 32, 128>}, {transform_indices = @transform_10, window_bounds = array<i64: 1, 1, 128>}, {transform_indices = @transform_11, window_bounds = array<i64: 1, 128, 32>}, {transform_indices = @transform_12, window_bounds = array<i64: 1, 1, 32>}, {pipeline_mode = #tpu.pipeline_mode<synchronous>, transform_indices = @transform_13, window_bounds = array<i64: 1, 32>}, {pipeline_mode = #tpu.pipeline_mode<synchronous>, transform_indices = @transform_14, window_bounds = array<i64: 1, 1>}, {transform_indices = @transform_15, window_bounds = array<i64: 1, 1, 32>}, {transform_indices = @transform_16, window_bounds = array<i64: 1, 6, 32, 32>}]} {
    %c0_i32 = arith.constant 0 : i32
    %0 = arith.cmpi eq, %arg1, %c0_i32 : i32
    %1 = arith.extui %0 : i1 to i32
    %c0_i32_0 = arith.constant 0 : i32
    %2 = arith.cmpi ne, %1, %c0_i32_0 : i32
    scf.if %2 {
      %c0_95 = arith.constant 0 : index
      %c0_96 = arith.constant 0 : index
      %217 = vector.load %arg3[%c0_95, %c0_96] : memref<32x12xf32, #tpu.memory_space<vmem>>, vector<32x12xf32>
      %c0_97 = arith.constant 0 : index
      %c0_98 = arith.constant 0 : index
      %c0_99 = arith.constant 0 : index
      %218 = vector.load %arg2[%c0_97, %c0_98, %c0_99] : memref<1x12x32xf32, #tpu.memory_space<vmem>>, vector<1x12x32xf32>
      %219 = vector.shape_cast %218 : vector<1x12x32xf32> to vector<12x32xf32>
      %cst_100 = arith.constant dense<0.000000e+00> : vector<32x32xf32>
      %220 = tpu.matmul %217, %219, %cst_100 {dimension_numbers = #tpu.dot_dimension_numbers<[1], [0], [0], [1], [0, 0, 1, 1], [], []>} : vector<32x12xf32>, vector<12x32xf32>, vector<32x32xf32> -> vector<32x32xf32>
      %c0_101 = arith.constant 0 : index
      %c0_102 = arith.constant 0 : index
      %221 = vector.load %arg4[%c0_101, %c0_102] : memref<32x1xf32, #tpu.memory_space<vmem>>, vector<32x1xf32>
      %222 = vector.broadcast %221 : vector<32x1xf32> to vector<32x32xf32>
      %223 = arith.addf %220, %222 : vector<32x32xf32>
      %c0_103 = arith.constant 0 : index
      %c0_104 = arith.constant 0 : index
      %c0_105 = arith.constant 0 : index
      %224 = vector.load %arg5[%c0_103, %c0_104, %c0_105] : memref<1x32x32xf32, #tpu.memory_space<vmem>>, vector<1x32x32xf32>
      %225 = vector.shape_cast %224 : vector<1x32x32xf32> to vector<32x32xf32>
      %226 = arith.addf %223, %225 : vector<32x32xf32>
      %c0_106 = arith.constant 0 : index
      %c0_107 = arith.constant 0 : index
      %227 = vector.load %arg19[%c0_106, %c0_107] : memref<32x32xf32, #tpu.memory_space<vmem>>, vector<32x32xf32>
      tpu.vector_store %arg19[%c0_106, %c0_107], %226 {strides = array<i32>} : memref<32x32xf32, #tpu.memory_space<vmem>>, vector<32x32xf32>,
    } else {
    }
    %c0 = arith.constant 0 : index
    %c0_1 = arith.constant 0 : index
    %3 = vector.load %arg19[%c0, %c0_1] : memref<32x32xf32, #tpu.memory_space<vmem>>, vector<32x32xf32>
    %c0_2 = arith.constant 0 : index
    %c0_3 = arith.constant 0 : index
    %c0_4 = arith.constant 0 : index
    %4 = vector.load %arg6[%c0_2, %c0_3, %c0_4] : memref<1x32x144xf32, #tpu.memory_space<vmem>>, vector<1x32x144xf32>
    %5 = vector.shape_cast %4 : vector<1x32x144xf32> to vector<32x144xf32>
    %c0_5 = arith.constant 0 : index
    %c0_6 = arith.constant 0 : index
    %c0_7 = arith.constant 0 : index
    %6 = vector.load %arg7[%c0_5, %c0_6, %c0_7] : memref<1x1x144xf32, #tpu.memory_space<vmem>>, vector<1x1x144xf32>
    %7 = vector.shape_cast %6 : vector<1x1x144xf32> to vector<1x144xf32>
    %c0_8 = arith.constant 0 : index
    %c0_9 = arith.constant 0 : index
    %c0_10 = arith.constant 0 : index
    %8 = vector.load %arg8[%c0_8, %c0_9, %c0_10] : memref<1x48x32xf32, #tpu.memory_space<vmem>>, vector<1x48x32xf32>
    %9 = vector.shape_cast %8 : vector<1x48x32xf32> to vector<48x32xf32>
    %c0_11 = arith.constant 0 : index
    %c0_12 = arith.constant 0 : index
    %c0_13 = arith.constant 0 : index
    %10 = vector.load %arg9[%c0_11, %c0_12, %c0_13] : memref<1x1x32xf32, #tpu.memory_space<vmem>>, vector<1x1x32xf32>
    %11 = vector.shape_cast %10 : vector<1x1x32xf32> to vector<1x32xf32>
    %c0_14 = arith.constant 0 : index
    %c0_15 = arith.constant 0 : index
    %c0_16 = arith.constant 0 : index
    %12 = vector.load %arg10[%c0_14, %c0_15, %c0_16] : memref<1x4x32xf32, #tpu.memory_space<vmem>>, vector<1x4x32xf32>
    %13 = vector.shape_cast %12 : vector<1x4x32xf32> to vector<4x32xf32>
    %cst = arith.constant dense<0.000000e+00> : vector<32x144xf32>
    %14 = tpu.matmul %3, %5, %cst {dimension_numbers = #tpu.dot_dimension_numbers<[1], [0], [0], [1], [0, 0, 1, 1], [], []>} : vector<32x32xf32>, vector<32x144xf32>, vector<32x144xf32> -> vector<32x144xf32>
    %15 = vector.broadcast %7 : vector<1x144xf32> to vector<32x144xf32>
    %16 = arith.addf %14, %15 : vector<32x144xf32>
    %17 = vector.extract_strided_slice %16 {offsets = [0, 0], sizes = [32, 8], strides = [1, 1]} : vector<32x144xf32> to vector<32x8xf32>
    %18 = vector.extract_strided_slice %16 {offsets = [0, 48], sizes = [32, 8], strides = [1, 1]} : vector<32x144xf32> to vector<32x8xf32>
    %19 = vector.extract_strided_slice %16 {offsets = [0, 96], sizes = [32, 8], strides = [1, 1]} : vector<32x144xf32> to vector<32x8xf32>
    %20 = tpu.transpose %18, [1, 0] : vector<32x8xf32> -> vector<8x32xf32>
    %cst_17 = arith.constant dense<0.000000e+00> : vector<32x32xf32>
    %21 = tpu.matmul %17, %20, %cst_17 {dimension_numbers = #tpu.dot_dimension_numbers<[1], [0], [0], [1], [0, 0, 1, 1], [], []>} : vector<32x8xf32>, vector<8x32xf32>, vector<32x32xf32> -> vector<32x32xf32>
    %cst_18 = arith.constant 0.44721359 : f32
    %22 = vector.broadcast %cst_18 : f32 to vector<32x32xf32>
    %23 = arith.mulf %21, %22 : vector<32x32xf32>
    %cst_19 = arith.constant dense<0xFF800000> : vector<32xf32>
    %24 = vector.multi_reduction <maximumf>, %23, %cst_19 [1] : vector<32x32xf32> to vector<32xf32>
    %25 = vector.shape_cast %24 : vector<32xf32> to vector<32x1xf32>
    %26 = vector.broadcast %25 : vector<32x1xf32> to vector<32x32xf32>
    %27 = arith.subf %23, %26 : vector<32x32xf32>
    %28 = math.exp %27 : vector<32x32xf32>
    %cst_20 = arith.constant dense<0.000000e+00> : vector<32xf32>
    %29 = vector.multi_reduction <add>, %28, %cst_20 [1] : vector<32x32xf32> to vector<32xf32>
    %30 = vector.shape_cast %29 : vector<32xf32> to vector<32x1xf32>
    %31 = tpu.reciprocal %30 {approx = true} : vector<32x1xf32> -> vector<32x1xf32>
    %32 = vector.broadcast %31 : vector<32x1xf32> to vector<32x32xf32>
    %33 = arith.mulf %28, %32 : vector<32x32xf32>
    %c0_21 = arith.constant 0 : index
    %c0_22 = arith.constant 0 : index
    %c0_23 = arith.constant 0 : index
    %c0_24 = arith.constant 0 : index
    %34 = vector.load %arg18[%c0_21, %c0_22, %c0_23, %c0_24] : memref<1x6x32x32xf32, #tpu.memory_space<vmem>>, vector<1x1x32x32xf32>
    %35 = vector.shape_cast %34 : vector<1x1x32x32xf32> to vector<32x32xf32>
    %36 = vector.shape_cast %33 : vector<32x32xf32> to vector<1x1x32x32xf32>
    tpu.vector_store %arg18[%c0_21, %c0_22, %c0_23, %c0_24], %36 {strides = array<i32>} : memref<1x6x32x32xf32, #tpu.memory_space<vmem>>, vector<1x1x32x32xf32>,
    %cst_25 = arith.constant dense<0.000000e+00> : vector<32x8xf32>
    %37 = tpu.matmul %33, %19, %cst_25 {dimension_numbers = #tpu.dot_dimension_numbers<[1], [0], [0], [1], [0, 0, 1, 1], [], []>} : vector<32x32xf32>, vector<32x8xf32>, vector<32x8xf32> -> vector<32x8xf32>
    %38 = vector.extract_strided_slice %16 {offsets = [0, 8], sizes = [32, 8], strides = [1, 1]} : vector<32x144xf32> to vector<32x8xf32>
    %39 = vector.extract_strided_slice %16 {offsets = [0, 56], sizes = [32, 8], strides = [1, 1]} : vector<32x144xf32> to vector<32x8xf32>
    %40 = vector.extract_strided_slice %16 {offsets = [0, 104], sizes = [32, 8], strides = [1, 1]} : vector<32x144xf32> to vector<32x8xf32>
    %41 = tpu.transpose %39, [1, 0] : vector<32x8xf32> -> vector<8x32xf32>
    %cst_26 = arith.constant dense<0.000000e+00> : vector<32x32xf32>
    %42 = tpu.matmul %38, %41, %cst_26 {dimension_numbers = #tpu.dot_dimension_numbers<[1], [0], [0], [1], [0, 0, 1, 1], [], []>} : vector<32x8xf32>, vector<8x32xf32>, vector<32x32xf32> -> vector<32x32xf32>
    %cst_27 = arith.constant 0.44721359 : f32
    %43 = vector.broadcast %cst_27 : f32 to vector<32x32xf32>
    %44 = arith.mulf %42, %43 : vector<32x32xf32>
    %cst_28 = arith.constant dense<0xFF800000> : vector<32xf32>
    %45 = vector.multi_reduction <maximumf>, %44, %cst_28 [1] : vector<32x32xf32> to vector<32xf32>
    %46 = vector.shape_cast %45 : vector<32xf32> to vector<32x1xf32>
    %47 = vector.broadcast %46 : vector<32x1xf32> to vector<32x32xf32>
    %48 = arith.subf %44, %47 : vector<32x32xf32>
    %49 = math.exp %48 : vector<32x32xf32>
    %cst_29 = arith.constant dense<0.000000e+00> : vector<32xf32>
    %50 = vector.multi_reduction <add>, %49, %cst_29 [1] : vector<32x32xf32> to vector<32xf32>
    %51 = vector.shape_cast %50 : vector<32xf32> to vector<32x1xf32>
    %52 = tpu.reciprocal %51 {approx = true} : vector<32x1xf32> -> vector<32x1xf32>
    %53 = vector.broadcast %52 : vector<32x1xf32> to vector<32x32xf32>
    %54 = arith.mulf %49, %53 : vector<32x32xf32>
    %c0_30 = arith.constant 0 : index
    %c1 = arith.constant 1 : index
    %c0_31 = arith.constant 0 : index
    %c0_32 = arith.constant 0 : index
    %55 = vector.load %arg18[%c0_30, %c1, %c0_31, %c0_32] : memref<1x6x32x32xf32, #tpu.memory_space<vmem>>, vector<1x1x32x32xf32>
    %56 = vector.shape_cast %55 : vector<1x1x32x32xf32> to vector<32x32xf32>
    %57 = vector.shape_cast %54 : vector<32x32xf32> to vector<1x1x32x32xf32>
    tpu.vector_store %arg18[%c0_30, %c1, %c0_31, %c0_32], %57 {strides = array<i32>} : memref<1x6x32x32xf32, #tpu.memory_space<vmem>>, vector<1x1x32x32xf32>,
    %cst_33 = arith.constant dense<0.000000e+00> : vector<32x8xf32>
    %58 = tpu.matmul %54, %40, %cst_33 {dimension_numbers = #tpu.dot_dimension_numbers<[1], [0], [0], [1], [0, 0, 1, 1], [], []>} : vector<32x32xf32>, vector<32x8xf32>, vector<32x8xf32> -> vector<32x8xf32>
    %59 = vector.extract_strided_slice %16 {offsets = [0, 16], sizes = [32, 8], strides = [1, 1]} : vector<32x144xf32> to vector<32x8xf32>
    %60 = vector.extract_strided_slice %16 {offsets = [0, 64], sizes = [32, 8], strides = [1, 1]} : vector<32x144xf32> to vector<32x8xf32>
    %61 = vector.extract_strided_slice %16 {offsets = [0, 112], sizes = [32, 8], strides = [1, 1]} : vector<32x144xf32> to vector<32x8xf32>
    %62 = tpu.transpose %60, [1, 0] : vector<32x8xf32> -> vector<8x32xf32>
    %cst_34 = arith.constant dense<0.000000e+00> : vector<32x32xf32>
    %63 = tpu.matmul %59, %62, %cst_34 {dimension_numbers = #tpu.dot_dimension_numbers<[1], [0], [0], [1], [0, 0, 1, 1], [], []>} : vector<32x8xf32>, vector<8x32xf32>, vector<32x32xf32> -> vector<32x32xf32>
    %cst_35 = arith.constant 0.44721359 : f32
    %64 = vector.broadcast %cst_35 : f32 to vector<32x32xf32>
    %65 = arith.mulf %63, %64 : vector<32x32xf32>
    %cst_36 = arith.constant dense<0xFF800000> : vector<32xf32>
    %66 = vector.multi_reduction <maximumf>, %65, %cst_36 [1] : vector<32x32xf32> to vector<32xf32>
    %67 = vector.shape_cast %66 : vector<32xf32> to vector<32x1xf32>
    %68 = vector.broadcast %67 : vector<32x1xf32> to vector<32x32xf32>
    %69 = arith.subf %65, %68 : vector<32x32xf32>
    %70 = math.exp %69 : vector<32x32xf32>
    %cst_37 = arith.constant dense<0.000000e+00> : vector<32xf32>
    %71 = vector.multi_reduction <add>, %70, %cst_37 [1] : vector<32x32xf32> to vector<32xf32>
    %72 = vector.shape_cast %71 : vector<32xf32> to vector<32x1xf32>
    %73 = tpu.reciprocal %72 {approx = true} : vector<32x1xf32> -> vector<32x1xf32>
    %74 = vector.broadcast %73 : vector<32x1xf32> to vector<32x32xf32>
    %75 = arith.mulf %70, %74 : vector<32x32xf32>
    %c0_38 = arith.constant 0 : index
    %c2 = arith.constant 2 : index
    %c0_39 = arith.constant 0 : index
    %c0_40 = arith.constant 0 : index
    %76 = vector.load %arg18[%c0_38, %c2, %c0_39, %c0_40] : memref<1x6x32x32xf32, #tpu.memory_space<vmem>>, vector<1x1x32x32xf32>
    %77 = vector.shape_cast %76 : vector<1x1x32x32xf32> to vector<32x32xf32>
    %78 = vector.shape_cast %75 : vector<32x32xf32> to vector<1x1x32x32xf32>
    tpu.vector_store %arg18[%c0_38, %c2, %c0_39, %c0_40], %78 {strides = array<i32>} : memref<1x6x32x32xf32, #tpu.memory_space<vmem>>, vector<1x1x32x32xf32>,
    %cst_41 = arith.constant dense<0.000000e+00> : vector<32x8xf32>
    %79 = tpu.matmul %75, %61, %cst_41 {dimension_numbers = #tpu.dot_dimension_numbers<[1], [0], [0], [1], [0, 0, 1, 1], [], []>} : vector<32x32xf32>, vector<32x8xf32>, vector<32x8xf32> -> vector<32x8xf32>
    %80 = vector.extract_strided_slice %16 {offsets = [0, 24], sizes = [32, 8], strides = [1, 1]} : vector<32x144xf32> to vector<32x8xf32>
    %81 = vector.extract_strided_slice %16 {offsets = [0, 72], sizes = [32, 8], strides = [1, 1]} : vector<32x144xf32> to vector<32x8xf32>
    %82 = vector.extract_strided_slice %16 {offsets = [0, 120], sizes = [32, 8], strides = [1, 1]} : vector<32x144xf32> to vector<32x8xf32>
    %83 = tpu.transpose %81, [1, 0] : vector<32x8xf32> -> vector<8x32xf32>
    %cst_42 = arith.constant dense<0.000000e+00> : vector<32x32xf32>
    %84 = tpu.matmul %80, %83, %cst_42 {dimension_numbers = #tpu.dot_dimension_numbers<[1], [0], [0], [1], [0, 0, 1, 1], [], []>} : vector<32x8xf32>, vector<8x32xf32>, vector<32x32xf32> -> vector<32x32xf32>
    %cst_43 = arith.constant 0.44721359 : f32
    %85 = vector.broadcast %cst_43 : f32 to vector<32x32xf32>
    %86 = arith.mulf %84, %85 : vector<32x32xf32>
    %cst_44 = arith.constant dense<0xFF800000> : vector<32xf32>
    %87 = vector.multi_reduction <maximumf>, %86, %cst_44 [1] : vector<32x32xf32> to vector<32xf32>
    %88 = vector.shape_cast %87 : vector<32xf32> to vector<32x1xf32>
    %89 = vector.broadcast %88 : vector<32x1xf32> to vector<32x32xf32>
    %90 = arith.subf %86, %89 : vector<32x32xf32>
    %91 = math.exp %90 : vector<32x32xf32>
    %cst_45 = arith.constant dense<0.000000e+00> : vector<32xf32>
    %92 = vector.multi_reduction <add>, %91, %cst_45 [1] : vector<32x32xf32> to vector<32xf32>
    %93 = vector.shape_cast %92 : vector<32xf32> to vector<32x1xf32>
    %94 = tpu.reciprocal %93 {approx = true} : vector<32x1xf32> -> vector<32x1xf32>
    %95 = vector.broadcast %94 : vector<32x1xf32> to vector<32x32xf32>
    %96 = arith.mulf %91, %95 : vector<32x32xf32>
    %c0_46 = arith.constant 0 : index
    %c3 = arith.constant 3 : index
    %c0_47 = arith.constant 0 : index
    %c0_48 = arith.constant 0 : index
    %97 = vector.load %arg18[%c0_46, %c3, %c0_47, %c0_48] : memref<1x6x32x32xf32, #tpu.memory_space<vmem>>, vector<1x1x32x32xf32>
    %98 = vector.shape_cast %97 : vector<1x1x32x32xf32> to vector<32x32xf32>
    %99 = vector.shape_cast %96 : vector<32x32xf32> to vector<1x1x32x32xf32>
    tpu.vector_store %arg18[%c0_46, %c3, %c0_47, %c0_48], %99 {strides = array<i32>} : memref<1x6x32x32xf32, #tpu.memory_space<vmem>>, vector<1x1x32x32xf32>,
    %cst_49 = arith.constant dense<0.000000e+00> : vector<32x8xf32>
    %100 = tpu.matmul %96, %82, %cst_49 {dimension_numbers = #tpu.dot_dimension_numbers<[1], [0], [0], [1], [0, 0, 1, 1], [], []>} : vector<32x32xf32>, vector<32x8xf32>, vector<32x8xf32> -> vector<32x8xf32>
    %101 = vector.extract_strided_slice %16 {offsets = [0, 32], sizes = [32, 8], strides = [1, 1]} : vector<32x144xf32> to vector<32x8xf32>
    %102 = vector.extract_strided_slice %16 {offsets = [0, 80], sizes = [32, 8], strides = [1, 1]} : vector<32x144xf32> to vector<32x8xf32>
    %103 = vector.extract_strided_slice %16 {offsets = [0, 128], sizes = [32, 8], strides = [1, 1]} : vector<32x144xf32> to vector<32x8xf32>
    %104 = tpu.transpose %102, [1, 0] : vector<32x8xf32> -> vector<8x32xf32>
    %cst_50 = arith.constant dense<0.000000e+00> : vector<32x32xf32>
    %105 = tpu.matmul %101, %104, %cst_50 {dimension_numbers = #tpu.dot_dimension_numbers<[1], [0], [0], [1], [0, 0, 1, 1], [], []>} : vector<32x8xf32>, vector<8x32xf32>, vector<32x32xf32> -> vector<32x32xf32>
    %cst_51 = arith.constant 0.44721359 : f32
    %106 = vector.broadcast %cst_51 : f32 to vector<32x32xf32>
    %107 = arith.mulf %105, %106 : vector<32x32xf32>
    %cst_52 = arith.constant dense<0xFF800000> : vector<32xf32>
    %108 = vector.multi_reduction <maximumf>, %107, %cst_52 [1] : vector<32x32xf32> to vector<32xf32>
    %109 = vector.shape_cast %108 : vector<32xf32> to vector<32x1xf32>
    %110 = vector.broadcast %109 : vector<32x1xf32> to vector<32x32xf32>
    %111 = arith.subf %107, %110 : vector<32x32xf32>
    %112 = math.exp %111 : vector<32x32xf32>
    %cst_53 = arith.constant dense<0.000000e+00> : vector<32xf32>
    %113 = vector.multi_reduction <add>, %112, %cst_53 [1] : vector<32x32xf32> to vector<32xf32>
    %114 = vector.shape_cast %113 : vector<32xf32> to vector<32x1xf32>
    %115 = tpu.reciprocal %114 {approx = true} : vector<32x1xf32> -> vector<32x1xf32>
    %116 = vector.broadcast %115 : vector<32x1xf32> to vector<32x32xf32>
    %117 = arith.mulf %112, %116 : vector<32x32xf32>
    %c0_54 = arith.constant 0 : index
    %c4 = arith.constant 4 : index
    %c0_55 = arith.constant 0 : index
    %c0_56 = arith.constant 0 : index
    %118 = vector.load %arg18[%c0_54, %c4, %c0_55, %c0_56] : memref<1x6x32x32xf32, #tpu.memory_space<vmem>>, vector<1x1x32x32xf32>
    %119 = vector.shape_cast %118 : vector<1x1x32x32xf32> to vector<32x32xf32>
    %120 = vector.shape_cast %117 : vector<32x32xf32> to vector<1x1x32x32xf32>
    tpu.vector_store %arg18[%c0_54, %c4, %c0_55, %c0_56], %120 {strides = array<i32>} : memref<1x6x32x32xf32, #tpu.memory_space<vmem>>, vector<1x1x32x32xf32>,
    %cst_57 = arith.constant dense<0.000000e+00> : vector<32x8xf32>
    %121 = tpu.matmul %117, %103, %cst_57 {dimension_numbers = #tpu.dot_dimension_numbers<[1], [0], [0], [1], [0, 0, 1, 1], [], []>} : vector<32x32xf32>, vector<32x8xf32>, vector<32x8xf32> -> vector<32x8xf32>
    %122 = vector.extract_strided_slice %16 {offsets = [0, 40], sizes = [32, 8], strides = [1, 1]} : vector<32x144xf32> to vector<32x8xf32>
    %123 = vector.extract_strided_slice %16 {offsets = [0, 88], sizes = [32, 8], strides = [1, 1]} : vector<32x144xf32> to vector<32x8xf32>
    %124 = vector.extract_strided_slice %16 {offsets = [0, 136], sizes = [32, 8], strides = [1, 1]} : vector<32x144xf32> to vector<32x8xf32>
    %125 = tpu.transpose %123, [1, 0] : vector<32x8xf32> -> vector<8x32xf32>
    %cst_58 = arith.constant dense<0.000000e+00> : vector<32x32xf32>
    %126 = tpu.matmul %122, %125, %cst_58 {dimension_numbers = #tpu.dot_dimension_numbers<[1], [0], [0], [1], [0, 0, 1, 1], [], []>} : vector<32x8xf32>, vector<8x32xf32>, vector<32x32xf32> -> vector<32x32xf32>
    %cst_59 = arith.constant 0.44721359 : f32
    %127 = vector.broadcast %cst_59 : f32 to vector<32x32xf32>
    %128 = arith.mulf %126, %127 : vector<32x32xf32>
    %cst_60 = arith.constant dense<0xFF800000> : vector<32xf32>
    %129 = vector.multi_reduction <maximumf>, %128, %cst_60 [1] : vector<32x32xf32> to vector<32xf32>
    %130 = vector.shape_cast %129 : vector<32xf32> to vector<32x1xf32>
    %131 = vector.broadcast %130 : vector<32x1xf32> to vector<32x32xf32>
    %132 = arith.subf %128, %131 : vector<32x32xf32>
    %133 = math.exp %132 : vector<32x32xf32>
    %cst_61 = arith.constant dense<0.000000e+00> : vector<32xf32>
    %134 = vector.multi_reduction <add>, %133, %cst_61 [1] : vector<32x32xf32> to vector<32xf32>
    %135 = vector.shape_cast %134 : vector<32xf32> to vector<32x1xf32>
    %136 = tpu.reciprocal %135 {approx = true} : vector<32x1xf32> -> vector<32x1xf32>
    %137 = vector.broadcast %136 : vector<32x1xf32> to vector<32x32xf32>
    %138 = arith.mulf %133, %137 : vector<32x32xf32>
    %c0_62 = arith.constant 0 : index
    %c5 = arith.constant 5 : index
    %c0_63 = arith.constant 0 : index
    %c0_64 = arith.constant 0 : index
    %139 = vector.load %arg18[%c0_62, %c5, %c0_63, %c0_64] : memref<1x6x32x32xf32, #tpu.memory_space<vmem>>, vector<1x1x32x32xf32>
    %140 = vector.shape_cast %139 : vector<1x1x32x32xf32> to vector<32x32xf32>
    %141 = vector.shape_cast %138 : vector<32x32xf32> to vector<1x1x32x32xf32>
    tpu.vector_store %arg18[%c0_62, %c5, %c0_63, %c0_64], %141 {strides = array<i32>} : memref<1x6x32x32xf32, #tpu.memory_space<vmem>>, vector<1x1x32x32xf32>,
    %cst_65 = arith.constant dense<0.000000e+00> : vector<32x8xf32>
    %142 = tpu.matmul %138, %124, %cst_65 {dimension_numbers = #tpu.dot_dimension_numbers<[1], [0], [0], [1], [0, 0, 1, 1], [], []>} : vector<32x32xf32>, vector<32x8xf32>, vector<32x8xf32> -> vector<32x8xf32>
    %143 = tpu.concatenate %37, %58, %79, %100, %121, %142 in 1 : vector<32x8xf32>, vector<32x8xf32>, vector<32x8xf32>, vector<32x8xf32>, vector<32x8xf32>, vector<32x8xf32> -> vector<32x48xf32>
    %cst_66 = arith.constant dense<0.000000e+00> : vector<32x32xf32>
    %144 = tpu.matmul %143, %9, %cst_66 {dimension_numbers = #tpu.dot_dimension_numbers<[1], [0], [0], [1], [0, 0, 1, 1], [], []>} : vector<32x48xf32>, vector<48x32xf32>, vector<32x32xf32> -> vector<32x32xf32>
    %145 = vector.broadcast %11 : vector<1x32xf32> to vector<32x32xf32>
    %146 = arith.addf %144, %145 : vector<32x32xf32>
    %147 = arith.addf %3, %146 : vector<32x32xf32>
    %cst_67 = arith.constant dense<0.000000e+00> : vector<32xf32>
    %148 = vector.multi_reduction <add>, %147, %cst_67 [1] : vector<32x32xf32> to vector<32xf32>
    %149 = vector.shape_cast %148 : vector<32xf32> to vector<32x1xf32>
    %cst_68 = arith.constant 3.200000e+01 : f32
    %150 = vector.broadcast %cst_68 : f32 to vector<32x1xf32>
    %151 = arith.divf %149, %150 : vector<32x1xf32>
    %152 = vector.broadcast %151 : vector<32x1xf32> to vector<32x32xf32>
    %153 = arith.subf %147, %152 : vector<32x32xf32>
    %154 = arith.mulf %153, %153 : vector<32x32xf32>
    %cst_69 = arith.constant dense<0.000000e+00> : vector<32xf32>
    %155 = vector.multi_reduction <add>, %154, %cst_69 [1] : vector<32x32xf32> to vector<32xf32>
    %156 = vector.shape_cast %155 : vector<32xf32> to vector<32x1xf32>
    %cst_70 = arith.constant 3.200000e+01 : f32
    %157 = vector.broadcast %cst_70 : f32 to vector<32x1xf32>
    %158 = arith.divf %156, %157 : vector<32x1xf32>
    %159 = vector.broadcast %151 : vector<32x1xf32> to vector<32x32xf32>
    %160 = arith.subf %147, %159 : vector<32x32xf32>
    %cst_71 = arith.constant 9.99999974E-6 : f32
    %161 = vector.broadcast %cst_71 : f32 to vector<32x1xf32>
    %162 = arith.addf %158, %161 : vector<32x1xf32>
    %163 = math.rsqrt %162 : vector<32x1xf32>
    %164 = vector.broadcast %163 : vector<32x1xf32> to vector<32x32xf32>
    %165 = arith.mulf %160, %164 : vector<32x32xf32>
    %166 = vector.extract_strided_slice %13 {offsets = [0, 0], sizes = [1, 32], strides = [1, 1]} : vector<4x32xf32> to vector<1x32xf32>
    %167 = vector.broadcast %166 : vector<1x32xf32> to vector<32x32xf32>
    %168 = arith.mulf %165, %167 : vector<32x32xf32>
    %169 = vector.extract_strided_slice %13 {offsets = [1, 0], sizes = [1, 32], strides = [1, 1]} : vector<4x32xf32> to vector<1x32xf32>
    %170 = vector.broadcast %169 : vector<1x32xf32> to vector<32x32xf32>
    %171 = arith.addf %168, %170 : vector<32x32xf32>
    %c0_72 = arith.constant 0 : index
    %c0_73 = arith.constant 0 : index
    %c0_74 = arith.constant 0 : index
    %172 = vector.load %arg11[%c0_72, %c0_73, %c0_74] : memref<1x32x128xf32, #tpu.memory_space<vmem>>, vector<1x32x128xf32>
    %173 = vector.shape_cast %172 : vector<1x32x128xf32> to vector<32x128xf32>
    %cst_75 = arith.constant dense<0.000000e+00> : vector<32x128xf32>
    %174 = tpu.matmul %171, %173, %cst_75 {dimension_numbers = #tpu.dot_dimension_numbers<[1], [0], [0], [1], [0, 0, 1, 1], [], []>} : vector<32x32xf32>, vector<32x128xf32>, vector<32x128xf32> -> vector<32x128xf32>
    %c0_76 = arith.constant 0 : index
    %c0_77 = arith.constant 0 : index
    %c0_78 = arith.constant 0 : index
    %175 = vector.load %arg12[%c0_76, %c0_77, %c0_78] : memref<1x1x128xf32, #tpu.memory_space<vmem>>, vector<1x1x128xf32>
    %176 = vector.shape_cast %175 : vector<1x1x128xf32> to vector<1x128xf32>
    %177 = vector.broadcast %176 : vector<1x128xf32> to vector<32x128xf32>
    %178 = arith.addf %174, %177 : vector<32x128xf32>
    %cst_79 = arith.constant 0.000000e+00 : f32
    %179 = vector.broadcast %cst_79 : f32 to vector<32x128xf32>
    %180 = arith.maximumf %178, %179 : vector<32x128xf32>
    %c0_80 = arith.constant 0 : index
    %c0_81 = arith.constant 0 : index
    %c0_82 = arith.constant 0 : index
    %181 = vector.load %arg13[%c0_80, %c0_81, %c0_82] : memref<1x128x32xf32, #tpu.memory_space<vmem>>, vector<1x128x32xf32>
    %182 = vector.shape_cast %181 : vector<1x128x32xf32> to vector<128x32xf32>
    %cst_83 = arith.constant dense<0.000000e+00> : vector<32x32xf32>
    %183 = tpu.matmul %180, %182, %cst_83 {dimension_numbers = #tpu.dot_dimension_numbers<[1], [0], [0], [1], [0, 0, 1, 1], [], []>} : vector<32x128xf32>, vector<128x32xf32>, vector<32x32xf32> -> vector<32x32xf32>
    %c0_84 = arith.constant 0 : index
    %c0_85 = arith.constant 0 : index
    %c0_86 = arith.constant 0 : index
    %184 = vector.load %arg14[%c0_84, %c0_85, %c0_86] : memref<1x1x32xf32, #tpu.memory_space<vmem>>, vector<1x1x32xf32>
    %185 = vector.shape_cast %184 : vector<1x1x32xf32> to vector<1x32xf32>
    %186 = vector.broadcast %185 : vector<1x32xf32> to vector<32x32xf32>
    %187 = arith.addf %183, %186 : vector<32x32xf32>
    %188 = arith.addf %171, %187 : vector<32x32xf32>
    %cst_87 = arith.constant dense<0.000000e+00> : vector<32xf32>
    %189 = vector.multi_reduction <add>, %188, %cst_87 [1] : vector<32x32xf32> to vector<32xf32>
    %190 = vector.shape_cast %189 : vector<32xf32> to vector<32x1xf32>
    %cst_88 = arith.constant 3.200000e+01 : f32
    %191 = vector.broadcast %cst_88 : f32 to vector<32x1xf32>
    %192 = arith.divf %190, %191 : vector<32x1xf32>
    %193 = vector.broadcast %192 : vector<32x1xf32> to vector<32x32xf32>
    %194 = arith.subf %188, %193 : vector<32x32xf32>
    %195 = arith.mulf %194, %194 : vector<32x32xf32>
    %cst_89 = arith.constant dense<0.000000e+00> : vector<32xf32>
    %196 = vector.multi_reduction <add>, %195, %cst_89 [1] : vector<32x32xf32> to vector<32xf32>
    %197 = vector.shape_cast %196 : vector<32xf32> to vector<32x1xf32>
    %cst_90 = arith.constant 3.200000e+01 : f32
    %198 = vector.broadcast %cst_90 : f32 to vector<32x1xf32>
    %199 = arith.divf %197, %198 : vector<32x1xf32>
    %200 = vector.broadcast %192 : vector<32x1xf32> to vector<32x32xf32>
    %201 = arith.subf %188, %200 : vector<32x32xf32>
    %cst_91 = arith.constant 9.99999974E-6 : f32
    %202 = vector.broadcast %cst_91 : f32 to vector<32x1xf32>
    %203 = arith.addf %199, %202 : vector<32x1xf32>
    %204 = math.rsqrt %203 : vector<32x1xf32>
    %205 = vector.broadcast %204 : vector<32x1xf32> to vector<32x32xf32>
    %206 = arith.mulf %201, %205 : vector<32x32xf32>
    %207 = vector.extract_strided_slice %13 {offsets = [2, 0], sizes = [1, 32], strides = [1, 1]} : vector<4x32xf32> to vector<1x32xf32>
    %208 = vector.broadcast %207 : vector<1x32xf32> to vector<32x32xf32>
    %209 = arith.mulf %206, %208 : vector<32x32xf32>
    %210 = vector.extract_strided_slice %13 {offsets = [3, 0], sizes = [1, 32], strides = [1, 1]} : vector<4x32xf32> to vector<1x32xf32>
    %211 = vector.broadcast %210 : vector<1x32xf32> to vector<32x32xf32>
    %212 = arith.addf %209, %211 : vector<32x32xf32>
    %c0_92 = arith.constant 0 : index
    %c0_93 = arith.constant 0 : index
    %213 = vector.load %arg19[%c0_92, %c0_93] : memref<32x32xf32, #tpu.memory_space<vmem>>, vector<32x32xf32>
    tpu.vector_store %arg19[%c0_92, %c0_93], %212 {strides = array<i32>} : memref<32x32xf32, #tpu.memory_space<vmem>>, vector<32x32xf32>,
    %c5_i32 = arith.constant 5 : i32
    %214 = arith.cmpi eq, %arg1, %c5_i32 : i32
    %215 = arith.extui %214 : i1 to i32
    %c0_i32_94 = arith.constant 0 : i32
    %216 = arith.cmpi ne, %215, %c0_i32_94 : i32
    scf.if %216 {
      %c0_95 = arith.constant 0 : index
      %c0_96 = arith.constant 0 : index
      %217 = vector.load %arg15[%c0_95, %c0_96] : memref<1x32xf32, #tpu.memory_space<vmem>>, vector<1x32xf32>
      %cst_97 = arith.constant dense<0.000000e+00> : vector<1x32xf32>
      %218 = tpu.matmul %217, %212, %cst_97 {dimension_numbers = #tpu.dot_dimension_numbers<[1], [0], [0], [1], [0, 0, 1, 1], [], []>} : vector<1x32xf32>, vector<32x32xf32>, vector<1x32xf32> -> vector<1x32xf32>
      %c0_98 = arith.constant 0 : index
      %c0_99 = arith.constant 0 : index
      %219 = vector.load %arg16[%c0_98, %c0_99] : memref<1x1xf32, #tpu.memory_space<vmem>>, vector<1x1xf32>
      %220 = vector.broadcast %219 : vector<1x1xf32> to vector<1x32xf32>
      %221 = arith.addf %218, %220 : vector<1x32xf32>
      %c0_100 = arith.constant 0 : index
      %c0_101 = arith.constant 0 : index
      %c0_102 = arith.constant 0 : index
      %222 = vector.load %arg17[%c0_100, %c0_101, %c0_102] : memref<1x1x32xf32, #tpu.memory_space<vmem>>, vector<1x1x32xf32>
      %223 = vector.shape_cast %222 : vector<1x1x32xf32> to vector<1x32xf32>
      %224 = vector.shape_cast %221 : vector<1x32xf32> to vector<1x1x32xf32>
      tpu.vector_store %arg17[%c0_100, %c0_101, %c0_102], %224 {strides = array<i32>} : memref<1x1x32xf32, #tpu.memory_space<vmem>>, vector<1x1x32xf32>,
    } else {
    }
    return
  }
  func.func @transform_0(%arg0: i32, %arg1: i32) -> (i32, i32, i32) {
    %c0_i32 = arith.constant 0 : i32
    %c0_i32_0 = arith.constant 0 : i32
    %c0_i32_1 = arith.constant 0 : i32
    return %arg0, %c0_i32, %c0_i32_0 : i32, i32, i32
  }
  func.func @transform_1(%arg0: i32, %arg1: i32) -> (i32, i32) {
    %c0_i32 = arith.constant 0 : i32
    %c0_i32_0 = arith.constant 0 : i32
    %c0_i32_1 = arith.constant 0 : i32
    return %c0_i32, %c0_i32_0 : i32, i32
  }
  func.func @transform_2(%arg0: i32, %arg1: i32) -> (i32, i32) {
    %c0_i32 = arith.constant 0 : i32
    %c0_i32_0 = arith.constant 0 : i32
    %c0_i32_1 = arith.constant 0 : i32
    return %c0_i32, %c0_i32_0 : i32, i32
  }
  func.func @transform_3(%arg0: i32, %arg1: i32) -> (i32, i32, i32) {
    %c0_i32 = arith.constant 0 : i32
    %c0_i32_0 = arith.constant 0 : i32
    %c0_i32_1 = arith.constant 0 : i32
    %c0_i32_2 = arith.constant 0 : i32
    return %c0_i32, %c0_i32_0, %c0_i32_1 : i32, i32, i32
  }
  func.func @transform_4(%arg0: i32, %arg1: i32) -> (i32, i32, i32) {
    %c0_i32 = arith.constant 0 : i32
    %c0_i32_0 = arith.constant 0 : i32
    %c0_i32_1 = arith.constant 0 : i32
    return %arg1, %c0_i32, %c0_i32_0 : i32, i32, i32
  }
  func.func @transform_5(%arg0: i32, %arg1: i32) -> (i32, i32, i32) {
    %c0_i32 = arith.constant 0 : i32
    %c0_i32_0 = arith.constant 0 : i32
    %c0_i32_1 = arith.constant 0 : i32
    return %arg1, %c0_i32, %c0_i32_0 : i32, i32, i32
  }
  func.func @transform_6(%arg0: i32, %arg1: i32) -> (i32, i32, i32) {
    %c0_i32 = arith.constant 0 : i32
    %c0_i32_0 = arith.constant 0 : i32
    %c0_i32_1 = arith.constant 0 : i32
    return %arg1, %c0_i32, %c0_i32_0 : i32, i32, i32
  }
  func.func @transform_7(%arg0: i32, %arg1: i32) -> (i32, i32, i32) {
    %c0_i32 = arith.constant 0 : i32
    %c0_i32_0 = arith.constant 0 : i32
    %c0_i32_1 = arith.constant 0 : i32
    return %arg1, %c0_i32, %c0_i32_0 : i32, i32, i32
  }
  func.func @transform_8(%arg0: i32, %arg1: i32) -> (i32, i32, i32) {
    %c0_i32 = arith.constant 0 : i32
    %c0_i32_0 = arith.constant 0 : i32
    %c0_i32_1 = arith.constant 0 : i32
    return %arg1, %c0_i32, %c0_i32_0 : i32, i32, i32
  }
  func.func @transform_9(%arg0: i32, %arg1: i32) -> (i32, i32, i32) {
    %c0_i32 = arith.constant 0 : i32
    %c0_i32_0 = arith.constant 0 : i32
    %c0_i32_1 = arith.constant 0 : i32
    return %arg1, %c0_i32, %c0_i32_0 : i32, i32, i32
  }
  func.func @transform_10(%arg0: i32, %arg1: i32) -> (i32, i32, i32) {
    %c0_i32 = arith.constant 0 : i32
    %c0_i32_0 = arith.constant 0 : i32
    %c0_i32_1 = arith.constant 0 : i32
    return %arg1, %c0_i32, %c0_i32_0 : i32, i32, i32
  }
  func.func @transform_11(%arg0: i32, %arg1: i32) -> (i32, i32, i32) {
    %c0_i32 = arith.constant 0 : i32
    %c0_i32_0 = arith.constant 0 : i32
    %c0_i32_1 = arith.constant 0 : i32
    return %arg1, %c0_i32, %c0_i32_0 : i32, i32, i32
  }
  func.func @transform_12(%arg0: i32, %arg1: i32) -> (i32, i32, i32) {
    %c0_i32 = arith.constant 0 : i32
    %c0_i32_0 = arith.constant 0 : i32
    %c0_i32_1 = arith.constant 0 : i32
    return %arg1, %c0_i32, %c0_i32_0 : i32, i32, i32
  }
  func.func @transform_13(%arg0: i32, %arg1: i32) -> (i32, i32) {
    %c0_i32 = arith.constant 0 : i32
    %c0_i32_0 = arith.constant 0 : i32
    %c0_i32_1 = arith.constant 0 : i32
    return %c0_i32, %c0_i32_0 : i32, i32
  }
  func.func @transform_14(%arg0: i32, %arg1: i32) -> (i32, i32) {
    %c0_i32 = arith.constant 0 : i32
    %c0_i32_0 = arith.constant 0 : i32
    %c0_i32_1 = arith.constant 0 : i32
    return %c0_i32, %c0_i32_0 : i32, i32
  }
  func.func @transform_15(%arg0: i32, %arg1: i32) -> (i32, i32, i32) {
    %c0_i32 = arith.constant 0 : i32
    %c0_i32_0 = arith.constant 0 : i32
    %c0_i32_1 = arith.constant 0 : i32
    return %arg0, %c0_i32, %c0_i32_0 : i32, i32, i32
  }
  func.func @transform_16(%arg0: i32, %arg1: i32) -> (i32, i32, i32, i32) {
    %c2_i32 = arith.constant 2 : i32
    %0 = arith.muli %arg1, %c2_i32 : i32
    %1 = arith.addi %0, %arg0 : i32
    %c0_i32 = arith.constant 0 : i32
    %c0_i32_0 = arith.constant 0 : i32
    %c0_i32_1 = arith.constant 0 : i32
    %c0_i32_2 = arith.constant 0 : i32
    return %1, %c0_i32, %c0_i32_0, %c0_i32_1 : i32, i32, i32, i32
  }
}

</mosaic_0001>

<bundles_post_ra>
// kernel: adaptive_transformer_forward.1
= control target key start
LH: loop header
LB: loop body
LE: loop exit
PB: predicated region body
PF: predicated region fallthrough
CT: control target
= control target key end

     0   :  { %s6342_s0 = inlined_call_operand.vmem [shape: f32[2,12,32], index: 0, kind: input, shape index: {}]   ;;  %s6343_s1 = inlined_call_operand.vmem [shape: f32[32,12], index: 1, kind: input, shape index: {}]   ;;  %s6344_s2 = inlined_call_operand.vmem [shape: f32[32,1], index: 2, kind: input, shape index: {}]   ;;  %s6345_s3 = inlined_call_operand.hbm [shape: f32[1,32,32], index: 3, kind: input, shape index: {}]   ;;  %s6346_s4 = inlined_call_operand.hbm [shape: f32[6,32,144], index: 4, kind: input, shape index: {}]   ;;  %s6347_s5 = inlined_call_operand.hbm [shape: f32[6,1,144], index: 5, kind: input, shape index: {}]   ;;  %s6348_s6 = inlined_call_operand.vmem [shape: f32[6,48,32], index: 6, kind: input, shape index: {}]   ;;  %s6349_s7 = inlined_call_operand.hbm [shape: f32[6,1,32], index: 7, kind: input, shape index: {}]   ;;  %s6350_s8 = inlined_call_operand.hbm [shape: f32[6,4,32], index: 8, kind: input, shape index: {}]   ;;  %s6351_s9 = inlined_call_operand.hbm [shape: f32[6,32,128], index: 9, kind: input, shape index: {}]   ;;  %s6352_s10 = inlined_call_operand.hbm [shape: f32[6,1,128], index: 10, kind: input, shape index: {}]   ;;  %s6353_s11 = inlined_call_operand.vmem [shape: f32[6,128,32], index: 11, kind: input, shape index: {}]   ;;  %s6354_s12 = inlined_call_operand.hbm [shape: f32[6,1,32], index: 12, kind: input, shape index: {}]   ;;  %s6355_s13 = inlined_call_operand.hbm [shape: f32[1,32], index: 13, kind: input, shape index: {}]   ;;  %s6356_s14 = inlined_call_operand.<no memory space> [shape: f32[1,1], index: 14, kind: input, shape index: {}]   ;;  %s6357_s15 = inlined_call_operand.hbm [shape: f32[2,1,32], index: 15, kind: output, shape index: {0}]   ;;  %s6358_s16 = inlined_call_operand.hbm [shape: f32[12,6,32,32], index: 16, kind: output, shape index: {1}]  }
   0x1   :  { %6393 = sst [smem:[#allocation51_spill]] %s6342_s0  ;;  %v22_v0 = vstv %s6356_s14 }
   0x2   :  { %6394 = sst [smem:[#allocation52_spill]] %s6343_s1  ;;  %23 = vst [vmem:[#allocation3] sm:$0x1] %v22_v0 }
   0x3   :  { %6395 = sst [smem:[#allocation53_spill]] %s6344_s2 }
   0x4   :  { %6396 = sst [smem:[#allocation54_spill]] %s6345_s3 }
   0x5   :  { %6397 = sst [smem:[#allocation55_spill]] %s6346_s4 }
   0x6   :  { %6398 = sst [smem:[#allocation56_spill]] %s6347_s5 }
   0x7   :  { %6399 = sst [smem:[#allocation57_spill]] %s6348_s6 }
   0x8   :  { %6400 = sst [smem:[#allocation58_spill]] %s6349_s7 }
   0x9   :  { %6401 = sst [smem:[#allocation59_spill]] %s6350_s8 }
   0xa   :  { %6402 = sst [smem:[#allocation60_spill]] %s6353_s11 }
   0xb   :  { %6403 = sst [smem:[#allocation61_spill]] %s6355_s13 }
   0xc   :  { %6404 = sst [smem:[#allocation62_spill]] %s6357_s15 }
   0xd   :  { %6405 = sst [smem:[#allocation63_spill]] %s6358_s16 }
   0xe   :  { %24 = vsyncpa [#allocation5], 0 }
   0xf   :  { %25 = vsyncpa [#allocation8], 0 }
  0x10   :  { %27 = vsyncpa [#allocation8 + $0x1], 0 }
  0x11   :  { %28 = vsyncpa [#allocation11], 0 }
  0x12   :  { %30 = vsyncpa [#allocation11 + $0x1], 0 }
  0x13   :  { %31 = vsyncpa [#allocation14], 0 }
  0x14   :  { %33 = vsyncpa [#allocation14 + $0x1], 0 }
  0x15   :  { %34 = vsyncpa [#allocation17], 0 }
  0x16   :  { %36 = vsyncpa [#allocation17 + $0x1], 0 }
  0x17   :  { %37 = vsyncpa [#allocation6], 0 }
  0x18   :  { %39 = vsyncpa [#allocation6 + $0x1], 0 }
  0x19   :  { %40 = vsyncpa [#allocation21], 0 }
  0x1a   :  { %42 = vsyncpa [#allocation21 + $0x1], 0  ;;  %s5264_s23 = smov 0   ;;  %s5266_s24 = smov 0  }
  0x1b   :  { %s5268_s25 = smov 0   ;;  %s5270_s14 = smov 0  }
  0x1c   :  { %s5272_s26 = smov 0   ;;  %s5274_s27 = smov 0  }
  0x1d   :  { %s5276_s28 = smov 0   ;;  %s5278_s29 = smov 0  }
  0x1e   :  { %s5280_s30 = smov 0   ;;  %s5282_s0 = smov 0  }
  0x1f   :  { %s5284_s17 = smov 0   ;;  %s5286_s18 = smov 0  }
  0x20   :  { %s5288_s19 = smov 0   ;;  %s5290_s20 = smov 0  }
  0x21 LB: > { %6406 = sst [smem:[#allocation30_spill]] %s5086_s23  ;;  %s5333_s21 = sadd.s32 4294967295, %s5138_s20   ;;  %s5138_s20 = sphi %s5290_s20, %s48_s20   ;;  %s5134_s19 = sphi %s5288_s19, %s6496_s19   ;;  %s5130_s18 = sphi %s5286_s18, %s6501_s18   ;;  %s5126_s17 = sphi %s5284_s17, %s6494_s17   ;;  %s5122_s0 = sphi %s5282_s0, %s6500_s0   ;;  %s5118_s30 = sphi %s5280_s30, %s6499_s30   ;;  %s5114_s29 = sphi %s5278_s29, %s6492_s29   ;;  %s5110_s28 = sphi %s5276_s28, %s6491_s28   ;;  %s5106_s27 = sphi %s5274_s27, %s6490_s27   ;;  %s5102_s26 = sphi %s5272_s26, %s6498_s26   ;;  %s5098_s14 = sphi %s5270_s14, %s6497_s14   ;;  %s5094_s25 = sphi %s5268_s25, %s6488_s25   ;;  %s5090_s24 = sphi %s5266_s24, %s6487_s24   ;;  %s5086_s23 = sphi %s5264_s23, %s6486_s23  }
  0x22   : > { %6407 = sst [smem:[#allocation31_spill]] %s5090_s24  ;;  %s3801_s22 = sadd.s32 4294967294, %s5138_s20  }
  0x23   : > { %6408 = sst [smem:[#allocation32_spill]] %s5094_s25  ;;  %s57_s16 = sadd.s32 1, %s5130_s18 }
  0x24   : > { %6409 = sst [smem:[#allocation33_spill]] %s5098_s14  ;;  %s60_s15 = sadd.s32 1, %s5134_s19 }
  0x25   : > { %6410 = sst [smem:[#allocation34_spill]] %s5106_s27  ;;  %p58_p0 = scmp.ge.s32.totalorder %s57_s16, 6 }
  0x26   : > { %6411 = sst [smem:[#allocation35_spill]] %s5114_s29  ;;  %s156_s2 = sadd.s32 1, %s5118_s30 }
  0x27   : > { %6412 = sst [smem:[#allocation36_spill]] %s5118_s30  ;;  %p163_p1 = scmp.ne.s32.totalorder %s5118_s30, %s5114_s29 }
  0x28   : > { %6413 = sst [smem:[#allocation37_spill]] %s5122_s0  ;;  %p164_p2 = scmp.eq.s32.totalorder %s5138_s20, 0 }
  0x29   : > { %6414 = sst [smem:[#allocation38_spill]] %s5126_s17  ;;  %s6503_s16 = smov (%p58_p0, %s57_s16), 0 }
  0x2a   : > { %6415 = sst [smem:[#allocation39_spill]] %s5134_s19  ;;  %s6505_s15 = smov (!%p58_p0, %s60_s15), %s5134_s19 }
  0x2b   : > { %6416 = sst [smem:[#allocation40_spill]] %s5138_s20  ;;  %s153_s1 = ssub.s32 %s5130_s18, %s6503_s16 }
  0x2c   : > { %6417 = sst [smem:[#allocation41_spill]] %s6503_s16  ;;  %p5347_p3 = por %p164_p2, %p163_p1 }
  0x2d   : > { %p62_p4 = scmp.ge.s32.totalorder %s6505_s15, 2  ;;  %p154_p5 = scmp.eq.s32.totalorder %s153_s1, 0 }
  0x2e   : > { %p169_p6 = scmp.ne.s32.totalorder %s5114_s29, %s5110_s28  ;;  %p6371_p7 = scmp.eq.s32.totalorder %s5333_s21, 0 }
  0x2f   : > { %s6507_s15 = smov (%p62_p4, %s6505_s15), 0  ;;  %s432_s1 = sadd.s32 1, %s5106_s27 }
  0x30   : > { %6419 = sst [smem:[#allocation42_spill]] %s6507_s15  ;;  %p5360_p8 = por %p6371_p7, %p169_p6 }
  0x31   : > { %s5356_s6 = scalar_select %p154_p5, %s5118_s30, %s156_s2  }
  0x32   : > { %s6421_s0 = scalar_select %p5360_p8, 1, 0 }
  0x33   : > { %6420 = sst [smem:[#allocation43_spill]] %s5356_s6  ;;  %s429_s17 = ssub.s32 %s5134_s19, %s6507_s15 }
  0x34   : > { %6422 = sst [smem:[#allocation44_spill]] %s6421_s0  ;;  %p430_p9 = scmp.eq.s32.totalorder %s429_s17, 0 }
  0x35   : > { %p442_p10 = scmp.ne.s32.totalorder %s5106_s27, %s5102_s26  ;;  %p443_p11 = scmp.eq.s32.totalorder %s5333_s21, 11 }
  0x36   : > { %s5371_s28 = scalar_select %p430_p9, %s5106_s27, %s432_s1  }
  0x37   : > { %p5375_p12 = por %p443_p11, %p442_p10  ;;  %p448_p13 = scmp.ne.s32.totalorder %s5102_s26, %s5098_s14 }
  0x38   : > { %6423 = sst [smem:[#allocation45_spill]] %s5371_s28  ;;  %p5381_p0 = scmp.eq.s32.totalorder %s3801_s22, 11 }
  0x39   : > { %s6424_s2 = scalar_select %p5375_p12, 1, 0 }
  0x3a   : > { %s3802_s6 = sshll.u32 %s5130_s18, 1  ;;  %s3803_s29 = sshll.u32 %s6503_s16, 1 }
  0x3b   : > { %6425 = sst [smem:[#allocation46_spill]] %s6424_s2  ;;  %s456_s0 = sadd.s32 %s5134_s19, %s3802_s6 }
  0x3c   : > { %p5390_p1 = por %p5381_p0, %p448_p13  ;;  %s458_s28 = sadd.s32 %s3803_s29, %s6507_s15 }
  0x3d   : > { %s459_s27 = ssub.s32 %s456_s0, %s458_s28  ;;  %s462_s14 = sadd.s32 1, %s5094_s25 }
  0x3e   : > { %s6427_s1 = scalar_select %p5390_p1, 1, 0 }
  0x3f   : > { %p460_p2 = scmp.eq.s32.totalorder %s459_s27, 0  ;;  %p472_p4 = scmp.ne.s32.totalorder %s5094_s25, %s5090_s24 }
  0x40   : > { %6428 = sst [smem:[#allocation47_spill]] %s6427_s1  ;;  %p478_p5 = scmp.ne.s32.totalorder %s5090_s24, %s5086_s23 }
  0x41   : > { %p3804_p6 = scmp.ge.s32.totalorder %s5138_s20, 1  ;;  %p5406_p9 = por %p472_p4, %p443_p11 }
  0x42   : > { %s5402_s22 = scalar_select %p460_p2, %s5094_s25, %s462_s14  }
  0x43   : > { %s6430_s6 = scalar_select %p5406_p9, 1, 0 }
  0x44   : > { %6429 = sst [smem:[#allocation48_spill]] %s5402_s22  ;;  %p5412_p10 = por %p478_p5, %p5381_p0 }
  0x45   : > { %6431 = sst [smem:[#allocation49_spill]] %s6430_s6  ;;  %p486_p13 = scmp.lt.s32.totalorder %s5138_s20, 13 }
  0x46   : > { %s6432_s29 = scalar_select %p5412_p10, 1, 0 }
  0x47   : > { %p5417_p7 = pnand %p3804_p6, %p486_p13  ;;  %s5140_s0 = smov [#allocation18]  }
  0x48   : > { %6433 = sst [smem:[#allocation50_spill]] %s6432_s29  ;;  %s518_s28 = sshll.u32 %s5140_s0, 4  ;;  %s519_s28 = int_to_ptr.vmem [resolvable:$true] %s518_s28 }
  0x49   : > { %p4434_p2 = scmp.lt.s32.totalorder %s5138_s20, 12  ;;  %p4396_p11 = pneg %p5417_p7 }
  0x4a   : > { %s5425_s14 = sand.u32 1, %s5118_s30   ;;  %s5434_s15 = sand.u32 1, %s5138_s20  }
  0x4b   : > { %p5429_p0 = pnand %p4434_p2, %p5347_p3  ;;  %p6436_p4 = scmp.eq.s32.totalorder %s5333_s21, 0 }
  0x4c   : > { %s3808_s0 = sshll.u32 %s5425_s14, 6  ;;  %s4707_s19 = scalar_lea.vmem %s519_s28, 16 }
  0x4d   : > { %p5438_p5 = pnand %p4396_p11, %p6436_p4  ;;  %p4708_p13 = scmp.ne.s32.totalorder %s519_s28, %s4707_s19 }
  0x4e   : > { %s4714_s11 = scalar_lea.vmem %s519_s28, 32  ;;  %p4715_p10 = scmp.lt.s32.totalorder %s519_s28, %s519_s28 }
  0x4f   : > { %p4698_p6 = pneg %p5438_p5  ;;  %p4716_p1 = scmp.lt.s32.totalorder %s4714_s11, %s4707_s19 }
  0x51   : > { %p4710_p3 = pnand %p4708_p13, %p4698_p6  ;;  %p4717_p9 = por %p4716_p1, %p4715_p10 }
  0x53   : > { %p4711_p2 = pneg %p4710_p3 }
  0x55   : > { %p4718_p12 = pnand %p4717_p9, %p4711_p2 }
  0x57   : > { %4721 = shalt.err (!%p4718_p12)
}
  0x58   : > { %s6438_s13 = sld [smem:[#allocation61_spill]]  ;;  %s3954_s25 = sshll.u32 %s5130_s18, 10 }
  0x59   : > { %s544_s29 = scalar_lea.vmem [#allocation7], %s3808_s0  ;;  %s6439_s4 = sld [smem:[#allocation55_spill]] }
  0x5a   : > { %s551_s23 = sshll.u32 %s544_s29, 4  ;;  %s6390_s19 = scalar_lea.sflag [#allocation8], %s5434_s15  ;;  %s552_s23 = int_to_ptr.vmem [resolvable:$true] %s551_s23 }
  0x5b   : > { %p5460_p12 = pneg %p5429_p0  ;;  %s4735_s30 = scalar_lea.vmem %s552_s23, 1024 }
  0x5c   : > { %p4736_p1 = scmp.ne.s32.totalorder %s552_s23, %s4735_s30  ;;  %s5141_s22 = smov [#allocation7]  }
  0x5e   : > { %4402 = dma.hbm_to_vmem [thread:$0]  (!%p5438_p5), %s6438_s13, 16, %s519_s28, [#allocation17]  }
  0x5f   : > { %s550_s6 = scalar_lea.hbm %s6439_s4, %s3954_s25  ;;  %p4738_p9 = pnand %p4736_p1, %p5460_p12 }
  0x60   : > { %s4740_s28 = sshll.u32 %s5141_s22, 4  ;;  %s4741_s28 = int_to_ptr.vmem [resolvable:$false] %s4740_s28 }
  0x61   : > { %p4739_p10 = pneg %p4738_p9  ;;  %s4742_s29 = scalar_lea.vmem %s4741_s28, 2048 }
  0x62   : > { %p4743_p11 = scmp.lt.s32.totalorder %s552_s23, %s4741_s28  ;;  %p4744_p4 = scmp.lt.s32.totalorder %s4742_s29, %s4735_s30 }
  0x64   : > { %p4745_p13 = por %p4744_p4, %p4743_p11 }
  0x66   : > { %p4746_p3 = pnand %p4745_p13, %p4739_p10 }
  0x68   : > { %4749 = shalt.err (!%p4746_p3)
}
  0x69   : > { %s5142_s25 = smov 256   ;;  %s5143_s20 = smov 16  }
  0x6a   : > { %4406 = dma.hbm_to_vmem [thread:$0]  (!%p5429_p0), %s550_s6, 1024, %s552_s23, %s6390_s19, %s5142_s25, %s5142_s25, %s5143_s20  }
  0x6b   : > { %s5471_s1 = sshll.u32 %s5130_s18, 4  ;;  %s591_s0 = scalar_lea.vmem [#allocation10], %s5425_s14 }
  0x6c   : > { %s598_s22 = sshll.u32 %s591_s0, 4  ;;  %s6441_s7 = sld [smem:[#allocation58_spill]]  ;;  %s599_s22 = int_to_ptr.vmem [resolvable:$true] %s598_s22 }
  0x6d   : > { %s589_s4 = scalar_lea.sflag [#allocation11], %s5434_s15  ;;  %s4763_s13 = scalar_lea.vmem %s599_s22, 16 }
  0x6e   : > { %p4764_p2 = scmp.ne.s32.totalorder %s599_s22, %s4763_s13  ;;  %s5144_s2 = smov [#allocation10]  }
  0x6f   : > { %s4768_s24 = sshll.u32 %s5144_s2, 4  ;;  %s4769_s24 = int_to_ptr.vmem [resolvable:$false] %s4768_s24 }
  0x70   : > { %p4766_p1 = pnand %p4764_p2, %p5460_p12  ;;  %s4770_s23 = scalar_lea.vmem %s4769_s24, 32 }
  0x71   : > { %p4771_p10 = scmp.lt.s32.totalorder %s599_s22, %s4769_s24  ;;  %p4772_p11 = scmp.lt.s32.totalorder %s4770_s23, %s4763_s13 }
  0x72   : > { %s596_s29 = scalar_lea.hbm %s6441_s7, %s5471_s1  ;;  %p4767_p9 = pneg %p4766_p1 }
  0x73   : > { %p4773_p4 = por %p4772_p11, %p4771_p10 }
  0x75   : > { %p4774_p13 = pnand %p4773_p4, %p4767_p9 }
  0x77   : > { %4777 = shalt.err (!%p4774_p13)
}
  0x78   : > { %4412 = dma.hbm_to_vmem [thread:$0]  (!%p5429_p0), %s596_s29, 16, %s599_s22, %s589_s4  }
  0x79   : > { %s3817_s6 = sshll.u32 %s5425_s14, 5  ;;  %s3956_s25 = sshll.u32 %s5130_s18, 9 }
  0x7a   : > { %s633_s0 = scalar_lea.hbm %s6351_s9, %s3956_s25  ;;  %s627_s24 = scalar_lea.vmem [#allocation13], %s3817_s6 }
  0x7b   : > { %s634_s13 = sshll.u32 %s627_s24, 4  ;;  %s6391_s30 = scalar_lea.sflag [#allocation14], %s5434_s15  ;;  %s635_s13 = int_to_ptr.vmem [resolvable:$true] %s634_s13 }
  0x7c   : > { %s4791_s28 = scalar_lea.vmem %s635_s13, 512  ;;  %s5145_s23 = smov [#allocation13]  }
  0x7d   : > { %p4792_p3 = scmp.ne.s32.totalorder %s635_s13, %s4791_s28  ;;  %s4796_s19 = sshll.u32 %s5145_s23, 4  ;;  %s4797_s19 = int_to_ptr.vmem [resolvable:$false] %s4796_s19 }
  0x7e   : > { %s4798_s7 = scalar_lea.vmem %s4797_s19, 1024  ;;  %p4799_p9 = scmp.lt.s32.totalorder %s635_s13, %s4797_s19 }
  0x7f   : > { %p4794_p2 = pnand %p4792_p3, %p5460_p12  ;;  %p4800_p10 = scmp.lt.s32.totalorder %s4798_s7, %s4791_s28 }
  0x81   : > { %p4795_p1 = pneg %p4794_p2  ;;  %p4801_p11 = por %p4800_p10, %p4799_p9 }
  0x83   : > { %p4802_p4 = pnand %p4801_p11, %p4795_p1 }
  0x85   : > { %4805 = shalt.err (!%p4802_p4)
}
  0x86   : > { %s5146_s22 = smov 128   ;;  %s5147_s29 = smov 8  }
  0x87   : > { %4418 = dma.hbm_to_vmem [thread:$0]  (!%p5429_p0), %s633_s0, 512, %s635_s13, %s6391_s30, %s5146_s22, %s5146_s22, %s5147_s29  }
  0x88   : > { %s5148_s6 = smov [#allocation4]   ;;  %s3811_s20 = sshll.u32 %s5425_s14, 1 }
  0x89   : > { %s504_s25 = sshll.u32 %s5148_s6, 4  ;;  %s505_s25 = int_to_ptr.vmem [resolvable:$true] %s504_s25 }
  0x8a   : > { %s4817_s2 = scalar_lea.vmem %s505_s25, 512  ;;  %p4825_p1 = scmp.lt.s32.totalorder %s505_s25, %s505_s25 }
  0x8b   : > { %p4818_p13 = scmp.ne.s32.totalorder %s505_s25, %s4817_s2  ;;  %p4826_p9 = scmp.lt.s32.totalorder %s4817_s2, %s4817_s2 }
  0x8d   : > { %p4820_p3 = pnand %p4818_p13, %p4698_p6  ;;  %p4827_p10 = por %p4826_p9, %p4825_p1 }
  0x8f   : > { %p4821_p2 = pneg %p4820_p3 }
  0x91   : > { %p4828_p11 = pnand %p4827_p10, %p4821_p2 }
  0x93   : > { %4831 = shalt.err (!%p4828_p11)
}
  0x94   : > { %s6442_s3 = sld [smem:[#allocation54_spill]]  ;;  %s3955_s0 = sshll.u32 %s5130_s18, 5 }
  0x95   : > { %s565_s24 = scalar_lea.vmem [#allocation9], %s3811_s20  ;;  %s6443_s5 = sld [smem:[#allocation56_spill]] }
  0x96   : > { %s573_s13 = sshll.u32 %s565_s24, 4  ;;  %s5149_s16 = smov [#allocation9]   ;;  %s574_s13 = int_to_ptr.vmem [resolvable:$true] %s573_s13 }
  0x97   : > { %s4845_s2 = scalar_lea.vmem %s574_s13, 32  ;;  %s4850_s30 = sshll.u32 %s5149_s16, 4  ;;  %s4851_s30 = int_to_ptr.vmem [resolvable:$false] %s4850_s30 }
  0x98   : > { %p4846_p6 = scmp.ne.s32.totalorder %s574_s13, %s4845_s2  ;;  %s4852_s7 = scalar_lea.vmem %s4851_s30, 64 }
  0x99   : > { %p4853_p3 = scmp.lt.s32.totalorder %s574_s13, %s4851_s30  ;;  %p4854_p2 = scmp.lt.s32.totalorder %s4852_s7, %s4845_s2 }
  0x9a   : > { %4399 = dma.hbm_to_vmem [thread:$0]  (!%p5438_p5), %s6442_s3, 512, %s505_s25, [#allocation5], %s5146_s22, %s5146_s22, %s5147_s29  }
  0x9b   : > { %s571_s6 = scalar_lea.hbm %s6443_s5, %s3955_s0  ;;  %p4848_p4 = pnand %p4846_p6, %p5460_p12 }
  0x9c   : > { %p4855_p5 = por %p4854_p2, %p4853_p3 }
  0x9d   : > { %p4849_p13 = pneg %p4848_p4 }
  0x9f   : > { %p4856_p1 = pnand %p4855_p5, %p4849_p13 }
  0xa1   : > { %4859 = shalt.err (!%p4856_p1)
}
  0xa2   : > { %s6444_s22 = scalar_lea.sflag [#allocation8], %s5434_s15  ;;  %s3815_s29 = sshll.u32 %s5425_s14, 2 }
  0xa3   : > { %4409 = dma.hbm_to_vmem [thread:$0]  (!%p5429_p0), %s571_s6, 32, %s574_s13, %s6444_s22  }
  0xa4   : > { %s3816_s25 = sshll.u32 %s5130_s18, 6  ;;  %s6445_s8 = sld [smem:[#allocation59_spill]] }
  0xa5   : > { %s609_s30 = scalar_lea.vmem [#allocation12], %s3815_s29  ;;  %s652_s2 = scalar_lea.hbm %s6352_s10, %s5471_s1 }
  0xa6   : > { %s616_s24 = sshll.u32 %s609_s30, 4  ;;  %s5150_s7 = smov [#allocation12]   ;;  %s617_s24 = int_to_ptr.vmem [resolvable:$true] %s616_s24 }
  0xa7   : > { %s4873_s16 = scalar_lea.vmem %s617_s24, 64  ;;  %s4878_s13 = sshll.u32 %s5150_s7, 4  ;;  %s4879_s13 = int_to_ptr.vmem [resolvable:$false] %s4878_s13 }
  0xa8   : > { %p4874_p9 = scmp.ne.s32.totalorder %s617_s24, %s4873_s16  ;;  %s4880_s6 = scalar_lea.vmem %s4879_s13, 128 }
  0xa9   : > { %p4881_p6 = scmp.lt.s32.totalorder %s617_s24, %s4879_s13  ;;  %p4882_p4 = scmp.lt.s32.totalorder %s4880_s6, %s4873_s16 }
  0xaa   : > { %s614_s0 = scalar_lea.hbm %s6445_s8, %s3816_s25  ;;  %p4876_p10 = pnand %p4874_p9, %p5460_p12 }
  0xab   : > { %p4883_p13 = por %p4882_p4, %p4881_p6 }
  0xac   : > { %p4877_p11 = pneg %p4876_p10 }
  0xae   : > { %p4884_p3 = pnand %p4883_p13, %p4877_p11 }
  0xb0   : > { %4887 = shalt.err (!%p4884_p3)
}
  0xb1   : > { %4415 = dma.hbm_to_vmem [thread:$0]  (!%p5429_p0), %s614_s0, 64, %s617_s24, %s589_s4  }
  0xb2   : > { %s647_s22 = scalar_lea.vmem [#allocation15], %s5425_s14  ;;  %s5151_s20 = smov [#allocation15]  }
  0xb3   : > { %s654_s29 = sshll.u32 %s647_s22, 4  ;;  %s4906_s19 = sshll.u32 %s5151_s20, 4  ;;  %s655_s29 = int_to_ptr.vmem [resolvable:$true] %s654_s29  ;;  %s4907_s19 = int_to_ptr.vmem [resolvable:$false] %s4906_s19 }
  0xb4   : > { %s4901_s25 = scalar_lea.vmem %s655_s29, 16  ;;  %s4908_s30 = scalar_lea.vmem %s4907_s19, 32 }
  0xb5   : > { %p4902_p2 = scmp.ne.s32.totalorder %s655_s29, %s4901_s25  ;;  %p4909_p9 = scmp.lt.s32.totalorder %s655_s29, %s4907_s19 }
  0xb6   : > { %p4910_p10 = scmp.lt.s32.totalorder %s4908_s30, %s4901_s25 }
  0xb7   : > { %p4904_p5 = pnand %p4902_p2, %p5460_p12 }
  0xb8   : > { %p4911_p11 = por %p4910_p10, %p4909_p9 }
  0xb9   : > { %p4905_p1 = pneg %p4904_p5 }
  0xbb   : > { %p4912_p6 = pnand %p4911_p11, %p4905_p1 }
  0xbd   : > { %4915 = shalt.err (!%p4912_p6)
}
  0xbe   : > { %s6446_s4 = scalar_lea.sflag [#allocation14], %s5434_s15  ;;  %s677_s16 = scalar_lea.hbm %s6354_s12, %s5471_s1 }
  0xbf   : > { %4421 = dma.hbm_to_vmem [thread:$0]  (!%p5429_p0), %s652_s2, 16, %s655_s29, %s6446_s4  }
  0xc0   : > { %s672_s7 = scalar_lea.vmem [#allocation16], %s5425_s14  ;;  %s670_s6 = scalar_lea.sflag [#allocation17], %s5434_s15 }
  0xc1   : > { %s679_s13 = sshll.u32 %s672_s7, 4  ;;  %s5152_s25 = smov [#allocation16]   ;;  %s680_s13 = int_to_ptr.vmem [resolvable:$true] %s679_s13 }
  0xc2   : > { %s4929_s22 = scalar_lea.vmem %s680_s13, 16  ;;  %s4934_s20 = sshll.u32 %s5152_s25, 4  ;;  %s4935_s20 = int_to_ptr.vmem [resolvable:$false] %s4934_s20 }
  0xc3   : > { %p4930_p4 = scmp.ne.s32.totalorder %s680_s13, %s4929_s22  ;;  %s4936_s19 = scalar_lea.vmem %s4935_s20, 32 }
  0xc4   : > { %p4937_p2 = scmp.lt.s32.totalorder %s680_s13, %s4935_s20  ;;  %p4938_p5 = scmp.lt.s32.totalorder %s4936_s19, %s4929_s22 }
  0xc5   : > { %p4932_p13 = pnand %p4930_p4, %p5460_p12 }
  0xc6   : > { %p4939_p1 = por %p4938_p5, %p4937_p2 }
  0xc7   : > { %p4933_p3 = pneg %p4932_p13 }
  0xc9   : > { %p4940_p9 = pnand %p4939_p1, %p4933_p3 }
  0xcb   : > { %4943 = shalt.err (!%p4940_p9)
}
  0xcc   : > { %4424 = dma.hbm_to_vmem [thread:$0]  (!%p5429_p0), %s677_s16, 16, %s680_s13, %s670_s6  }
  0xcd   : > { %688 = sbr.rel (%p5417_p7) target bundleno = 5489 (0x1571), region = 80  ;;  %p6447_p10 = scmp.eq.s32.totalorder (!%p5417_p7), %s5333_s21, 0 }
  0xd2   : > { %5053 = dma.done.wait (%p6447_p10), [#allocation5], 512   ;;  %p6448_p12 = pmov %p6447_p10 }
  0xd3   : > { %s6449_s15 = sld [smem:[#allocation35_spill]]  ;;  %s694_s11 = sand.u32 1, %s5333_s21  }
  0xd4   : > { %5055 = vsyncadd (%p6448_p12), [#allocation5], 4294966784  ;;  %s695_s29 = scalar_lea.sflag [#allocation8], %s694_s11 }
  0xd9   : > { %s5561_s1 = sand.u32 1, %s6449_s15  }
  0xda   : > { %s3824_s2 = sshll.u32 %s5561_s1, 6 }
  0xdb   : > { %s5564_s17 = scalar_lea.vmem [#allocation7], %s3824_s2 }
  0xdc   : > { %5057 = dma.done.wait (%p5360_p8), %s695_s29, 1056  }
  0xdd   : > { %5059 = vsyncadd (%p5360_p8), %s695_s29, 4294966240  ;;  %s3825_s27 = sshll.u32 %s5561_s1, 1  ;;  %s713_s4 = scalar_lea.sflag [#allocation11], %s694_s11 }
  0xde   : > { %s5571_s30 = scalar_lea.vmem [#allocation9], %s3825_s27 }
  0xdf   : > { %5061 = dma.done.wait (%p5360_p8), %s713_s4, 80  }
  0xe0   : > { %5063 = vsyncadd (%p5360_p8), %s713_s4, 4294967216  ;;  %s3826_s24 = sshll.u32 %s5561_s1, 2  ;;  %s3827_s28 = sshll.u32 %s5561_s1, 5 }
  0xe1   : > { %s5580_s23 = scalar_lea.vmem [#allocation12], %s3826_s24  ;;  %s730_s16 = scalar_lea.sflag [#allocation14], %s694_s11 }
  0xe2   : > { %s5582_s7 = scalar_lea.vmem [#allocation13], %s3827_s28 }
  0xe3   : > { %5065 = dma.done.wait (%p5360_p8), %s730_s16, 528  }
  0xe4   : > { %5067 = vsyncadd (%p5360_p8), %s730_s16, 4294966768  ;;  %s747_s6 = scalar_lea.sflag [#allocation17], %s694_s11 }
  0xe5   : > { %5069 = dma.done.wait (%p5360_p8), %s747_s6, 16  }
  0xe6   : > { %5071 = vsyncadd (%p5360_p8), %s747_s6, 4294967280  ;;  %p6451_p7 = pmov %p6447_p10 }
  0xe8   : > { %5073 = dma.done.wait (%p6451_p7), [#allocation17], 16   ;;  %p6452_p0 = pmov %p6451_p7 }
  0xe9   : > { %s6453_s25 = sld [smem:[#allocation31_spill]]  ;;  %s6459_s5 = sand.u32 1, %s5102_s26  }
  0xea   : > { %5075 = vsyncadd (%p6452_p0), [#allocation17], 4294967280  ;;  %s6454_s20 = sld [smem:[#allocation38_spill]]  ;;  %s5621_s8 = scalar_lea.vmem [#allocation19], %s6459_s5 }
  0xeb   : > { %s6455_s19 = sld [smem:[#allocation37_spill]] }
  0xec   : > { %s6456_s4 = sld [smem:[#allocation51_spill]] }
  0xed   : > { %s6457_s13 = sld [smem:[#allocation57_spill]] }
  0xef   : > { %s6392_s11 = sand.u32 1, %s6453_s25   ;;  %s6458_s25 = sld [smem:[#allocation60_spill]] }
  0xf0   : > { %s4367_s2 = smul.u32 192, %s6392_s11  ;;  %p848_p11 = scmp.lt.s32.totalorder %s6454_s20, 1 }
  0xf1   : > { %p853_p8 = scmp.lt.s32.totalorder %s6455_s19, 5  ;;  %p3834_p6 = scmp.ne.s32.totalorder %s6455_s19, 0 }
  0xf2   : > { %s6509_s20 = smov (!%p848_p11, %s6454_s20), 1  ;;  %s6460_s3 = sld [smem:[#allocation52_spill]] (!%p3834_p6) }
  0xf3   : > { %s854_s14 = scalar_select %p853_p8, %s6455_s19, 5 }
  0xf4   : > { %s3957_s29 = sshll.u32 %s6509_s20, 4  ;;  %s5623_s20 = scalar_lea.vmem [#allocation20], %s4367_s2 }
  0xf5   : > { %s852_s24 = scalar_lea.vmem %s6456_s4, %s3957_s29  ;;  %s4368_s28 = smul.u32 48, %s854_s14 }
  0xf6   : > { %s3958_s16 = sshll.u32 %s854_s14, 7  ;;  %868 = sbr.rel (%p3834_p6) target bundleno = 457 (0x1c9), region = 120 }
  0xf7   : > { %s5612_s0 = scalar_lea.vmem %s6457_s13, %s4368_s28  ;;  %s5617_s11 = scalar_lea.vmem %s6458_s25, %s3958_s16 }
  0xf8   : > { %s6461_s4 = sld [smem:[#allocation53_spill]] (!%p3834_p6) }
  0xfb   : > { %v874_v1 = vld [vmem:[%s852_s24 + $0x8] sm:$0xf]  ;;  %vm912_vm0 = vcmask 1043456   ;;  %v873_v2 = vld [vmem:[%s852_s24] sm:$0xff]  ;;  %vm899_vm1 = vcmask 97280   ;;  %v871_v4 = vld [vmem:[%s6460_s3 + $0x10] sm:$0xff] }
  0xfc   : > { %4104 = vmatprep.subr.msk.mxu0 %vm912_vm0, %v874_v1  ;;  %4363 = vmatprep.subr.msk.mxu1 %vm912_vm0, %v874_v1  ;;  %v869_v3 = vld [vmem:[%s6460_s3] sm:$0xff]  ;;  %v870_v5 = vld [vmem:[%s6460_s3 + $0x8] sm:$0xff]  ;;  %v872_v6 = vld [vmem:[%s6460_s3 + $0x18] sm:$0xff]  ;;  %v5153_v9 = vmov 0   ;;  %vm1009_vm2 = vcmask 261120  }
  0xfd   : > { %4105 = vmatpush3.msk.msra.mxu0 %vm912_vm0, %v874_v1  ;;  %4365 = vmatpush3.msk.msra.mxu1 %vm912_vm0, %v874_v1  ;;  %v1002_v17 = vld [vmem:[#allocation4 + $0x8] sm:$0xff]  ;;  %v1004_v19 = vld [vmem:[#allocation4 + $0x18] sm:$0xff]  ;;  %v1001_v23 = vld [vmem:[#allocation4] sm:$0xff] }
  0xfe   : > { %4106 = vmatprep.subr.mxu0 %v873_v2  ;;  %4364 = vmatprep.subr.mxu1 %v873_v2  ;;  %v877_v7 = vld [vmem:[%s6461_s4 + $0x10] sm:$0xff]  ;;  %v875_v8 = vld [vmem:[%s6461_s4] sm:$0xff]  ;;  %v878_v10 = vld [vmem:[%s6461_s4 + $0x18] sm:$0xff] }
  0xff   : > { %4107 = vmatpush3.msra.mxu0 %v873_v2  ;;  %4366 = vmatpush3.msra.mxu1 %v873_v2  ;;  %v876_v11 = vld [vmem:[%s6461_s4 + $0x8] sm:$0xff]  ;;  %v1003_v25 = vld [vmem:[#allocation4 + $0x10] sm:$0xff] }
 0x100   : > { %4108 = vmatprep.mubr.msk.f32.mxu0 %vm899_vm1, %v869_v3  ;;  %4111 = vmatprep.mubr.msk.f32.mxu1 %vm899_vm1, %v871_v4 }
 0x101   : > { %4109 = vmatmul.mubr.msk.f32.vlgmr.msra.gmra.mxu0 %vm899_vm1, %v870_v5  ;;  %4112 = vmatmul.mubr.msk.f32.vlgmr.msra.gmra.mxu1 %vm899_vm1, %v872_v6 }
 0x102   : > { %4578 = vset.pattern.permute.xlu1 %v5153_v9  ;;  %4577 = vset.pattern.permute.xlu0 %v5153_v9 }
 0x103   : > { %891 = vperm.xlu1 %4578, %v877_v7   ;;  %881 = vperm.xlu0 %4577, %v875_v8  }
 0x107   : > { %896 = vperm.xlu1 %4578, %v878_v10   ;;  %886 = vperm.xlu0 %4577, %v876_v11  }
 0x17e   : > { %v892_v12 = vpop.permute.xlu1 %891  ;;  %v882_v13 = vpop.permute.xlu0 %881 }
 0x182   : > { %v897_v14 = vpop.permute.xlu1 %896  ;;  %v887_v15 = vpop.permute.xlu0 %886 }
 0x1c1   : > { %v4110_v16 = vpop.f32.mrf.mxu0  ;;  %v4113_v18 = vpop.f32.mrf.mxu1 }
 0x1c2   : > { %v988_v20 = vadd.f32 %v4110_v16, %v887_v15  ;;  %v998_v21 = vadd.f32 %v4113_v18, %v897_v14 }
 0x1c3   : > { %v982_v22 = vpop.f32.mrf.mxu0  ;;  %v992_v24 = vpop.f32.mrf.mxu1 }
 0x1c4   : > { %v1006_v26 = vadd.f32 %v1002_v17, %v988_v20  ;;  %v1008_v27 = vadd.f32 %v1004_v19, %v998_v21  ;;  %v983_v28 = vadd.f32 %v982_v22, %v882_v13  ;;  %v993_v29 = vadd.f32 %v992_v24, %v892_v12 }
 0x1c6   : > { %1011 = vst.msk [vmem:[#allocation2 + $0x8] sm:$0xff] %vm1009_vm2, %v1006_v26  ;;  %1013 = vst.msk [vmem:[#allocation2 + $0x18] sm:$0xff] %vm1009_vm2, %v1008_v27  ;;  %v1005_v30 = vadd.f32 %v1001_v23, %v983_v28  ;;  %v1007_v31 = vadd.f32 %v1003_v25, %v993_v29 }
 0x1c8   : > { %1010 = vst.msk [vmem:[#allocation2] sm:$0xff] %vm1009_vm2, %v1005_v30  ;;  %1012 = vst.msk [vmem:[#allocation2 + $0x10] sm:$0xff] %vm1009_vm2, %v1007_v31 }
 0x1c9 PF: > { %v1025_v32 = vld [vmem:[%s5564_s17 + $0x38] sm:$0xff]  ;;  %v1024_v33 = vld [vmem:[%s5564_s17 + $0x30] sm:$0xff]  ;;  %v1023_v34 = vld [vmem:[%s5564_s17 + $0x28] sm:$0xff]  ;;  %v5154_v36 = vmov 0.0   ;;  %vm1046_vm3 = vcmask 261120   ;;  %v1036_v45 = vlaneseq  ;;  %vm1160_vm4 = vcmask 64512  }
 0x1ca   : > { %1083 = vmatprep.subr.mxu0 %v1025_v32  ;;  %v1022_v35 = vld [vmem:[%s5564_s17 + $0x20] sm:$0xff]  ;;  %1123 = vmatprep.mubr.f32.mxu0 %v5154_v36  ;;  %v1021_v37 = vld [vmem:[%s5564_s17 + $0x18] sm:$0xff]  ;;  %v1020_v38 = vld [vmem:[%s5564_s17 + $0x10] sm:$0xff]  ;;  %s5157_s22 = smov 120   ;;  %s5158_s15 = smov 32   ;;  %vm2894_vm5 = vcmask 130048  }
 0x1cb   : > { %1084 = vmatpush1.msra.mxu0 %v1024_v33  ;;  %v1019_v39 = vld [vmem:[%s5564_s17 + $0x8] sm:$0xff]  ;;  %v1018_v40 = vld [vmem:[%s5564_s17] sm:$0xff]  ;;  %v5662_v46 = vshrl.u32 %v1036_v45, 7  ;;  %s5155_s17 = smov 80   ;;  %s5159_s5 = smov 24   ;;  %vm2899_vm6 = vcmask 195584  }
 0x1cc   : > { %1085 = vmatprep.subr.mxu0 %v1023_v34  ;;  %v5668_v48 = vld [vmem:[%s5571_s30] sm:$0x3]  ;;  %s5156_s30 = smov 72   ;;  %s5160_s19 = smov 64   ;;  %vm2908_vm7 = vcmask 326656   ;;  %vm2919_vm8 = vcmask 392192  }
 0x1cd   : > { %1086 = vmatpush1.msra.mxu0 %v1022_v35  ;;  %v1015_v42 = vld [vmem:[#allocation2 + $0x8] sm:$0xff]  ;;  %v1017_v44 = vld [vmem:[#allocation2 + $0x18] sm:$0xff]  ;;  %v5665_v47 = vsub.s32 0, %v5662_v46  ;;  %s5161_s2 = smov 112   ;;  %s5162_s14 = smov 16  }
 0x1ce   : > { %1087 = vmatprep.subr.mxu0 %v1021_v37  ;;  %s5163_s29 = smov 56   ;;  %s5164_s27 = smov 104  }
 0x1cf   : > { %1088 = vmatpush1.msra.mxu0 %v1020_v38  ;;  %v1014_v41 = vld [vmem:[#allocation2] sm:$0xff]  ;;  %v1016_v43 = vld [vmem:[#allocation2 + $0x10] sm:$0xff]  ;;  %v1039_v49 = vrot.slane %v5668_v48, %v5665_v47  ;;  %s5165_s21 = smov 8   ;;  %s5166_s24 = smov 48  }
 0x1d0   : > { %1089 = vmatprep.subr.mxu0 %v1019_v39  ;;  %s5167_s28 = smov 96   ;;  %s5168_s16 = smov 40  }
 0x1d1   : > { %1090 = vmatpush1.msra.mxu0 %v1018_v40  ;;  %s5169_s6 = smov 88  }
 0x1d2   : > { %3840 = vmatmul.mubr.msk.f32.vlgmr.msra.gmra.mxu0 %vm1046_vm3, %v1014_v41 }
 0x1d3   : > { %1129 = vmatprep.mubr.f32.mxu0 %v5154_v36 }
 0x1d6   : > { %3841 = vmatmul.mubr.msk.f32.gmra.mxu0 %vm1046_vm3, %v1015_v42 }
 0x1d7   : > { %1135 = vmatprep.mubr.f32.mxu0 %v5154_v36 }
 0x1da   : > { %3842 = vmatmul.mubr.msk.f32.gmra.mxu0 %vm1046_vm3, %v1016_v43 }
 0x1db   : > { %1141 = vmatprep.mubr.f32.mxu0 %v5154_v36 }
 0x1de   : > { %3843 = vmatmul.mubr.msk.f32.gmra.mxu0 %vm1046_vm3, %v1017_v44 }
 0x292   : > { %v1125_v50 = vpop.f32.mrf.mxu0 }
 0x293   : > { %v5672_v51 = vadd.f32 %v1125_v50, %v1039_v49 }
 0x294   : > { %v5674_v52 = vpop.f32.mrf.mxu0 }
 0x295   : > { %4122 = vmatprep.mubr.msk.f32.mxu0 %vm1160_vm4, %v5672_v51 }
 0x296   : > { %v1131_v53 = vpop.f32.mrf.mxu0 }
 0x297   : > { %v5678_v54 = vadd.f32 %v1131_v53, %v1039_v49 }
 0x298   : > { %v5680_v55 = vpop.f32.mrf.mxu0 }
 0x299   : > { %1154 = vrot.lane.b32.xlu1 %v5678_v54, %s5155_s17 }
 0x29a   : > { %v1137_v56 = vpop.f32.mrf.mxu0 }
 0x29b   : > { %v5689_v60 = vadd.f32 %v1137_v56, %v1039_v49 }
 0x29c   : > { %v5683_v57 = vpop.f32.mrf.mxu0 }
 0x29e   : > { %v1143_v58 = vpop.f32.mrf.mxu0 }
 0x29f   : > { %v5685_v59 = vadd.f32 %v1143_v58, %v1039_v49 }
 0x2a0   : > { %v5730_v9 = vpop.f32.mrf.mxu0 }
 0x2a1   : > { %1158 = vrot.lane.b32.xlu0 %v5685_v59, %s5155_s17  ;;  %1437 = vrot.lane.b32.xlu1 %v5685_v59, %s5156_s30 }
 0x2a5   : > { %1156 = vrot.lane.b32.xlu0 %v5689_v60, %s5155_s17  ;;  %1435 = vrot.lane.b32.xlu1 %v5689_v60, %s5156_s30 }
 0x2a9   : > { %1431 = vrot.lane.b32.xlu1 %v5672_v51, %s5156_s30  ;;  %1152 = vrot.lane.b32.xlu0 %v5672_v51, %s5155_s17 }
 0x2ad   : > { %1425 = vrot.lane.b32.xlu1 %v5678_v54, %s5157_s22  ;;  %1433 = vrot.lane.b32.xlu0 %v5678_v54, %s5156_s30 }
 0x2b1   : > { %1429 = vrot.lane.b32.xlu1 %v5685_v59, %s5157_s22  ;;  %1423 = vrot.lane.b32.xlu0 %v5672_v51, %s5157_s22 }
 0x2b5   : > { %1427 = vrot.lane.b32.xlu0 %v5689_v60, %s5157_s22 }
 0x30b   : > { %v1155_v61 = vpop.permute.xlu1 %1154 }
 0x313   : > { %v1159_v62 = vpop.permute.xlu0 %1158  ;;  %v1438_v63 = vpop.permute.xlu1 %1437 }
 0x314   : > { %4114 = vmatprep.subr.msk.mxu0 %vm1160_vm4, %v1159_v62  ;;  %4142 = vmatprep.subr.msk.mxu1 %vm1160_vm4, %v1438_v63 }
 0x315   : > { %4115 = vmatpush3.xpose.msk.msra.mxu0 %vm1160_vm4, %v1159_v62  ;;  %4143 = vmatpush3.xpose.msk.msra.mxu1 %vm1160_vm4, %v1438_v63 }
 0x317   : > { %v1157_v0 = vpop.permute.xlu0 %1156  ;;  %v1436_v1 = vpop.permute.xlu1 %1435 }
 0x318   : > { %4116 = vmatprep.subr.msk.mxu0 %vm1160_vm4, %v1157_v0  ;;  %4144 = vmatprep.subr.msk.mxu1 %vm1160_vm4, %v1436_v1 }
 0x319   : > { %4117 = vmatpush3.xpose.msk.msra.mxu0 %vm1160_vm4, %v1157_v0  ;;  %4145 = vmatpush3.xpose.msk.msra.mxu1 %vm1160_vm4, %v1436_v1 }
 0x31a   : > { %4118 = vmatprep.subr.msk.mxu0 %vm1160_vm4, %v1155_v61 }
 0x31b   : > { %v1153_v2 = vpop.permute.xlu0 %1152  ;;  %v1432_v3 = vpop.permute.xlu1 %1431 }
 0x31d   : > { %4119 = vmatpush3.xpose.msk.msra.mxu0 %vm1160_vm4, %v1155_v61 }
 0x31e   : > { %4120 = vmatprep.subr.msk.mxu0 %vm1160_vm4, %v1153_v2 }
 0x31f   : > { %v1434_v4 = vpop.permute.xlu0 %1433  ;;  %v1426_v6 = vpop.permute.xlu1 %1425 }
 0x320   : > { %4146 = vmatprep.subr.msk.mxu1 %vm1160_vm4, %v1434_v4 }
 0x321   : > { %4121 = vmatpush3.xpose.msk.msra.mxu0 %vm1160_vm4, %v1153_v2  ;;  %4147 = vmatpush3.xpose.msk.msra.mxu1 %vm1160_vm4, %v1434_v4 }
 0x322   : > { %4148 = vmatprep.subr.msk.mxu1 %vm1160_vm4, %v1432_v3 }
 0x323   : > { %v1424_v5 = vpop.permute.xlu0 %1423  ;;  %v1430_v8 = vpop.permute.xlu1 %1429 }
 0x324   : > { %4123 = vmatmul.mubr.msk.f32.vlgmr.msra.gmra.mxu0 %vm1160_vm4, %v5678_v54  ;;  %4150 = vmatprep.mubr.msk.f32.mxu1 %vm1160_vm4, %v1424_v5 }
 0x325   : > { %4125 = vmatprep.mubr.msk.f32.mxu0 %vm1160_vm4, %v5689_v60  ;;  %4149 = vmatpush3.xpose.msk.msra.mxu1 %vm1160_vm4, %v1432_v3 }
 0x327   : > { %v1428_v7 = vpop.permute.xlu0 %1427 }
 0x328   : > { %4126 = vmatmul.mubr.msk.f32.gmra.mxu0 %vm1160_vm4, %v5685_v59  ;;  %4151 = vmatmul.mubr.msk.f32.vlgmr.msra.gmra.mxu1 %vm1160_vm4, %v1426_v6 }
 0x329   : > { %4153 = vmatprep.mubr.msk.f32.mxu1 %vm1160_vm4, %v1428_v7 }
 0x32c   : > { %4154 = vmatmul.mubr.msk.f32.gmra.mxu1 %vm1160_vm4, %v1430_v8 }
 0x3e4   : > { %v4124_v10 = vpop.f32.mrf.mxu0 }
 0x3e5   : > { %v1263_v11 = vmul.f32 0.4472136, %v4124_v10 }
 0x3e6   : > { %v1243_v12 = vpop.f32.mrf.mxu0 }
 0x3e7   : > { %v1262_v13 = vmul.f32 0.4472136, %v1243_v12  ;;  %v1269_v14 = vsel %vm1046_vm3, %v1263_v11, -inf }
 0x3e8   : > { %v4152_v15 = vpop.f32.mrf.mxu1  ;;  %1270 = vmax.xlane.f32.xlu1 %v1269_v14  ;;  %v4127_v16 = vpop.f32.mrf.mxu0 }
 0x3e9   : > { %v1266_v17 = vsel %vm1046_vm3, %v1262_v13, -inf  ;;  %v1265_v22 = vmul.f32 0.4472136, %v4127_v16  ;;  %v1541_v25 = vmul.f32 0.4472136, %v4152_v15 }
 0x3ea   : > { %v1521_v18 = vpop.f32.mrf.mxu1  ;;  %1267 = vmax.xlane.f32.xlu0 %v1266_v17  ;;  %v1253_v19 = vpop.f32.mrf.mxu0 }
 0x3eb   : > { %v1540_v20 = vmul.f32 0.4472136, %v1521_v18  ;;  %v5734_v21 = vmul.f32 0.4472136, %v1253_v19  ;;  %v1275_v26 = vsel %vm1046_vm3, %v1265_v22, -inf  ;;  %v1547_v29 = vsel %vm1046_vm3, %v1541_v25, -inf }
 0x3ec   : > { %v4155_v27 = vpop.f32.mrf.mxu1 }
 0x3ed   : > { %v1544_v23 = vsel %vm1046_vm3, %v1540_v20, -inf  ;;  %v1272_v24 = vsel %vm1046_vm3, %v5734_v21, -inf  ;;  %v5740_v28 = vmul.f32 0.4472136, %v4155_v27 }
 0x3ee   : > { %1545 = vmax.xlane.f32.xlu1 %v1544_v23  ;;  %1273 = vmax.xlane.f32.xlu0 %v1272_v24  ;;  %v1531_v31 = vpop.f32.mrf.mxu1 }
 0x3ef   : > { %v1553_v30 = vsel %vm1046_vm3, %v5740_v28, -inf  ;;  %v5761_v32 = vmul.f32 0.4472136, %v1531_v31 }
 0x3f1   : > { %v1550_v33 = vsel %vm1046_vm3, %v5761_v32, -inf }
 0x3f2   : > { %1276 = vmax.xlane.f32.xlu0 %v1275_v26 }
 0x3f6   : > { %1548 = vmax.xlane.f32.xlu0 %v1547_v29 }
 0x3fa   : > { %1554 = vmax.xlane.f32.xlu0 %v1553_v30 }
 0x3ff   : > { %1318 = vrot.lane.b32.xlu1 %v5689_v60, %s5158_s15 }
 0x403   : > { %1314 = vrot.lane.b32.xlu1 %v5672_v51, %s5158_s15 }
 0x407   : > { %1597 = vrot.lane.b32.xlu1 %v5689_v60, %s5159_s5 }
 0x40b   : > { %1593 = vrot.lane.b32.xlu1 %v5672_v51, %s5159_s5 }
 0x410   : > { %1320 = vrot.lane.b32.xlu0 %v5685_v59, %s5158_s15 }
 0x414   : > { %1316 = vrot.lane.b32.xlu0 %v5678_v54, %s5158_s15 }
 0x418   : > { %1599 = vrot.lane.b32.xlu0 %v5685_v59, %s5159_s5 }
 0x41c   : > { %1595 = vrot.lane.b32.xlu0 %v5678_v54, %s5159_s5 }
 0x42f   : > { %1551 = vmax.xlane.f32.xlu1 %v1550_v33 }
 0x471   : > { %v1271_v34 = vpop.xlane.xlu1 %1270 }
 0x472   : > { %v1279_v35 = vsub.f32 %v1263_v11, %v1271_v34 }
 0x473   : > { %v1268_v36 = vpop.xlane.xlu0 %1267 }
 0x474   : > { %v1284_v37 = vmul.f32 1.442695, %v1279_v35  ;;  %v1278_v38 = vsub.f32 %v1262_v13, %v1268_v36 }
 0x476   : > { %4579 = vpow2.f32 %v1284_v37  ;;  %v1282_v39 = vmul.f32 1.442695, %v1278_v38 }
 0x477   : > { %v1546_v40 = vpop.xlane.xlu1 %1545  ;;  %v1274_v41 = vpop.xlane.xlu0 %1273 }
 0x478   : > { %4581 = vpow2.f32 %v1282_v39  ;;  %v1556_v42 = vsub.f32 %v1540_v20, %v1546_v40  ;;  %v1280_v14 = vsub.f32 %v5734_v21, %v1274_v41 }
 0x47a   : > { %v1560_v43 = vmul.f32 1.442695, %v1556_v42  ;;  %v1286_v16 = vmul.f32 1.442695, %v1280_v14 }
 0x47b   : > { %v1277_v44 = vpop.xlane.xlu0 %1276  ;;  %v1319_v1 = vpop.permute.xlu1 %1318 }
 0x47c   : > { %4583 = vpow2.f32 %v1560_v43  ;;  %v1281_v45 = vsub.f32 %v1265_v22, %v1277_v44 }
 0x47e   : > { %v1288_v53 = vmul.f32 1.442695, %v1281_v45 }
 0x47f   : > { %v1549_v49 = vpop.xlane.xlu0 %1548  ;;  %v1315_v6 = vpop.permute.xlu1 %1314 }
 0x480   : > { %v1557_v50 = vsub.f32 %v1541_v25, %v1549_v49 }
 0x482   : > { %v1562_v56 = vmul.f32 1.442695, %v1557_v50 }
 0x483   : > { %v5765_v58 = vpop.eup %4579  ;;  %v1555_v61 = vpop.xlane.xlu0 %1554 }
 0x484   : > { %4585 = vpow2.f32 %v1562_v56  ;;  %v1293_v62 = vsel %vm1046_vm3, %v5765_v58, 0.0  ;;  %v1559_v13 = vsub.f32 %v5740_v28, %v1555_v61  ;;  %v1598_v21 = vpop.permute.xlu1 %1597 }
 0x485   : > { %v5769_v63 = vpop.eup %4581  ;;  %1294 = vadd.xlane.f32.xlu0 %v1293_v62  ;;  %4587 = vpow2.f32 %v1288_v53 }
 0x486   : > { %v1290_v0 = vsel %vm1046_vm3, %v5769_v63, 0.0  ;;  %v1566_v15 = vmul.f32 1.442695, %v1559_v13 }
 0x487   : > { %1291 = vadd.xlane.f32.xlu1 %v1290_v0  ;;  %v1321_v2 = vpop.permute.xlu0 %1320 }
 0x488   : > { %4128 = vmatprep.subr.mxu0 %v1321_v2  ;;  %4589 = vpow2.f32 %v1566_v15  ;;  %v1594_v22 = vpop.permute.xlu1 %1593 }
 0x489   : > { %v5773_v3 = vpop.eup %4583  ;;  %4129 = vmatpush3.msra.mxu0 %v1321_v2  ;;  %4591 = vpow2.f32 %v1286_v16 }
 0x48a   : > { %4130 = vmatprep.subr.mxu0 %v1319_v1  ;;  %v1568_v4 = vsel %vm1046_vm3, %v5773_v3, 0.0 }
 0x48b   : > { %1569 = vadd.xlane.f32.xlu1 %v1568_v4  ;;  %4131 = vmatpush3.msra.mxu0 %v1319_v1  ;;  %v1317_v5 = vpop.permute.xlu0 %1316 }
 0x48c   : > { %4132 = vmatprep.subr.mxu0 %v1317_v5 }
 0x48d   : > { %4133 = vmatpush3.msra.mxu0 %v1317_v5 }
 0x48e   : > { %4134 = vmatprep.subr.mxu0 %v1315_v6 }
 0x48f   : > { %4135 = vmatpush3.msra.mxu0 %v1315_v6  ;;  %v5777_v7 = vpop.permute.xlu0 %1599 }
 0x490   : > { %4156 = vmatprep.subr.mxu0 %v5777_v7 }
 0x491   : > { %v5780_v8 = vpop.eup %4585 }
 0x492   : > { %v1571_v10 = vsel %vm1046_vm3, %v5780_v8, 0.0  ;;  %v5784_v11 = vpop.eup %4587 }
 0x493   : > { %1572 = vadd.xlane.f32.xlu0 %v1571_v10  ;;  %v1299_v12 = vsel %vm1046_vm3, %v5784_v11, 0.0  ;;  %v1596_v28 = vpop.permute.xlu0 %1595 }
 0x495   : > { %v5795_v17 = vpop.eup %4589 }
 0x496   : > { %v1577_v18 = vsel %vm1046_vm3, %v5795_v17, 0.0  ;;  %v5801_v19 = vpop.eup %4591 }
 0x497   : > { %1300 = vadd.xlane.f32.xlu0 %v1299_v12  ;;  %v1296_v20 = vsel %vm1046_vm3, %v5801_v19, 0.0 }
 0x49c   : > { %1714 = vrot.lane.b32.xlu1 %v5689_v60, %s5160_s19 }
 0x4ad   : > { %1716 = vrot.lane.b32.xlu0 %v5685_v59, %s5160_s19 }
 0x4b1   : > { %1712 = vrot.lane.b32.xlu0 %v5678_v54, %s5160_s19 }
 0x4b5   : > { %1702 = vrot.lane.b32.xlu0 %v5672_v51, %s5161_s2 }
 0x4b8   : > { %v1552_v23 = vpop.xlane.xlu1 %1551 }
 0x4b9   : > { %1706 = vrot.lane.b32.xlu0 %v5689_v60, %s5161_s2  ;;  %v1558_v24 = vsub.f32 %v5761_v32, %v1552_v23 }
 0x4bb   : > { %v1564_v25 = vmul.f32 1.442695, %v1558_v24 }
 0x4bd   : > { %1876 = vrot.lane.b32.xlu0 %v5689_v60, %s5162_s14  ;;  %4593 = vpow2.f32 %v1564_v25 }
 0x4c0   : > { %1578 = vadd.xlane.f32.xlu1 %v1577_v18 }
 0x4c4   : > { %1297 = vadd.xlane.f32.xlu1 %v1296_v20 }
 0x4ca   : > { %v5807_v26 = vpop.eup %4593 }
 0x4cb   : > { %v1574_v27 = vsel %vm1046_vm3, %v5807_v26, 0.0 }
 0x4d5   : > { %1710 = vrot.lane.b32.xlu1 %v5672_v51, %s5160_s19 }
 0x4f9   : > { %1575 = vadd.xlane.f32.xlu1 %v1574_v27 }
 0x50a   : > { %1704 = vrot.lane.b32.xlu1 %v5678_v54, %s5161_s2 }
 0x50e   : > { %1708 = vrot.lane.b32.xlu1 %v5685_v59, %s5161_s2  ;;  %v1295_v29 = vpop.xlane.xlu0 %1294 }
 0x50f   : > { %4595 = vrcp.f32 %v1295_v29 }
 0x510   : > { %v1292_v30 = vpop.xlane.xlu1 %1291 }
 0x511   : > { %4597 = vrcp.f32 %v1292_v30 }
 0x512   : > { %1878 = vrot.lane.b32.xlu1 %v5685_v59, %s5162_s14 }
 0x514   : > { %v1570_v31 = vpop.xlane.xlu1 %1569 }
 0x515   : > { %4599 = vrcp.f32 %v1570_v31 }
 0x516   : > { %1874 = vrot.lane.b32.xlu1 %v5678_v54, %s5162_s14 }
 0x518   : > { %v1715_v45 = vpop.permute.xlu1 %1714 }
 0x51a   : > { %1872 = vrot.lane.b32.xlu1 %v5672_v51, %s5162_s14 }
 0x51c   : > { %v4596_v32 = vpop.eup %4595  ;;  %v1573_v33 = vpop.xlane.xlu0 %1572 }
 0x51d   : > { %v1307_v34 = vmul.f32 %v4596_v32, %v5765_v58  ;;  %4601 = vrcp.f32 %v1573_v33 }
 0x51e   : > { %v4598_v35 = vpop.eup %4597 }
 0x51f   : > { %1311 = vst.msk [vmem:[%s5623_s20 + $0x8] sm:$0xff] %vm1046_vm3, %v1307_v34  ;;  %v1306_v36 = vmul.f32 %v4598_v35, %v5769_v63 }
 0x520   : > { %v1301_v37 = vpop.xlane.xlu0 %1300 }
 0x521   : > { %4603 = vrcp.f32 %v1301_v37  ;;  %1310 = vst.msk [vmem:[%s5623_s20] sm:$0xff] %vm1046_vm3, %v1306_v36  ;;  %4136 = vmatprep.mubr.msk.f32.mxu0 %vm1046_vm3, %v1306_v36 }
 0x522   : > { %v4600_v38 = vpop.eup %4599  ;;  %4137 = vmatmul.mubr.msk.f32.vlgmr.msra.gmra.mxu0 %vm1046_vm3, %v1307_v34 }
 0x523   : > { %4157 = vmatpush3.msra.mxu0 %v5777_v7  ;;  %v1584_v39 = vmul.f32 %v4600_v38, %v5773_v3 }
 0x524   : > { %4158 = vmatprep.subr.mxu0 %v1598_v21  ;;  %v1717_v40 = vpop.permute.xlu0 %1716 }
 0x525   : > { %4159 = vmatpush3.msra.mxu0 %v1598_v21  ;;  %3864 = vst.msk [vmem:[%s5623_s20 + $0x20] sm:$0xff] %vm1046_vm3, %v1584_v39 }
 0x526   : > { %4160 = vmatprep.subr.mxu0 %v1596_v28 }
 0x527   : > { %4161 = vmatpush3.msra.mxu0 %v1596_v28 }
 0x528   : > { %4162 = vmatprep.subr.mxu0 %v1594_v22  ;;  %v1713_v62 = vpop.permute.xlu0 %1712 }
 0x529   : > { %4163 = vmatpush3.msra.mxu0 %v1594_v22 }
 0x52a   : > { %v4602_v41 = vpop.eup %4601  ;;  %4170 = vmatprep.subr.msk.mxu0 %vm1160_vm4, %v1717_v40 }
 0x52b   : > { %v1585_v42 = vmul.f32 %v4602_v41, %v5780_v8 }
 0x52c   : > { %v1703_v1 = vpop.permute.xlu0 %1702 }
 0x52d   : > { %3865 = vst.msk [vmem:[%s5623_s20 + $0x28] sm:$0xff] %vm1046_vm3, %v1585_v42 }
 0x52e   : > { %v4604_v43 = vpop.eup %4603 }
 0x52f   : > { %v1309_v44 = vmul.f32 %v4604_v43, %v5784_v11 }
 0x530   : > { %v1707_v3 = vpop.permute.xlu0 %1706 }
 0x531   : > { %1313 = vst.msk [vmem:[%s5623_s20 + $0x18] sm:$0xff] %vm1046_vm3, %v1309_v44 }
 0x534   : > { %v1877_v7 = vpop.permute.xlu0 %1876 }
 0x549   : > { %v1579_v49 = vpop.xlane.xlu1 %1578 }
 0x54a   : > { %4605 = vrcp.f32 %v1579_v49 }
 0x54d   : > { %v1298_v50 = vpop.xlane.xlu1 %1297 }
 0x54e   : > { %4607 = vrcp.f32 %v1298_v50 }
 0x551   : > { %v1711_v63 = vpop.permute.xlu1 %1710 }
 0x557   : > { %v4606_v53 = vpop.eup %4605 }
 0x558   : > { %v1587_v56 = vmul.f32 %v4606_v53, %v5795_v17 }
 0x55a   : > { %3867 = vst.msk [vmem:[%s5623_s20 + $0x38] sm:$0xff] %vm1046_vm3, %v1587_v56 }
 0x55b   : > { %v4608_v58 = vpop.eup %4607 }
 0x55c   : > { %v1308_v61 = vmul.f32 %v4608_v58, %v5801_v19 }
 0x55e   : > { %1312 = vst.msk [vmem:[%s5623_s20 + $0x10] sm:$0xff] %vm1046_vm3, %v1308_v61  ;;  %4139 = vmatprep.mubr.msk.f32.mxu0 %vm1046_vm3, %v1308_v61 }
 0x55f   : > { %4140 = vmatmul.mubr.msk.f32.gmra.mxu0 %vm1046_vm3, %v1309_v44 }
 0x560   : > { %4164 = vmatprep.mubr.msk.f32.mxu0 %vm1046_vm3, %v1584_v39 }
 0x563   : > { %4165 = vmatmul.mubr.msk.f32.vlgmr.msra.gmra.mxu0 %vm1046_vm3, %v1585_v42 }
 0x564   : > { %4171 = vmatpush3.xpose.msk.msra.mxu0 %vm1160_vm4, %v1717_v40 }
 0x565   : > { %4172 = vmatprep.subr.msk.mxu0 %vm1160_vm4, %v1715_v45 }
 0x568   : > { %4173 = vmatpush3.xpose.msk.msra.mxu0 %vm1160_vm4, %v1715_v45 }
 0x569   : > { %4174 = vmatprep.subr.msk.mxu0 %vm1160_vm4, %v1713_v62 }
 0x56c   : > { %4175 = vmatpush3.xpose.msk.msra.mxu0 %vm1160_vm4, %v1713_v62 }
 0x56d   : > { %4176 = vmatprep.subr.msk.mxu0 %vm1160_vm4, %v1711_v63 }
 0x570   : > { %4177 = vmatpush3.xpose.msk.msra.mxu0 %vm1160_vm4, %v1711_v63 }
 0x582   : > { %v1576_v0 = vpop.xlane.xlu1 %1575 }
 0x583   : > { %4609 = vrcp.f32 %v1576_v0 }
 0x586   : > { %v1705_v2 = vpop.permute.xlu1 %1704 }
 0x58a   : > { %v1709_v4 = vpop.permute.xlu1 %1708 }
 0x58e   : > { %v1879_v5 = vpop.permute.xlu1 %1878 }
 0x58f   : > { %4184 = vmatprep.subr.mxu1 %v1879_v5 }
 0x590   : > { %v4610_v6 = vpop.eup %4609  ;;  %4185 = vmatpush3.msra.mxu1 %v1879_v5 }
 0x591   : > { %4186 = vmatprep.subr.mxu1 %v1877_v7  ;;  %v1586_v8 = vmul.f32 %v4610_v6, %v5807_v26 }
 0x592   : > { %v1875_v10 = vpop.permute.xlu1 %1874  ;;  %4187 = vmatpush3.msra.mxu1 %v1877_v7  ;;  %v1042_v7 = vsub.s32 1, %v5662_v46 }
 0x593   : > { %3866 = vst.msk [vmem:[%s5623_s20 + $0x30] sm:$0xff] %vm1046_vm3, %v1586_v8  ;;  %4167 = vmatprep.mubr.msk.f32.mxu0 %vm1046_vm3, %v1586_v8  ;;  %4188 = vmatprep.subr.mxu1 %v1875_v10 }
 0x594   : > { %4168 = vmatmul.mubr.msk.f32.gmra.mxu0 %vm1046_vm3, %v1587_v56  ;;  %4189 = vmatpush3.msra.mxu1 %v1875_v10  ;;  %v1043_v10 = vrot.slane %v5668_v48, %v1042_v7 }
 0x595   : > { %4178 = vmatprep.mubr.msk.f32.mxu0 %vm1160_vm4, %v1703_v1 }
 0x596   : > { %v1873_v11 = vpop.permute.xlu1 %1872 }
 0x597   : > { %4190 = vmatprep.subr.mxu1 %v1873_v11 }
 0x598   : > { %4179 = vmatmul.mubr.msk.f32.vlgmr.msra.gmra.mxu0 %vm1160_vm4, %v1705_v2  ;;  %4191 = vmatpush3.msra.mxu1 %v1873_v11  ;;  %v5922_v11 = vadd.f32 %v5730_v9, %v1043_v10 }
 0x599   : > { %4181 = vmatprep.mubr.msk.f32.mxu0 %vm1160_vm4, %v1707_v3 }
 0x59c   : > { %4182 = vmatmul.mubr.msk.f32.gmra.mxu0 %vm1160_vm4, %v1709_v4 }
 0x5e2   : > { %v5864_v12 = vpop.f32.mrf.mxu0 }
 0x5e4   : > { %v5866_v13 = vpop.f32.mrf.mxu0 }
 0x61f   : > { %v5868_v14 = vpop.f32.mrf.mxu0 }
 0x621   : > { %v5870_v15 = vpop.f32.mrf.mxu0 }
 0x623   : > { %v5872_v16 = vpop.f32.mrf.mxu0 }
 0x625   : > { %v5874_v17 = vpop.f32.mrf.mxu0 }
 0x654   : > { %v5876_v18 = vpop.f32.mrf.mxu0 }
 0x656   : > { %v5878_v19 = vpop.f32.mrf.mxu0 }
 0x658   : > { %v4180_v20 = vpop.f32.mrf.mxu0 }
 0x659   : > { %v1820_v21 = vmul.f32 0.4472136, %v4180_v20 }
 0x65a   : > { %v1800_v22 = vpop.f32.mrf.mxu0 }
 0x65b   : > { %v1819_v23 = vmul.f32 0.4472136, %v1800_v22  ;;  %v1826_v24 = vsel %vm1046_vm3, %v1820_v21, -inf }
 0x65c   : > { %1827 = vmax.xlane.f32.xlu1 %v1826_v24  ;;  %v4183_v25 = vpop.f32.mrf.mxu0 }
 0x65d   : > { %v1822_v26 = vmul.f32 0.4472136, %v4183_v25  ;;  %v1823_v27 = vsel %vm1046_vm3, %v1819_v23, -inf }
 0x65e   : > { %1824 = vmax.xlane.f32.xlu0 %v1823_v27  ;;  %v1810_v28 = vpop.f32.mrf.mxu0 }
 0x65f   : > { %v1821_v29 = vmul.f32 0.4472136, %v1810_v28  ;;  %v1832_v30 = vsel %vm1046_vm3, %v1822_v26, -inf }
 0x661   : > { %v1829_v31 = vsel %vm1046_vm3, %v1821_v29, -inf }
 0x662   : > { %1833 = vmax.xlane.f32.xlu0 %v1832_v30 }
 0x666   : > { %1830 = vmax.xlane.f32.xlu0 %v1829_v31 }
 0x66d   : > { %1993 = vrot.lane.b32.xlu1 %v5689_v60, %s5163_s29 }
 0x67c   : > { %1995 = vrot.lane.b32.xlu0 %v5685_v59, %s5163_s29 }
 0x6e5   : > { %v1828_v32 = vpop.xlane.xlu1 %1827 }
 0x6e6   : > { %v1836_v33 = vsub.f32 %v1820_v21, %v1828_v32  ;;  %v5934_v32 = vadd.f32 %v5683_v57, %v1043_v10 }
 0x6e7   : > { %v1825_v34 = vpop.xlane.xlu0 %1824 }
 0x6e8   : > { %v1841_v35 = vmul.f32 1.442695, %v1836_v33  ;;  %v1835_v36 = vsub.f32 %v1819_v23, %v1825_v34  ;;  %v5940_v33 = vadd.f32 %v5680_v55, %v1043_v10  ;;  %v5945_v34 = vadd.f32 %v5674_v52, %v1043_v10 }
 0x6e9   : > { %v1994_v63 = vpop.permute.xlu1 %1993 }
 0x6ea   : > { %4611 = vpow2.f32 %v1841_v35  ;;  %v1839_v37 = vmul.f32 1.442695, %v1835_v36 }
 0x6eb   : > { %v1834_v38 = vpop.xlane.xlu0 %1833 }
 0x6ec   : > { %4613 = vpow2.f32 %v1839_v37  ;;  %v1838_v45 = vsub.f32 %v1822_v26, %v1834_v38 }
 0x6ee   : > { %v1845_v50 = vmul.f32 1.442695, %v1838_v45 }
 0x6ef   : > { %v1831_v39 = vpop.xlane.xlu0 %1830 }
 0x6f0   : > { %v1837_v49 = vsub.f32 %v1821_v29, %v1831_v39  ;;  %4615 = vpow2.f32 %v1845_v50 }
 0x6f2   : > { %v1843_v53 = vmul.f32 1.442695, %v1837_v49 }
 0x6f3   : > { %v1996_v40 = vpop.permute.xlu0 %1995 }
 0x6f4   : > { %4198 = vmatprep.subr.msk.mxu1 %vm1160_vm4, %v1996_v40  ;;  %4617 = vpow2.f32 %v1843_v53 }
 0x6f7   : > { %v4612_v41 = vpop.eup %4611 }
 0x6f8   : > { %v1850_v42 = vsel %vm1046_vm3, %v4612_v41, 0.0 }
 0x6f9   : > { %v4614_v43 = vpop.eup %4613  ;;  %1851 = vadd.xlane.f32.xlu0 %v1850_v42 }
 0x6fa   : > { %v1847_v44 = vsel %vm1046_vm3, %v4614_v43, 0.0 }
 0x6fb   : > { %1848 = vadd.xlane.f32.xlu1 %v1847_v44 }
 0x6fd   : > { %v4616_v56 = vpop.eup %4615 }
 0x6fe   : > { %v1856_v61 = vsel %vm1046_vm3, %v4616_v56, 0.0 }
 0x701   : > { %v4618_v58 = vpop.eup %4617 }
 0x702   : > { %v1853_v62 = vsel %vm1046_vm3, %v4618_v58, 0.0 }
 0x70c   : > { %1989 = vrot.lane.b32.xlu1 %v5672_v51, %s5163_s29 }
 0x70f   : > { %1991 = vrot.lane.b32.xlu0 %v5678_v54, %s5163_s29 }
 0x72e   : > { %1857 = vadd.xlane.f32.xlu0 %v1856_v61 }
 0x730   : > { %1854 = vadd.xlane.f32.xlu1 %v1853_v62 }
 0x741   : > { %1983 = vrot.lane.b32.xlu1 %v5678_v54, %s5164_s27 }
 0x744   : > { %1981 = vrot.lane.b32.xlu0 %v5672_v51, %s5164_s27 }
 0x745   : > { %1987 = vrot.lane.b32.xlu1 %v5685_v59, %s5164_s27 }
 0x748   : > { %1985 = vrot.lane.b32.xlu0 %v5689_v60, %s5164_s27 }
 0x749   : > { %2157 = vrot.lane.b32.xlu1 %v5685_v59, %s5165_s21 }
 0x74c   : > { %2155 = vrot.lane.b32.xlu0 %v5689_v60, %s5165_s21 }
 0x74d   : > { %2153 = vrot.lane.b32.xlu1 %v5678_v54, %s5165_s21 }
 0x751   : > { %2151 = vrot.lane.b32.xlu1 %v5672_v51, %s5165_s21 }
 0x782   : > { %v1852_v0 = vpop.xlane.xlu0 %1851 }
 0x783   : > { %4619 = vrcp.f32 %v1852_v0 }
 0x784   : > { %v1849_v1 = vpop.xlane.xlu1 %1848 }
 0x785   : > { %4621 = vrcp.f32 %v1849_v1 }
 0x786   : > { %v1992_v6 = vpop.permute.xlu0 %1991 }
 0x788   : > { %v1990_v8 = vpop.permute.xlu1 %1989 }
 0x790   : > { %v4620_v2 = vpop.eup %4619 }
 0x791   : > { %v1864_v3 = vmul.f32 %v4620_v2, %v4612_v41 }
 0x792   : > { %v4622_v4 = vpop.eup %4621 }
 0x793   : > { %3881 = vst.msk [vmem:[%s5623_s20 + $0x48] sm:$0xff] %vm1046_vm3, %v1864_v3  ;;  %v1863_v5 = vmul.f32 %v4622_v4, %v4614_v43 }
 0x795   : > { %3880 = vst.msk [vmem:[%s5623_s20 + $0x40] sm:$0xff] %vm1046_vm3, %v1863_v5  ;;  %4192 = vmatprep.mubr.msk.f32.mxu1 %vm1046_vm3, %v1863_v5 }
 0x796   : > { %4193 = vmatmul.mubr.msk.f32.vlgmr.msra.gmra.mxu1 %vm1046_vm3, %v1864_v3 }
 0x797   : > { %4199 = vmatpush3.xpose.msk.msra.mxu1 %vm1160_vm4, %v1996_v40 }
 0x798   : > { %4200 = vmatprep.subr.msk.mxu1 %vm1160_vm4, %v1994_v63 }
 0x79b   : > { %4201 = vmatpush3.xpose.msk.msra.mxu1 %vm1160_vm4, %v1994_v63 }
 0x79c   : > { %4202 = vmatprep.subr.msk.mxu1 %vm1160_vm4, %v1992_v6 }
 0x79f   : > { %4203 = vmatpush3.xpose.msk.msra.mxu1 %vm1160_vm4, %v1992_v6 }
 0x7a0   : > { %4204 = vmatprep.subr.msk.mxu1 %vm1160_vm4, %v1990_v8 }
 0x7a3   : > { %4205 = vmatpush3.xpose.msk.msra.mxu1 %vm1160_vm4, %v1990_v8 }
 0x7a4   : > { %4240 = vmatprep.subr.mxu1 %v5922_v11 }
 0x7b7   : > { %v1858_v20 = vpop.xlane.xlu0 %1857 }
 0x7b8   : > { %4623 = vrcp.f32 %v1858_v20 }
 0x7b9   : > { %v1855_v21 = vpop.xlane.xlu1 %1854 }
 0x7ba   : > { %4625 = vrcp.f32 %v1855_v21 }
 0x7bb   : > { %v1982_v22 = vpop.permute.xlu0 %1981 }
 0x7bd   : > { %v1984_v23 = vpop.permute.xlu1 %1983 }
 0x7bf   : > { %v1986_v24 = vpop.permute.xlu0 %1985 }
 0x7c1   : > { %v1988_v25 = vpop.permute.xlu1 %1987 }
 0x7c3   : > { %v2156_v28 = vpop.permute.xlu0 %2155 }
 0x7c5   : > { %v4624_v48 = vpop.eup %4623  ;;  %v2158_v26 = vpop.permute.xlu1 %2157 }
 0x7c6   : > { %4212 = vmatprep.subr.mxu0 %v2158_v26  ;;  %v1866_v27 = vmul.f32 %v4624_v48, %v4616_v56 }
 0x7c7   : > { %v4626_v9 = vpop.eup %4625  ;;  %4213 = vmatpush3.msra.mxu0 %v2158_v26 }
 0x7c8   : > { %4214 = vmatprep.subr.mxu0 %v2156_v28  ;;  %v1865_v29 = vmul.f32 %v4626_v9, %v4618_v58  ;;  %3883 = vst.msk [vmem:[%s5623_s20 + $0x58] sm:$0xff] %vm1046_vm3, %v1866_v27 }
 0x7c9   : > { %v2154_v30 = vpop.permute.xlu1 %2153  ;;  %4215 = vmatpush3.msra.mxu0 %v2156_v28 }
 0x7ca   : > { %3882 = vst.msk [vmem:[%s5623_s20 + $0x50] sm:$0xff] %vm1046_vm3, %v1865_v29  ;;  %4195 = vmatprep.mubr.msk.f32.mxu1 %vm1046_vm3, %v1865_v29  ;;  %4216 = vmatprep.subr.mxu0 %v2154_v30 }
 0x7cb   : > { %4196 = vmatmul.mubr.msk.f32.gmra.mxu1 %vm1046_vm3, %v1866_v27  ;;  %4217 = vmatpush3.msra.mxu0 %v2154_v30 }
 0x7cc   : > { %4206 = vmatprep.mubr.msk.f32.mxu1 %vm1160_vm4, %v1982_v22 }
 0x7cd   : > { %v2152_v31 = vpop.permute.xlu1 %2151 }
 0x7ce   : > { %4218 = vmatprep.subr.mxu0 %v2152_v31 }
 0x7cf   : > { %4207 = vmatmul.mubr.msk.f32.vlgmr.msra.gmra.mxu1 %vm1160_vm4, %v1984_v23  ;;  %4219 = vmatpush3.msra.mxu0 %v2152_v31 }
 0x7d0   : > { %4241 = vmatpush3.msra.mxu1 %v5922_v11  ;;  %4209 = vmatprep.mubr.msk.f32.mxu1 %vm1160_vm4, %v1986_v24 }
 0x7d1   : > { %4242 = vmatprep.subr.mxu1 %v5934_v32 }
 0x7d2   : > { %4243 = vmatpush3.msra.mxu1 %v5934_v32 }
 0x7d3   : > { %4244 = vmatprep.subr.mxu1 %v5940_v33  ;;  %4210 = vmatmul.mubr.msk.f32.gmra.mxu1 %vm1160_vm4, %v1988_v25 }
 0x7d4   : > { %4245 = vmatpush3.msra.mxu1 %v5940_v33 }
 0x7d5   : > { %4246 = vmatprep.subr.mxu1 %v5945_v34 }
 0x7d6   : > { %4247 = vmatpush3.msra.mxu1 %v5945_v34 }
 0x856   : > { %v5952_v57 = vpop.f32.mrf.mxu1 }
 0x858   : > { %v5954_v55 = vpop.f32.mrf.mxu1 }
 0x88b   : > { %v5956_v35 = vpop.f32.mrf.mxu1 }
 0x88d   : > { %v5958_v36 = vpop.f32.mrf.mxu1 }
 0x88f   : > { %v4208_v52 = vpop.f32.mrf.mxu1 }
 0x890   : > { %v2099_v37 = vmul.f32 0.4472136, %v4208_v52 }
 0x891   : > { %v2079_v38 = vpop.f32.mrf.mxu1 }
 0x892   : > { %v2098_v39 = vmul.f32 0.4472136, %v2079_v38  ;;  %v2105_v40 = vsel %vm1046_vm3, %v2099_v37, -inf }
 0x893   : > { %2106 = vmax.xlane.f32.xlu1 %v2105_v40  ;;  %v4211_v41 = vpop.f32.mrf.mxu1 }
 0x894   : > { %v2101_v42 = vmul.f32 0.4472136, %v4211_v41  ;;  %v2102_v43 = vsel %vm1046_vm3, %v2098_v39, -inf }
 0x895   : > { %2103 = vmax.xlane.f32.xlu0 %v2102_v43  ;;  %v2089_v44 = vpop.f32.mrf.mxu1 }
 0x896   : > { %v2100_v45 = vmul.f32 0.4472136, %v2089_v44  ;;  %v2111_v49 = vsel %vm1046_vm3, %v2101_v42, -inf }
 0x898   : > { %v2108_v50 = vsel %vm1046_vm3, %v2100_v45, -inf }
 0x899   : > { %2112 = vmax.xlane.f32.xlu0 %v2111_v49 }
 0x89d   : > { %2109 = vmax.xlane.f32.xlu0 %v2108_v50 }
 0x8a4   : > { %2272 = vrot.lane.b32.xlu1 %v5689_v60, %s5166_s24 }
 0x8b3   : > { %2274 = vrot.lane.b32.xlu0 %v5685_v59, %s5166_s24 }
 0x91c   : > { %v2107_v53 = vpop.xlane.xlu1 %2106 }
 0x91d   : > { %v2115_v56 = vsub.f32 %v2099_v37, %v2107_v53 }
 0x91e   : > { %v2104_v58 = vpop.xlane.xlu0 %2103 }
 0x91f   : > { %v2120_v61 = vmul.f32 1.442695, %v2115_v56  ;;  %v2114_v62 = vsub.f32 %v2098_v39, %v2104_v58 }
 0x920   : > { %v2273_v48 = vpop.permute.xlu1 %2272 }
 0x921   : > { %4627 = vpow2.f32 %v2120_v61  ;;  %v2118_v63 = vmul.f32 1.442695, %v2114_v62 }
 0x922   : > { %v2113_v0 = vpop.xlane.xlu0 %2112 }
 0x923   : > { %4629 = vpow2.f32 %v2118_v63  ;;  %v2117_v8 = vsub.f32 %v2101_v42, %v2113_v0 }
 0x925   : > { %v2124_v20 = vmul.f32 1.442695, %v2117_v8 }
 0x926   : > { %v2110_v1 = vpop.xlane.xlu0 %2109 }
 0x927   : > { %v2116_v10 = vsub.f32 %v2100_v45, %v2110_v1  ;;  %4631 = vpow2.f32 %v2124_v20 }
 0x929   : > { %v2122_v21 = vmul.f32 1.442695, %v2116_v10 }
 0x92a   : > { %v2275_v2 = vpop.permute.xlu0 %2274 }
 0x92b   : > { %4226 = vmatprep.subr.msk.mxu0 %vm1160_vm4, %v2275_v2  ;;  %4633 = vpow2.f32 %v2122_v21 }
 0x92e   : > { %v4628_v3 = vpop.eup %4627 }
 0x92f   : > { %v2129_v4 = vsel %vm1046_vm3, %v4628_v3, 0.0 }
 0x930   : > { %v4630_v5 = vpop.eup %4629  ;;  %2130 = vadd.xlane.f32.xlu0 %v2129_v4 }
 0x931   : > { %v2126_v6 = vsel %vm1046_vm3, %v4630_v5, 0.0 }
 0x932   : > { %2127 = vadd.xlane.f32.xlu1 %v2126_v6 }
 0x934   : > { %v4632_v22 = vpop.eup %4631 }
 0x935   : > { %v2135_v24 = vsel %vm1046_vm3, %v4632_v22, 0.0 }
 0x938   : > { %v4634_v23 = vpop.eup %4633 }
 0x939   : > { %v2132_v25 = vsel %vm1046_vm3, %v4634_v23, 0.0 }
 0x943   : > { %2268 = vrot.lane.b32.xlu1 %v5672_v51, %s5166_s24 }
 0x946   : > { %2270 = vrot.lane.b32.xlu0 %v5678_v54, %s5166_s24 }
 0x965   : > { %2136 = vadd.xlane.f32.xlu0 %v2135_v24 }
 0x967   : > { %2133 = vadd.xlane.f32.xlu1 %v2132_v25 }
 0x978   : > { %2262 = vrot.lane.b32.xlu1 %v5678_v54, %s5167_s28 }
 0x97b   : > { %2260 = vrot.lane.b32.xlu0 %v5672_v51, %s5167_s28 }
 0x97c   : > { %2266 = vrot.lane.b32.xlu1 %v5685_v59, %s5167_s28 }
 0x97f   : > { %2264 = vrot.lane.b32.xlu0 %v5689_v60, %s5167_s28 }
 0x9b9   : > { %v2131_v26 = vpop.xlane.xlu0 %2130 }
 0x9ba   : > { %4635 = vrcp.f32 %v2131_v26 }
 0x9bb   : > { %v2128_v27 = vpop.xlane.xlu1 %2127 }
 0x9bc   : > { %4637 = vrcp.f32 %v2128_v27 }
 0x9bd   : > { %v2271_v31 = vpop.permute.xlu0 %2270 }
 0x9bf   : > { %v2269_v52 = vpop.permute.xlu1 %2268 }
 0x9c7   : > { %v4636_v9 = vpop.eup %4635 }
 0x9c8   : > { %v2143_v28 = vmul.f32 %v4636_v9, %v4628_v3 }
 0x9c9   : > { %v4638_v29 = vpop.eup %4637 }
 0x9ca   : > { %3897 = vst.msk [vmem:[%s5623_s20 + $0x68] sm:$0xff] %vm1046_vm3, %v2143_v28  ;;  %v2142_v30 = vmul.f32 %v4638_v29, %v4630_v5 }
 0x9cc   : > { %3896 = vst.msk [vmem:[%s5623_s20 + $0x60] sm:$0xff] %vm1046_vm3, %v2142_v30  ;;  %4220 = vmatprep.mubr.msk.f32.mxu0 %vm1046_vm3, %v2142_v30 }
 0x9cd   : > { %4221 = vmatmul.mubr.msk.f32.vlgmr.msra.gmra.mxu0 %vm1046_vm3, %v2143_v28 }
 0x9ce   : > { %4227 = vmatpush3.xpose.msk.msra.mxu0 %vm1160_vm4, %v2275_v2 }
 0x9cf   : > { %4228 = vmatprep.subr.msk.mxu0 %vm1160_vm4, %v2273_v48 }
 0x9d2   : > { %4229 = vmatpush3.xpose.msk.msra.mxu0 %vm1160_vm4, %v2273_v48 }
 0x9d3   : > { %4230 = vmatprep.subr.msk.mxu0 %vm1160_vm4, %v2271_v31 }
 0x9d6   : > { %4231 = vmatpush3.xpose.msk.msra.mxu0 %vm1160_vm4, %v2271_v31 }
 0x9d7   : > { %4232 = vmatprep.subr.msk.mxu0 %vm1160_vm4, %v2269_v52 }
 0x9da   : > { %4233 = vmatpush3.xpose.msk.msra.mxu0 %vm1160_vm4, %v2269_v52 }
 0x9ee   : > { %v2137_v37 = vpop.xlane.xlu0 %2136 }
 0x9ef   : > { %4639 = vrcp.f32 %v2137_v37 }
 0x9f0   : > { %v2134_v38 = vpop.xlane.xlu1 %2133 }
 0x9f1   : > { %4641 = vrcp.f32 %v2134_v38 }
 0x9f2   : > { %v2261_v43 = vpop.permute.xlu0 %2260 }
 0x9f4   : > { %v2263_v44 = vpop.permute.xlu1 %2262 }
 0x9f6   : > { %v2265_v45 = vpop.permute.xlu0 %2264 }
 0x9f8   : > { %v2267_v49 = vpop.permute.xlu1 %2266 }
 0x9fc   : > { %v4640_v39 = vpop.eup %4639 }
 0x9fd   : > { %v2145_v40 = vmul.f32 %v4640_v39, %v4632_v22 }
 0x9fe   : > { %v4642_v41 = vpop.eup %4641 }
 0x9ff   : > { %v2144_v42 = vmul.f32 %v4642_v41, %v4634_v23  ;;  %3899 = vst.msk [vmem:[%s5623_s20 + $0x78] sm:$0xff] %vm1046_vm3, %v2145_v40 }
 0xa01   : > { %3898 = vst.msk [vmem:[%s5623_s20 + $0x70] sm:$0xff] %vm1046_vm3, %v2144_v42  ;;  %4223 = vmatprep.mubr.msk.f32.mxu0 %vm1046_vm3, %v2144_v42 }
 0xa02   : > { %4224 = vmatmul.mubr.msk.f32.gmra.mxu0 %vm1046_vm3, %v2145_v40 }
 0xa03   : > { %4234 = vmatprep.mubr.msk.f32.mxu0 %vm1160_vm4, %v2261_v43 }
 0xa06   : > { %4235 = vmatmul.mubr.msk.f32.vlgmr.msra.gmra.mxu0 %vm1160_vm4, %v2263_v44 }
 0xa07   : > { %4237 = vmatprep.mubr.msk.f32.mxu0 %vm1160_vm4, %v2265_v45 }
 0xa0a   : > { %4238 = vmatmul.mubr.msk.f32.gmra.mxu0 %vm1160_vm4, %v2267_v49 }
 0xa8d   : > { %v6000_v50 = vpop.f32.mrf.mxu0 }
 0xa8f   : > { %v6002_v53 = vpop.f32.mrf.mxu0 }
 0xac2   : > { %v6004_v56 = vpop.f32.mrf.mxu0 }
 0xac4   : > { %v6006_v58 = vpop.f32.mrf.mxu0 }
 0xac6   : > { %v4236_v61 = vpop.f32.mrf.mxu0 }
 0xac7   : > { %v2378_v62 = vmul.f32 0.4472136, %v4236_v61 }
 0xac8   : > { %v2358_v63 = vpop.f32.mrf.mxu0 }
 0xac9   : > { %v2377_v0 = vmul.f32 0.4472136, %v2358_v63  ;;  %v2384_v1 = vsel %vm1046_vm3, %v2378_v62, -inf }
 0xaca   : > { %2385 = vmax.xlane.f32.xlu1 %v2384_v1  ;;  %v4239_v2 = vpop.f32.mrf.mxu0 }
 0xacb   : > { %v2381_v3 = vsel %vm1046_vm3, %v2377_v0, -inf  ;;  %v2380_v6 = vmul.f32 0.4472136, %v4239_v2 }
 0xacc   : > { %2382 = vmax.xlane.f32.xlu0 %v2381_v3  ;;  %v2368_v4 = vpop.f32.mrf.mxu0 }
 0xacd   : > { %v2379_v5 = vmul.f32 0.4472136, %v2368_v4  ;;  %v2390_v10 = vsel %vm1046_vm3, %v2380_v6, -inf }
 0xacf   : > { %v2387_v8 = vsel %vm1046_vm3, %v2379_v5, -inf }
 0xad0   : > { %2388 = vmax.xlane.f32.xlu0 %v2387_v8 }
 0xad4   : > { %2391 = vmax.xlane.f32.xlu0 %v2390_v10 }
 0xadb   : > { %2541 = vrot.lane.b32.xlu1 %v5685_v59, %s5168_s16 }
 0xadf   : > { %2537 = vrot.lane.b32.xlu1 %v5678_v54, %s5168_s16 }
 0xb53   : > { %v2386_v20 = vpop.xlane.xlu1 %2385 }
 0xb54   : > { %v2394_v21 = vsub.f32 %v2378_v62, %v2386_v20 }
 0xb55   : > { %v2383_v22 = vpop.xlane.xlu0 %2382 }
 0xb56   : > { %v2399_v23 = vmul.f32 1.442695, %v2394_v21  ;;  %v2393_v24 = vsub.f32 %v2377_v0, %v2383_v22 }
 0xb57   : > { %v2542_v25 = vpop.permute.xlu1 %2541 }
 0xb58   : > { %4643 = vpow2.f32 %v2399_v23  ;;  %v2397_v48 = vmul.f32 1.442695, %v2393_v24  ;;  %4254 = vmatprep.subr.msk.mxu1 %vm1160_vm4, %v2542_v25 }
 0xb59   : > { %v2389_v29 = vpop.xlane.xlu0 %2388 }
 0xb5a   : > { %4645 = vpow2.f32 %v2397_v48  ;;  %v2395_v52 = vsub.f32 %v2379_v5, %v2389_v29 }
 0xb5b   : > { %v2538_v43 = vpop.permute.xlu1 %2537 }
 0xb5c   : > { %v2401_v38 = vmul.f32 1.442695, %v2395_v52 }
 0xb5d   : > { %v2392_v30 = vpop.xlane.xlu0 %2391 }
 0xb5e   : > { %v2396_v31 = vsub.f32 %v2380_v6, %v2392_v30 }
 0xb60   : > { %v2403_v37 = vmul.f32 1.442695, %v2396_v31 }
 0xb62   : > { %4647 = vpow2.f32 %v2403_v37 }
 0xb63   : > { %4649 = vpow2.f32 %v2401_v38 }
 0xb65   : > { %v4644_v26 = vpop.eup %4643 }
 0xb66   : > { %v2408_v27 = vsel %vm1046_vm3, %v4644_v26, 0.0 }
 0xb67   : > { %v4646_v9 = vpop.eup %4645  ;;  %2409 = vadd.xlane.f32.xlu0 %v2408_v27 }
 0xb68   : > { %v2405_v28 = vsel %vm1046_vm3, %v4646_v9, 0.0 }
 0xb69   : > { %2406 = vadd.xlane.f32.xlu1 %v2405_v28 }
 0xb6f   : > { %v4648_v39 = vpop.eup %4647 }
 0xb70   : > { %v4650_v40 = vpop.eup %4649  ;;  %v2414_v41 = vsel %vm1046_vm3, %v4648_v39, 0.0 }
 0xb71   : > { %v2411_v42 = vsel %vm1046_vm3, %v4650_v40, 0.0 }
 0xb7a   : > { %2535 = vrot.lane.b32.xlu1 %v5672_v51, %s5168_s16 }
 0xb7d   : > { %2539 = vrot.lane.b32.xlu0 %v5689_v60, %s5168_s16 }
 0xb9c   : > { %2415 = vadd.xlane.f32.xlu0 %v2414_v41 }
 0xb9e   : > { %2412 = vadd.xlane.f32.xlu1 %v2411_v42 }
 0xbaf   : > { %2529 = vrot.lane.b32.xlu1 %v5678_v54, %s5169_s6 }
 0xbb2   : > { %2527 = vrot.lane.b32.xlu0 %v5672_v51, %s5169_s6 }
 0xbb3   : > { %2533 = vrot.lane.b32.xlu1 %v5685_v59, %s5169_s6 }
 0xbb6   : > { %2531 = vrot.lane.b32.xlu0 %v5689_v60, %s5169_s6 }
 0xbf0   : > { %v2410_v44 = vpop.xlane.xlu0 %2409 }
 0xbf1   : > { %4651 = vrcp.f32 %v2410_v44 }
 0xbf2   : > { %v2407_v45 = vpop.xlane.xlu1 %2406 }
 0xbf3   : > { %4653 = vrcp.f32 %v2407_v45 }
 0xbf4   : > { %v2540_v51 = vpop.permute.xlu0 %2539 }
 0xbf6   : > { %v2536_v54 = vpop.permute.xlu1 %2535 }
 0xbfe   : > { %v4652_v49 = vpop.eup %4651 }
 0xbff   : > { %v2422_v61 = vmul.f32 %v4652_v49, %v4644_v26 }
 0xc00   : > { %v4654_v62 = vpop.eup %4653 }
 0xc01   : > { %3913 = vst.msk [vmem:[%s5623_s20 + $0x88] sm:$0xff] %vm1046_vm3, %v2422_v61  ;;  %v2421_v63 = vmul.f32 %v4654_v62, %v4646_v9 }
 0xc03   : > { %3912 = vst.msk [vmem:[%s5623_s20 + $0x80] sm:$0xff] %vm1046_vm3, %v2421_v63  ;;  %4248 = vmatprep.mubr.msk.f32.mxu1 %vm1046_vm3, %v2421_v63 }
 0xc04   : > { %4249 = vmatmul.mubr.msk.f32.vlgmr.msra.gmra.mxu1 %vm1046_vm3, %v2422_v61 }
 0xc05   : > { %4255 = vmatpush3.xpose.msk.msra.mxu1 %vm1160_vm4, %v2542_v25 }
 0xc06   : > { %4256 = vmatprep.subr.msk.mxu1 %vm1160_vm4, %v2540_v51 }
 0xc09   : > { %4257 = vmatpush3.xpose.msk.msra.mxu1 %vm1160_vm4, %v2540_v51 }
 0xc0a   : > { %4258 = vmatprep.subr.msk.mxu1 %vm1160_vm4, %v2538_v43 }
 0xc0d   : > { %4259 = vmatpush3.xpose.msk.msra.mxu1 %vm1160_vm4, %v2538_v43 }
 0xc0e   : > { %4260 = vmatprep.subr.msk.mxu1 %vm1160_vm4, %v2536_v54 }
 0xc11   : > { %4261 = vmatpush3.xpose.msk.msra.mxu1 %vm1160_vm4, %v2536_v54 }
 0xc25   : > { %v2416_v59 = vpop.xlane.xlu0 %2415 }
 0xc26   : > { %4655 = vrcp.f32 %v2416_v59 }
 0xc27   : > { %v2413_v60 = vpop.xlane.xlu1 %2412 }
 0xc28   : > { %4657 = vrcp.f32 %v2413_v60 }
 0xc29   : > { %v2528_v4 = vpop.permute.xlu0 %2527 }
 0xc2b   : > { %v2530_v5 = vpop.permute.xlu1 %2529 }
 0xc2d   : > { %v2532_v6 = vpop.permute.xlu0 %2531 }
 0xc2f   : > { %v2534_v8 = vpop.permute.xlu1 %2533 }
 0xc33   : > { %v4656_v0 = vpop.eup %4655 }
 0xc34   : > { %v2424_v1 = vmul.f32 %v4656_v0, %v4648_v39 }
 0xc35   : > { %v4658_v2 = vpop.eup %4657 }
 0xc36   : > { %v2423_v3 = vmul.f32 %v4658_v2, %v4650_v40  ;;  %3915 = vst.msk [vmem:[%s5623_s20 + $0x98] sm:$0xff] %vm1046_vm3, %v2424_v1 }
 0xc38   : > { %3914 = vst.msk [vmem:[%s5623_s20 + $0x90] sm:$0xff] %vm1046_vm3, %v2423_v3  ;;  %4251 = vmatprep.mubr.msk.f32.mxu1 %vm1046_vm3, %v2423_v3  ;;  %v1032_v3 = vld [vmem:[%s5612_s0 + $0x28] sm:$0xff] }
 0xc39   : > { %4252 = vmatmul.mubr.msk.f32.gmra.mxu1 %vm1046_vm3, %v2424_v1 }
 0xc3a   : > { %4262 = vmatprep.mubr.msk.f32.mxu1 %vm1160_vm4, %v2528_v4  ;;  %v1031_v4 = vld [vmem:[%s5612_s0 + $0x20] sm:$0xff] }
 0xc3d   : > { %4263 = vmatmul.mubr.msk.f32.vlgmr.msra.gmra.mxu1 %vm1160_vm4, %v2530_v5  ;;  %v1030_v5 = vld [vmem:[%s5612_s0 + $0x18] sm:$0xff] }
 0xc3e   : > { %4265 = vmatprep.mubr.msk.f32.mxu1 %vm1160_vm4, %v2532_v6  ;;  %v1029_v6 = vld [vmem:[%s5612_s0 + $0x10] sm:$0xff] }
 0xc41   : > { %4266 = vmatmul.mubr.msk.f32.gmra.mxu1 %vm1160_vm4, %v2534_v8  ;;  %v1028_v8 = vld [vmem:[%s5612_s0 + $0x8] sm:$0xff] }
 0xcc4   : > { %v4250_v10 = vpop.f32.mrf.mxu1 }
 0xcc6   : > { %v2508_v20 = vpop.f32.mrf.mxu1 }
 0xcf9   : > { %v6052_v21 = vpop.f32.mrf.mxu1 }
 0xcfb   : > { %v2518_v22 = vpop.f32.mrf.mxu1 }
 0xcfd   : > { %v4264_v23 = vpop.f32.mrf.mxu1 }
 0xcfe   : > { %v2645_v24 = vmul.f32 0.4472136, %v4264_v23 }
 0xcff   : > { %v2625_v25 = vpop.f32.mrf.mxu1 }
 0xd00   : > { %v2644_v48 = vmul.f32 0.4472136, %v2625_v25  ;;  %v2651_v26 = vsel %vm1046_vm3, %v2645_v24, -inf }
 0xd01   : > { %2652 = vmax.xlane.f32.xlu1 %v2651_v26  ;;  %v4267_v27 = vpop.f32.mrf.mxu1 }
 0xd02   : > { %v2648_v9 = vsel %vm1046_vm3, %v2644_v48, -inf  ;;  %v2647_v30 = vmul.f32 0.4472136, %v4267_v27 }
 0xd03   : > { %2649 = vmax.xlane.f32.xlu0 %v2648_v9  ;;  %v2635_v28 = vpop.f32.mrf.mxu1 }
 0xd04   : > { %v2646_v29 = vmul.f32 0.4472136, %v2635_v28  ;;  %v2657_v52 = vsel %vm1046_vm3, %v2647_v30, -inf }
 0xd06   : > { %v2654_v31 = vsel %vm1046_vm3, %v2646_v29, -inf }
 0xd07   : > { %2655 = vmax.xlane.f32.xlu0 %v2654_v31 }
 0xd0b   : > { %2658 = vmax.xlane.f32.xlu0 %v2657_v52 }
 0xd12   : > { %2707 = vrot.lane.b32.xlu1 %v5922_v11, %s5157_s22 }
 0xd8a   : > { %v2653_v37 = vpop.xlane.xlu1 %2652 }
 0xd8b   : > { %v2661_v38 = vsub.f32 %v2645_v24, %v2653_v37 }
 0xd8c   : > { %v2650_v39 = vpop.xlane.xlu0 %2649 }
 0xd8d   : > { %v2666_v40 = vmul.f32 1.442695, %v2661_v38  ;;  %v2660_v41 = vsub.f32 %v2644_v48, %v2650_v39 }
 0xd8e   : > { %v2708_v42 = vpop.permute.xlu1 %2707 }
 0xd8f   : > { %4659 = vpow2.f32 %v2666_v40  ;;  %v2664_v43 = vmul.f32 1.442695, %v2660_v41  ;;  %4268 = vmatprep.subr.mxu0 %v2708_v42 }
 0xd90   : > { %4269 = vmatpush3.msra.mxu0 %v2708_v42  ;;  %v2656_v44 = vpop.xlane.xlu0 %2655 }
 0xd91   : > { %4661 = vpow2.f32 %v2664_v43  ;;  %v2662_v60 = vsub.f32 %v2646_v29, %v2656_v44 }
 0xd93   : > { %v2668_v0 = vmul.f32 1.442695, %v2662_v60 }
 0xd94   : > { %v2659_v45 = vpop.xlane.xlu0 %2658 }
 0xd95   : > { %v2663_v49 = vsub.f32 %v2647_v30, %v2659_v45 }
 0xd97   : > { %v2670_v61 = vmul.f32 1.442695, %v2663_v49 }
 0xd99   : > { %4663 = vpow2.f32 %v2670_v61 }
 0xd9a   : > { %4665 = vpow2.f32 %v2668_v0 }
 0xd9c   : > { %v4660_v62 = vpop.eup %4659 }
 0xd9d   : > { %v2675_v63 = vsel %vm1046_vm3, %v4660_v62, 0.0 }
 0xd9e   : > { %v4662_v11 = vpop.eup %4661  ;;  %2676 = vadd.xlane.f32.xlu0 %v2675_v63 }
 0xd9f   : > { %v2672_v51 = vsel %vm1046_vm3, %v4662_v11, 0.0 }
 0xda0   : > { %2673 = vadd.xlane.f32.xlu1 %v2672_v51 }
 0xda6   : > { %v4664_v54 = vpop.eup %4663 }
 0xda7   : > { %v2681_v59 = vsel %vm1046_vm3, %v4664_v54, 0.0  ;;  %v4666_v1 = vpop.eup %4665 }
 0xda8   : > { %2682 = vadd.xlane.f32.xlu0 %v2681_v59 }
 0xdb1   : > { %2703 = vrot.lane.b32.xlu1 %v5940_v33, %s5157_s22  ;;  %v2678_v33 = vsel %vm1046_vm3, %v4666_v1, 0.0 }
 0xdbe   : > { %2705 = vrot.lane.b32.xlu0 %v5934_v32, %s5157_s22 }
 0xdc2   : > { %2814 = vrot.lane.b32.xlu0 %v5874_v17, %s5165_s21 }
 0xdc6   : > { %2830 = vrot.lane.b32.xlu0 %v5954_v55, %s5162_s14 }
 0xdca   : > { %2846 = vrot.lane.b32.xlu0 %v6002_v53, %s5159_s5 }
 0xdce   : > { %2862 = vrot.lane.b32.xlu0 %v2508_v20, %s5158_s15 }
 0xdd2   : > { %2864 = vrot.lane.b32.xlu0 %v4250_v10, %s5158_s15  ;;  %v1027_v10 = vld [vmem:[%s5612_s0] sm:$0xff]  ;;  %s6462_s0 = scalar_lea.vmem [#allocation10], %s5561_s1 }
 0xdd5   : > { %2679 = vadd.xlane.f32.xlu1 %v2678_v33 }
 0xdd6   : > { %2820 = vrot.lane.b32.xlu0 %v5876_v18, %s5165_s21 }
 0xdda   : > { %2850 = vrot.lane.b32.xlu0 %v6006_v58, %s5159_s5 }
 0xdde   : > { %2866 = vrot.lane.b32.xlu0 %v2518_v22, %s5158_s15 }
 0xde6   : > { %2701 = vrot.lane.b32.xlu1 %v5945_v34, %s5157_s22 }
 0xdea   : > { %2816 = vrot.lane.b32.xlu1 %v5872_v16, %s5165_s21 }
 0xdee   : > { %2832 = vrot.lane.b32.xlu1 %v5952_v57, %s5162_s14 }
 0xdf2   : > { %2848 = vrot.lane.b32.xlu1 %v6000_v50, %s5159_s5 }
 0xdf6   : > { %2818 = vrot.lane.b32.xlu1 %v5878_v19, %s5165_s21 }
 0xdfa   : > { %2834 = vrot.lane.b32.xlu1 %v5958_v36, %s5162_s14 }
 0xdfe   : > { %2836 = vrot.lane.b32.xlu1 %v5956_v35, %s5162_s14 }
 0xe02   : > { %2852 = vrot.lane.b32.xlu1 %v6004_v56, %s5159_s5 }
 0xe27   : > { %v2677_v16 = vpop.xlane.xlu0 %2676 }
 0xe28   : > { %4667 = vrcp.f32 %v2677_v16 }
 0xe29   : > { %v2674_v17 = vpop.xlane.xlu1 %2673 }
 0xe2a   : > { %4669 = vrcp.f32 %v2674_v17 }
 0xe2d   : > { %v2704_v55 = vpop.permute.xlu1 %2703 }
 0xe31   : > { %v2683_v18 = vpop.xlane.xlu0 %2682 }
 0xe32   : > { %4671 = vrcp.f32 %v2683_v18 }
 0xe35   : > { %v4668_v32 = vpop.eup %4667  ;;  %v2706_v19 = vpop.permute.xlu0 %2705 }
 0xe36   : > { %v2689_v34 = vmul.f32 %v4668_v32, %v4660_v62  ;;  %4270 = vmatprep.subr.mxu0 %v2706_v19 }
 0xe37   : > { %v4670_v57 = vpop.eup %4669  ;;  %4271 = vmatpush3.msra.mxu0 %v2706_v19 }
 0xe38   : > { %3929 = vst.msk [vmem:[%s5623_s20 + $0xa8] sm:$0xff] %vm1046_vm3, %v2689_v34  ;;  %4272 = vmatprep.subr.mxu0 %v2704_v55  ;;  %v2688_v35 = vmul.f32 %v4670_v57, %v4662_v11 }
 0xe39   : > { %4273 = vmatpush3.msra.mxu0 %v2704_v55  ;;  %v2815_v25 = vpop.permute.xlu0 %2814 }
 0xe3a   : > { %3928 = vst.msk [vmem:[%s5623_s20 + $0xa0] sm:$0xff] %vm1046_vm3, %v2688_v35  ;;  %4276 = vmatprep.mubr.msk.f32.mxu0 %vm1046_vm3, %v2688_v35  ;;  %v2890_v42 = vsel %vm1160_vm4, %v5866_v13, %v2815_v25  ;;  %v4691_v35 = vld [vmem:[#allocation2 + $0x8] sm:$0xff] }
 0xe3d   : > { %v2831_v48 = vpop.permute.xlu0 %2830 }
 0xe3e   : > { %v2895_v44 = vsel %vm2894_vm5, %v2890_v42, %v2831_v48 }
 0xe3f   : > { %v4672_v36 = vpop.eup %4671 }
 0xe40   : > { %v2691_v50 = vmul.f32 %v4672_v36, %v4664_v54 }
 0xe41   : > { %v2847_v27 = vpop.permute.xlu0 %2846 }
 0xe42   : > { %3931 = vst.msk [vmem:[%s5623_s20 + $0xb8] sm:$0xff] %vm1046_vm3, %v2691_v50  ;;  %v2900_v49 = vsel %vm2899_vm6, %v2895_v44, %v2847_v27 }
 0xe45   : > { %v2863_v28 = vpop.permute.xlu0 %2862 }
 0xe46   : > { %v2904_v62 = vsel %vm1046_vm3, %v2900_v49, %v2863_v28  ;;  %v3093_v49 = vld [vmem:[%s5582_s7 + $0x18] sm:$0xff] }
 0xe47   : > { %4300 = vmatprep.subr.mxu1 %v3093_v49 }
 0xe48   : > { %4301 = vmatpush3.msra.mxu1 %v3093_v49 }
 0xe49   : > { %v2865_v30 = vpop.permute.xlu0 %2864 }
 0xe4d   : > { %v2821_v52 = vpop.permute.xlu0 %2820 }
 0xe4e   : > { %v2893_v0 = vsel %vm1160_vm4, %v5868_v14, %v2821_v52  ;;  %v3936_v14 = vld [vmem:[%s6462_s0] ss:$0 sm:$0xff] }
 0xe51   : > { %v2851_v38 = vpop.permute.xlu0 %2850 }
 0xe5e   : > { %v2680_v53 = vpop.xlane.xlu1 %2679 }
 0xe5f   : > { %4673 = vrcp.f32 %v2680_v53  ;;  %v4692_v53 = vld [vmem:[#allocation2] sm:$0xff] }
 0xe62   : > { %v2702_v56 = vpop.permute.xlu1 %2701 }
 0xe63   : > { %4274 = vmatprep.subr.mxu0 %v2702_v56 }
 0xe64   : > { %4275 = vmatpush3.msra.mxu0 %v2702_v56 }
 0xe65   : > { %4277 = vmatmul.mubr.msk.f32.vlgmr.msra.gmra.mxu0 %vm1046_vm3, %v2689_v34  ;;  %4282 = vmatprep.subr.mxu0 %v1032_v3 }
 0xe66   : > { %4283 = vmatpush3.msra.mxu0 %v1032_v3  ;;  %v2817_v26 = vpop.permute.xlu1 %2816 }
 0xe67   : > { %4284 = vmatprep.subr.mxu0 %v1031_v4  ;;  %v2891_v40 = vsel %vm1160_vm4, %v5864_v12, %v2817_v26 }
 0xe68   : > { %4285 = vmatpush3.msra.mxu0 %v1031_v4 }
 0xe69   : > { %4286 = vmatprep.subr.mxu0 %v1030_v5 }
 0xe6a   : > { %4287 = vmatpush3.msra.mxu0 %v1030_v5  ;;  %v2833_v9 = vpop.permute.xlu1 %2832 }
 0xe6b   : > { %4288 = vmatprep.subr.mxu0 %v1029_v6  ;;  %v2896_v43 = vsel %vm2894_vm5, %v2891_v40, %v2833_v9 }
 0xe6c   : > { %v4674_v58 = vpop.eup %4673  ;;  %4289 = vmatpush3.msra.mxu0 %v1029_v6 }
 0xe6d   : > { %v2690_v2 = vmul.f32 %v4674_v58, %v4666_v1  ;;  %4290 = vmatprep.subr.mxu0 %v1028_v8 }
 0xe6e   : > { %4291 = vmatpush3.msra.mxu0 %v1028_v8  ;;  %v2849_v29 = vpop.permute.xlu1 %2848  ;;  %v4693_v8 = vld [vmem:[#allocation2 + $0x10] sm:$0xff] }
 0xe6f   : > { %3930 = vst.msk [vmem:[%s5623_s20 + $0xb0] sm:$0xff] %vm1046_vm3, %v2690_v2  ;;  %4279 = vmatprep.mubr.msk.f32.mxu0 %vm1046_vm3, %v2690_v2  ;;  %4292 = vmatprep.subr.mxu0 %v1027_v10  ;;  %v2901_v45 = vsel %vm2899_vm6, %v2896_v43, %v2849_v29 }
 0xe70   : > { %4280 = vmatmul.mubr.msk.f32.gmra.mxu0 %vm1046_vm3, %v2691_v50  ;;  %v2905_v12 = vsel %vm1046_vm3, %v2901_v45, %v2865_v30 }
 0xe71   : > { %4293 = vmatpush3.msra.mxu0 %v1027_v10 }
 0xe72   : > { %v2819_v31 = vpop.permute.xlu1 %2818 }
 0xe73   : > { %v2892_v51 = vsel %vm1160_vm4, %v5870_v15, %v2819_v31 }
 0xe76   : > { %v2835_v37 = vpop.permute.xlu1 %2834 }
 0xe77   : > { %v2897_v59 = vsel %vm2894_vm5, %v2892_v51, %v2835_v37 }
 0xe78   : > { %v2902_v60 = vsel %vm2899_vm6, %v2897_v59, %v2851_v38 }
 0xe7a   : > { %v2837_v39 = vpop.permute.xlu1 %2836 }
 0xe7b   : > { %v2898_v1 = vsel %vm2894_vm5, %v2893_v0, %v2837_v39 }
 0xe7e   : > { %v2853_v41 = vpop.permute.xlu1 %2852 }
 0xe7f   : > { %v2903_v16 = vsel %vm2899_vm6, %v2898_v1, %v2853_v41 }
 0xf25   : > { %v4278_v20 = vpop.f32.mrf.mxu0 }
 0xf26   : > { %2880 = vrot.lane.b32.xlu0 %v4278_v20, %s5168_s16  ;;  %v4694_v20 = vld [vmem:[#allocation2 + $0x18] sm:$0xff] }
 0xf27   : > { %v2791_v22 = vpop.f32.mrf.mxu0 }
 0xf28   : > { %2878 = vrot.lane.b32.xlu1 %v2791_v22, %s5168_s16 }
 0xf2c   : > { %2868 = vrot.lane.b32.xlu1 %v6052_v21, %s5158_s15  ;;  %v2867_v21 = vpop.permute.xlu0 %2866 }
 0xf2d   : > { %v2906_v17 = vsel %vm1046_vm3, %v2902_v60, %v2867_v21 }
 0xf30   : > { %v4281_v23 = vpop.f32.mrf.mxu0 }
 0xf31   : > { %2884 = vrot.lane.b32.xlu1 %v4281_v23, %s5168_s16 }
 0xf32   : > { %v2801_v24 = vpop.f32.mrf.mxu0 }
 0xf33   : > { %2882 = vrot.lane.b32.xlu0 %v2801_v24, %s5168_s16 }
 0xf98   : > { %v2881_v61 = vpop.permute.xlu0 %2880 }
 0xf99   : > { %v2910_v13 = vsel %vm2908_vm7, %v2905_v12, %v2881_v61  ;;  %v3092_v61 = vld [vmem:[%s5582_s7 + $0x10] sm:$0xff] }
 0xf9a   : > { %v2879_v63 = vpop.permute.xlu1 %2878  ;;  %4302 = vmatprep.subr.mxu1 %v3092_v61  ;;  %v3217_v12 = vld [vmem:[%s5617_s11 + $0x78] sm:$0xff] }
 0xf9b   : > { %v2909_v11 = vsel %vm2908_vm7, %v2904_v62, %v2879_v63  ;;  %v3091_v62 = vld [vmem:[%s5582_s7 + $0x8] sm:$0xff]  ;;  %4303 = vmatpush3.msra.mxu1 %v3092_v61  ;;  %v3090_v63 = vld [vmem:[%s5582_s7] sm:$0xff]  ;;  %s6464_s7 = scalar_lea.vmem [#allocation16], %s5561_s1 }
 0xf9c   : > { %4294 = vmatprep.mubr.msk.f32.mxu0 %vm2919_vm8, %v2909_v11  ;;  %4304 = vmatprep.subr.mxu1 %v3091_v62 }
 0xf9d   : > { %4295 = vmatmul.mubr.msk.f32.vlgmr.msra.gmra.mxu0 %vm2919_vm8, %v2910_v13  ;;  %4305 = vmatpush3.msra.mxu1 %v3091_v62  ;;  %v3946_v62 = vld [vmem:[%s6464_s7] ss:$0 sm:$0xff] }
 0xf9e   : > { %v2869_v54 = vpop.permute.xlu1 %2868  ;;  %4306 = vmatprep.subr.mxu1 %v3090_v63 }
 0xf9f   : > { %v2907_v32 = vsel %vm1046_vm3, %v2903_v16, %v2869_v54  ;;  %4307 = vmatpush3.msra.mxu1 %v3090_v63 }
 0xfa0   : > { %4314 = vmatprep.subr.mxu1 %v3217_v12 }
 0xfa3   : > { %v2885_v33 = vpop.permute.xlu1 %2884 }
 0xfa4   : > { %v2912_v19 = vsel %vm2908_vm7, %v2907_v32, %v2885_v33  ;;  %v6169_v33 = vld [vmem:[%s5580_s23] sm:$0xf]  ;;  %s6463_s23 = scalar_lea.vmem [#allocation15], %s5561_s1  ;;  %s6465_s1 = sld [smem:[#allocation37_spill]] }
 0xfa5   : > { %v2883_v18 = vpop.permute.xlu0 %2882  ;;  %v3077_v32 = vrot.slane %v6169_v33, %v5665_v47 }
 0xfa6   : > { %v2911_v15 = vsel %vm2908_vm7, %v2906_v17, %v2883_v18 }
 0xfa7   : > { %4297 = vmatprep.mubr.msk.f32.mxu0 %vm2919_vm8, %v2911_v15 }
 0xfa8   : > { %4298 = vmatmul.mubr.msk.f32.gmra.mxu0 %vm2919_vm8, %v2912_v19 }
 0xfaa   : > { %p3947_p4 = scmp.ne.s32.totalorder %s6465_s1, 5 }
0x105d   : > { %v4296_v34 = vpop.f32.mrf.mxu0 }
0x105e   : > { %v3004_v57 = vadd.f32 %v4296_v34, %v3936_v14 }
0x105f   : > { %v2998_v55 = vpop.f32.mrf.mxu0 }
0x1060   : > { %v3018_v36 = vadd.f32 %v4691_v35, %v3004_v57  ;;  %v2999_v50 = vadd.f32 %v3936_v14, %v2998_v55  ;;  %v3085_v55 = vrot.slane %v6169_v33, %v1042_v7 }
0x1062   : > { %v3017_v56 = vadd.f32 %v4692_v53, %v2999_v50  ;;  %v3024_v58 = vsel %vm1046_vm3, %v3018_v36, 0.0 }
0x1063   : > { %3025 = vadd.xlane.f32.xlu1 %v3024_v58  ;;  %v3215_v58 = vld [vmem:[%s5617_s11 + $0x68] sm:$0xff] }
0x1064   : > { %v3021_v2 = vsel %vm1046_vm3, %v3017_v56, 0.0 }
0x1065   : > { %3022 = vadd.xlane.f32.xlu0 %v3021_v2  ;;  %v3214_v2 = vld [vmem:[%s5617_s11 + $0x60] sm:$0xff] }
0x1068   : > { %v4299_v3 = vpop.f32.mrf.mxu0 }
0x1069   : > { %v3014_v5 = vadd.f32 %v4299_v3, %v3936_v14 }
0x106a   : > { %v3008_v4 = vpop.f32.mrf.mxu0 }
0x106b   : > { %v3009_v6 = vadd.f32 %v3936_v14, %v3008_v4  ;;  %v3020_v22 = vadd.f32 %v4694_v20, %v3014_v5  ;;  %v3213_v4 = vld [vmem:[%s5617_s11 + $0x58] sm:$0xff] }
0x106d   : > { %v3019_v10 = vadd.f32 %v4693_v8, %v3009_v6  ;;  %v3030_v24 = vsel %vm1046_vm3, %v3020_v22, 0.0  ;;  %v3212_v8 = vld [vmem:[%s5617_s11 + $0x50] sm:$0xff] }
0x106f   : > { %v3027_v23 = vsel %vm1046_vm3, %v3019_v10, 0.0 }
0x1070   : > { %3028 = vadd.xlane.f32.xlu0 %v3027_v23 }
0x1074   : > { %3031 = vadd.xlane.f32.xlu0 %v3030_v24  ;;  %v3210_v24 = vld [vmem:[%s5617_s11 + $0x40] sm:$0xff] }
0x10ec   : > { %v3026_v25 = vpop.xlane.xlu1 %3025 }
0x10ed   : > { %v3035_v48 = vmul.f32 0.03125, %v3026_v25 }
0x10ee   : > { %v3023_v26 = vpop.xlane.xlu0 %3022 }
0x10ef   : > { %v3039_v27 = vsub.f32 %v3018_v36, %v3035_v48  ;;  %v3034_v9 = vmul.f32 0.03125, %v3023_v26  ;;  %v3209_v48 = vld [vmem:[%s5617_s11 + $0x38] sm:$0xff]  ;;  %v3208_v26 = vld [vmem:[%s5617_s11 + $0x30] sm:$0xff] }
0x10f1   : > { %v3038_v28 = vsub.f32 %v3017_v56, %v3034_v9  ;;  %v3043_v29 = vmul.f32 %v3039_v27, %v3039_v27  ;;  %v3216_v56 = vld [vmem:[%s5617_s11 + $0x70] sm:$0xff]  ;;  %v3206_v9 = vld [vmem:[%s5617_s11 + $0x20] sm:$0xff] }
0x10f3   : > { %v3049_v30 = vsel %vm1046_vm3, %v3043_v29, 0.0  ;;  %v3042_v31 = vmul.f32 %v3038_v28, %v3038_v28  ;;  %v3204_v29 = vld [vmem:[%s5617_s11 + $0x10] sm:$0xff] }
0x10f4   : > { %3050 = vadd.xlane.f32.xlu0 %v3049_v30  ;;  %v3203_v30 = vld [vmem:[%s5617_s11 + $0x8] sm:$0xff] }
0x10f5   : > { %v3046_v52 = vsel %vm1046_vm3, %v3042_v31, 0.0  ;;  %v3202_v31 = vld [vmem:[%s5617_s11] sm:$0xff] }
0x10f6   : > { %3047 = vadd.xlane.f32.xlu1 %v3046_v52  ;;  %v3941_v52 = vld [vmem:[%s6463_s23] ss:$0 sm:$0xff] }
0x10f9   : > { %v3029_v37 = vpop.xlane.xlu0 %3028 }
0x10fa   : > { %v3036_v38 = vmul.f32 0.03125, %v3029_v37 }
0x10fc   : > { %v3040_v39 = vsub.f32 %v3019_v10, %v3036_v38 }
0x10fd   : > { %v3032_v21 = vpop.xlane.xlu0 %3031 }
0x10fe   : > { %v3037_v40 = vmul.f32 0.03125, %v3032_v21  ;;  %v3044_v41 = vmul.f32 %v3040_v39, %v3040_v39 }
0x1100   : > { %v6157_v42 = vsub.f32 %v3020_v22, %v3037_v40  ;;  %v3052_v43 = vsel %vm1046_vm3, %v3044_v41, 0.0  ;;  %v3211_v22 = vld [vmem:[%s5617_s11 + $0x48] sm:$0xff] }
0x1101   : > { %3053 = vadd.xlane.f32.xlu1 %v3052_v43 }
0x1102   : > { %v3045_v44 = vmul.f32 %v6157_v42, %v6157_v42 }
0x1104   : > { %v3055_v45 = vsel %vm1046_vm3, %v3045_v44, 0.0 }
0x1105   : > { %3056 = vadd.xlane.f32.xlu0 %v3055_v45 }
0x117d   : > { %v3051_v11 = vpop.xlane.xlu0 %3050 }
0x117e   : > { %v3059_v13 = vmul.f32 0.03125, %v3051_v11 }
0x117f   : > { %v3048_v51 = vpop.xlane.xlu1 %3047 }
0x1180   : > { %v3063_v54 = vadd.f32 1e-05, %v3059_v13  ;;  %v3058_v59 = vmul.f32 0.03125, %v3048_v51 }
0x1182   : > { %4675 = vrsqrt.f32 %v3063_v54  ;;  %v3062_v60 = vadd.f32 1e-05, %v3058_v59 }
0x1184   : > { %4677 = vrsqrt.f32 %v3062_v60 }
0x118a   : > { %v3054_v0 = vpop.xlane.xlu1 %3053 }
0x118b   : > { %v3060_v1 = vmul.f32 0.03125, %v3054_v0 }
0x118d   : > { %v3064_v16 = vadd.f32 1e-05, %v3060_v1 }
0x118e   : > { %v3057_v17 = vpop.xlane.xlu0 %3056 }
0x118f   : > { %v4676_v18 = vpop.eup %4675  ;;  %4679 = vrsqrt.f32 %v3064_v16  ;;  %v3061_v15 = vmul.f32 0.03125, %v3057_v17 }
0x1190   : > { %v3071_v19 = vmul.f32 %v4676_v18, %v3039_v27  ;;  %v3207_v27 = vld [vmem:[%s5617_s11 + $0x28] sm:$0xff] }
0x1191   : > { %v4678_v14 = vpop.eup %4677  ;;  %v3065_v34 = vadd.f32 1e-05, %v3061_v15 }
0x1192   : > { %v3070_v57 = vmul.f32 %v4678_v14, %v3038_v28  ;;  %v3079_v35 = vmul.f32 %v3077_v32, %v3071_v19  ;;  %v3205_v28 = vld [vmem:[%s5617_s11 + $0x18] sm:$0xff] }
0x1193   : > { %4681 = vrsqrt.f32 %v3065_v34 }
0x1194   : > { %v3078_v36 = vmul.f32 %v3077_v32, %v3070_v57  ;;  %v6178_v53 = vadd.f32 %v3085_v55, %v3079_v35 }
0x1196   : > { %v6176_v50 = vadd.f32 %v3085_v55, %v3078_v36 }
0x1198   : > { %4308 = vmatprep.mubr.msk.f32.mxu1 %vm1046_vm3, %v6176_v50 }
0x1199   : > { %4309 = vmatmul.mubr.msk.f32.vlgmr.msra.gmra.mxu1 %vm1046_vm3, %v6178_v53 }
0x119a   : > { %4315 = vmatpush3.msra.mxu1 %v3217_v12 }
0x119b   : > { %4316 = vmatprep.subr.mxu1 %v3216_v56 }
0x119c   : > { %v4680_v7 = vpop.eup %4679  ;;  %4317 = vmatpush3.msra.mxu1 %v3216_v56 }
0x119d   : > { %v3072_v3 = vmul.f32 %v4680_v7, %v3040_v39  ;;  %4318 = vmatprep.subr.mxu1 %v3215_v58 }
0x119e   : > { %4319 = vmatpush3.msra.mxu1 %v3215_v58 }
0x119f   : > { %v3080_v5 = vmul.f32 %v3077_v32, %v3072_v3  ;;  %4320 = vmatprep.subr.mxu1 %v3214_v2 }
0x11a0   : > { %v4682_v6 = vpop.eup %4681  ;;  %4321 = vmatpush3.msra.mxu1 %v3214_v2 }
0x11a1   : > { %v6189_v10 = vadd.f32 %v3085_v55, %v3080_v5  ;;  %v3073_v20 = vmul.f32 %v4682_v6, %v6157_v42  ;;  %4322 = vmatprep.subr.mxu1 %v3213_v4 }
0x11a2   : > { %4323 = vmatpush3.msra.mxu1 %v3213_v4 }
0x11a3   : > { %4311 = vmatprep.mubr.msk.f32.mxu1 %vm1046_vm3, %v6189_v10  ;;  %v3081_v23 = vmul.f32 %v3077_v32, %v3073_v20  ;;  %4324 = vmatprep.subr.mxu1 %v3212_v8 }
0x11a4   : > { %4325 = vmatpush3.msra.mxu1 %v3212_v8 }
0x11a5   : > { %v3089_v25 = vadd.f32 %v3085_v55, %v3081_v23  ;;  %4326 = vmatprep.subr.mxu1 %v3211_v22 }
0x11a6   : > { %4327 = vmatpush3.msra.mxu1 %v3211_v22 }
0x11a7   : > { %4312 = vmatmul.mubr.msk.f32.gmra.mxu1 %vm1046_vm3, %v3089_v25  ;;  %4328 = vmatprep.subr.mxu1 %v3210_v24 }
0x11a8   : > { %4329 = vmatpush3.msra.mxu1 %v3210_v24 }
0x11a9   : > { %4330 = vmatprep.subr.mxu1 %v3209_v48 }
0x11aa   : > { %4331 = vmatpush3.msra.mxu1 %v3209_v48 }
0x11ab   : > { %4332 = vmatprep.subr.mxu1 %v3208_v26 }
0x11ac   : > { %4333 = vmatpush3.msra.mxu1 %v3208_v26 }
0x11ad   : > { %4334 = vmatprep.subr.mxu1 %v3207_v27 }
0x11ae   : > { %4335 = vmatpush3.msra.mxu1 %v3207_v27 }
0x11af   : > { %4336 = vmatprep.subr.mxu1 %v3206_v9 }
0x11b0   : > { %4337 = vmatpush3.msra.mxu1 %v3206_v9  ;;  %v3368_v9 = vsub.s32 2, %v5662_v46 }
0x11b1   : > { %4338 = vmatprep.subr.mxu1 %v3205_v28 }
0x11b2   : > { %4339 = vmatpush3.msra.mxu1 %v3205_v28 }
0x11b3   : > { %4340 = vmatprep.subr.mxu1 %v3204_v29 }
0x11b4   : > { %4341 = vmatpush3.msra.mxu1 %v3204_v29  ;;  %v3376_v29 = vsub.s32 3, %v5662_v46 }
0x11b5   : > { %4342 = vmatprep.subr.mxu1 %v3203_v30 }
0x11b6   : > { %4343 = vmatpush3.msra.mxu1 %v3203_v30 }
0x11b7   : > { %4344 = vmatprep.subr.mxu1 %v3202_v31 }
0x11b8   : > { %4345 = vmatpush3.msra.mxu1 %v3202_v31 }
0x1259   : > { %v4310_v37 = vpop.f32.mrf.mxu1 }
0x125a   : > { %v3185_v38 = vadd.f32 %v4310_v37, %v3941_v52 }
0x125b   : > { %v3179_v39 = vpop.f32.mrf.mxu1 }
0x125c   : > { %v3180_v21 = vadd.f32 %v3941_v52, %v3179_v39  ;;  %v3199_v41 = vmax.f32 %v3185_v38, 0.0 }
0x125e   : > { %v3198_v40 = vmax.f32 %v3180_v21, 0.0  ;;  %v3377_v21 = vrot.slane %v6169_v33, %v3376_v29 }
0x1260   : > { %4346 = vmatprep.mubr.f32.mxu1 %v3198_v40 }
0x1261   : > { %4347 = vmatmul.mubr.f32.vlgmr.msra.gmra.mxu1 %v3199_v41 }
0x1267   : > { %v4313_v42 = vpop.f32.mrf.mxu1 }
0x1268   : > { %v3195_v43 = vadd.f32 %v4313_v42, %v3941_v52 }
0x1269   : > { %v3189_v44 = vpop.f32.mrf.mxu1 }
0x126a   : > { %v3190_v45 = vadd.f32 %v3941_v52, %v3189_v44  ;;  %v3201_v61 = vmax.f32 %v3195_v43, 0.0  ;;  %v3369_v52 = vrot.slane %v6169_v33, %v3368_v9 }
0x126c   : > { %v3200_v49 = vmax.f32 %v3190_v45, 0.0 }
0x126e   : > { %4349 = vmatprep.mubr.f32.mxu1 %v3200_v49 }
0x126f   : > { %4350 = vmatmul.mubr.f32.gmra.mxu1 %v3201_v61 }
0x1321   : > { %v4348_v63 = vpop.f32.mrf.mxu1 }
0x1322   : > { %v3297_v12 = vadd.f32 %v4348_v63, %v3946_v62 }
0x1323   : > { %v3291_v11 = vpop.f32.mrf.mxu1 }
0x1324   : > { %v3311_v13 = vadd.f32 %v3297_v12, %v6178_v53  ;;  %v3292_v51 = vadd.f32 %v3946_v62, %v3291_v11 }
0x1326   : > { %v3310_v54 = vadd.f32 %v3292_v51, %v6176_v50  ;;  %v3317_v59 = vsel %vm1046_vm3, %v3311_v13, 0.0 }
0x1327   : > { %3318 = vadd.xlane.f32.xlu0 %v3317_v59 }
0x1328   : > { %v3314_v60 = vsel %vm1046_vm3, %v3310_v54, 0.0 }
0x1329   : > { %3315 = vadd.xlane.f32.xlu1 %v3314_v60 }
0x132f   : > { %v4351_v0 = vpop.f32.mrf.mxu1 }
0x1330   : > { %v3307_v1 = vadd.f32 %v4351_v0, %v3946_v62 }
0x1331   : > { %v3301_v16 = vpop.f32.mrf.mxu1 }
0x1332   : > { %v3313_v17 = vadd.f32 %v3307_v1, %v3089_v25  ;;  %v3302_v18 = vadd.f32 %v3946_v62, %v3301_v16 }
0x1334   : > { %v3312_v32 = vadd.f32 %v3302_v18, %v6189_v10  ;;  %v3323_v15 = vsel %vm1046_vm3, %v3313_v17, 0.0 }
0x1335   : > { %3324 = vadd.xlane.f32.xlu0 %v3323_v15 }
0x1336   : > { %v3320_v19 = vsel %vm1046_vm3, %v3312_v32, 0.0 }
0x1337   : > { %3321 = vadd.xlane.f32.xlu1 %v3320_v19 }
0x13b0   : > { %v3319_v14 = vpop.xlane.xlu0 %3318 }
0x13b1   : > { %v3327_v34 = vmul.f32 0.03125, %v3319_v14 }
0x13b2   : > { %v3316_v57 = vpop.xlane.xlu1 %3315 }
0x13b3   : > { %v3331_v55 = vsub.f32 %v3311_v13, %v3327_v34  ;;  %v3326_v35 = vmul.f32 0.03125, %v3316_v57 }
0x13b5   : > { %v3330_v36 = vsub.f32 %v3310_v54, %v3326_v35  ;;  %v3335_v50 = vmul.f32 %v3331_v55, %v3331_v55 }
0x13b7   : > { %v3341_v53 = vsel %vm1046_vm3, %v3335_v50, 0.0  ;;  %v3334_v56 = vmul.f32 %v3330_v36, %v3330_v36 }
0x13b8   : > { %3342 = vadd.xlane.f32.xlu0 %v3341_v53 }
0x13b9   : > { %v3338_v58 = vsel %vm1046_vm3, %v3334_v56, 0.0 }
0x13ba   : > { %3339 = vadd.xlane.f32.xlu1 %v3338_v58 }
0x13be   : > { %v3325_v7 = vpop.xlane.xlu0 %3324 }
0x13bf   : > { %v3329_v2 = vmul.f32 0.03125, %v3325_v7 }
0x13c0   : > { %v3322_v3 = vpop.xlane.xlu1 %3321 }
0x13c1   : > { %v3333_v4 = vsub.f32 %v3313_v17, %v3329_v2  ;;  %v3328_v5 = vmul.f32 0.03125, %v3322_v3 }
0x13c3   : > { %v3332_v6 = vsub.f32 %v3312_v32, %v3328_v5  ;;  %v3337_v8 = vmul.f32 %v3333_v4, %v3333_v4 }
0x13c5   : > { %v3347_v10 = vsel %vm1046_vm3, %v3337_v8, 0.0  ;;  %v3336_v20 = vmul.f32 %v3332_v6, %v3332_v6 }
0x13c6   : > { %3348 = vadd.xlane.f32.xlu0 %v3347_v10 }
0x13c7   : > { %v3344_v22 = vsel %vm1046_vm3, %v3336_v20, 0.0 }
0x13c8   : > { %3345 = vadd.xlane.f32.xlu1 %v3344_v22 }
0x1441   : > { %v3343_v23 = vpop.xlane.xlu0 %3342 }
0x1442   : > { %v3351_v24 = vmul.f32 0.03125, %v3343_v23 }
0x1443   : > { %v3340_v25 = vpop.xlane.xlu1 %3339 }
0x1444   : > { %v3355_v48 = vadd.f32 1e-05, %v3351_v24  ;;  %v3350_v26 = vmul.f32 0.03125, %v3340_v25 }
0x1446   : > { %4683 = vrsqrt.f32 %v3355_v48  ;;  %v3354_v27 = vadd.f32 1e-05, %v3350_v26 }
0x1448   : > { %4685 = vrsqrt.f32 %v3354_v27 }
0x144f   : > { %v3349_v28 = vpop.xlane.xlu0 %3348 }
0x1450   : > { %v3353_v30 = vmul.f32 0.03125, %v3349_v28 }
0x1451   : > { %v3346_v31 = vpop.xlane.xlu1 %3345 }
0x1452   : > { %v3357_v37 = vadd.f32 1e-05, %v3353_v30  ;;  %v3352_v38 = vmul.f32 0.03125, %v3346_v31 }
0x1453   : > { %v4684_v39 = vpop.eup %4683 }
0x1454   : > { %v3363_v40 = vmul.f32 %v4684_v39, %v3331_v55  ;;  %4687 = vrsqrt.f32 %v3357_v37  ;;  %v3356_v41 = vadd.f32 1e-05, %v3352_v38 }
0x1455   : > { %v4686_v42 = vpop.eup %4685 }
0x1456   : > { %v3371_v43 = vmul.f32 %v3369_v52, %v3363_v40  ;;  %v3362_v44 = vmul.f32 %v4686_v42, %v3330_v36  ;;  %4689 = vrsqrt.f32 %v3356_v41 }
0x1458   : > { %v3379_v45 = vadd.f32 %v3377_v21, %v3371_v43  ;;  %v3370_v49 = vmul.f32 %v3369_v52, %v3362_v44 }
0x145a   : > { %3383 = vst.msk [vmem:[#allocation2 + $0x8] sm:$0xff] %vm1046_vm3, %v3379_v45  ;;  %v3378_v46 = vadd.f32 %v3377_v21, %v3370_v49 }
0x145c   : > { %3382 = vst.msk [vmem:[#allocation2] sm:$0xff] %vm1046_vm3, %v3378_v46 }
0x1461   : > { %v4688_v61 = vpop.eup %4687 }
0x1462   : > { %v3365_v62 = vmul.f32 %v4688_v61, %v3333_v4 }
0x1463   : > { %v4690_v63 = vpop.eup %4689 }
0x1464   : > { %v3373_v12 = vmul.f32 %v3369_v52, %v3365_v62  ;;  %v3364_v11 = vmul.f32 %v4690_v63, %v3332_v6 }
0x1466   : > { %v3381_v33 = vadd.f32 %v3377_v21, %v3373_v12  ;;  %v3372_v13 = vmul.f32 %v3369_v52, %v3364_v11  ;;  %3389 = sbr.rel (%p3947_p4) target bundleno = 5432 (0x1538), region = 124 }
0x1468   : > { %3385 = vst.msk [vmem:[#allocation2 + $0x18] sm:$0xff] %vm1046_vm3, %v3381_v33  ;;  %v3380_v51 = vadd.f32 %v3377_v21, %v3372_v13 }
0x146a   : > { %3384 = vst.msk [vmem:[#allocation2 + $0x10] sm:$0xff] %vm1046_vm3, %v3380_v51 }
0x146b   : > { %v5170_v54 = vmov 0.0   ;;  %vm5171_vm9 = vmmov 0   ;;  %v3391_v59 = vld [vmem:[#allocation3] sm:$0x1]  ;;  %v5172_v60 = vmov 0   ;;  %vm3474_vm10 = vcmask 253952  }
0x146c   : > { %4352 = vmatprep.subr.mxu0 %v5170_v54  ;;  %4360 = vmatprep.mubr.msk.f32.mxu0 %vm5171_vm9, %v5170_v54  ;;  %v3390_v0 = vld [vmem:[#allocation18] sm:$0x1] }
0x146d   : > { %4353 = vmatpush3.msra.mxu0 %v3381_v33  ;;  %4695 = vset.pattern.permute.xlu0 %v5172_v60 }
0x146e   : > { %4354 = vmatprep.subr.mxu0 %v5170_v54  ;;  %3394 = vperm.xlu0 %4695, %v3391_v59  }
0x146f   : > { %4355 = vmatpush3.msra.mxu0 %v3380_v51 }
0x1470   : > { %4356 = vmatprep.subr.mxu0 %v5170_v54 }
0x1471   : > { %4357 = vmatpush3.msra.mxu0 %v3379_v45 }
0x1472   : > { %4358 = vmatprep.subr.mxu0 %v5170_v54 }
0x1473   : > { %4359 = vmatpush3.msra.mxu0 %v3378_v46 }
0x1474   : > { %4361 = vmatmul.mubr.msk.f32.vlgmr.msra.gmra.mxu0 %vm1046_vm3, %v3390_v0 }
0x14e9   : > { %v3395_v1 = vpop.permute.xlu0 %3394 }
0x14ea   : > { %v3400_v16 = vrot.slane %v3395_v1, %v5665_v47 }
0x1534   : > { %v3470_v17 = vpop.f32.mrf.mxu0 }
0x1535   : > { %v3471_v18 = vadd.f32 %v3470_v17, %v3400_v16 }
0x1536   : > { %v4362_v32 = vpop.f32.mrf.mxu0 }
0x1537   : > { %3475 = vst.msk [vmem:[%s5621_s8] sm:$0x1] %vm3474_vm10, %v3471_v18 }
0x1538 PF: > { %s6466_s11 = sld [smem:[#allocation38_spill]]  ;;  %s3494_s5 = sshll.u32 %s5621_s8, 4  ;;  %s3495_s5 = int_to_ptr.vmem [resolvable:$true] %s3494_s5 }
0x1539   : > { %s6467_s25 = sld [smem:[#allocation46_spill]]  ;;  %s6469_s19 = sand.u32 1, %s5102_s26  }
0x153a   : > { %s6468_s22 = sld [smem:[#allocation62_spill]]  ;;  %s3477_s2 = scalar_lea.sflag [#allocation6], %s6469_s19 }
0x153b   : > { %s4944_s14 = scalar_lea.vmem %s3495_s5, 16  ;;  %s5173_s29 = smov [#allocation19]  }
0x153c   : > { %p4945_p13 = scmp.ne.s32.totalorder %s3495_s5, %s4944_s14  ;;  %s4948_s27 = sshll.u32 %s5173_s29, 4  ;;  %s4949_s27 = int_to_ptr.vmem [resolvable:$false] %s4948_s27 }
0x153d   : > { %s4950_s24 = scalar_lea.vmem %s4949_s27, 32  ;;  %p4951_p1 = scmp.lt.s32.totalorder %s3495_s5, %s4949_s27 }
0x153e   : > { %s3949_s13 = sshll.u32 %s6466_s11, 4  ;;  %p4952_p9 = scmp.lt.s32.totalorder %s4950_s24, %s4944_s14 }
0x153f   : > { %p6470_p3 = scmp.ne.s32.totalorder %s6467_s25, 0 }
0x1540   : > { %s3492_s15 = scalar_lea.hbm %s6468_s22, %s3949_s13  ;;  %p4953_p10 = por %p4952_p9, %p4951_p1 }
0x1541   : > { %p4946_p2 = pnand %p4945_p13, %p6470_p3 }
0x1543   : > { %p4947_p5 = pneg %p4946_p2 }
0x1545   : > { %p4954_p12 = pnand %p4953_p10, %p4947_p5 }
0x1547   : > { %4957 = shalt.err (!%p4954_p12)
}
0x1548   : > { %s4958_s28 = scalar_lea.hbm %s3492_s15, 16  ;;  %s4962_s6 = scalar_lea.hbm %s6468_s22, 32 }
0x1549   : > { %p4959_p7 = scmp.ne.s32.totalorder %s3492_s15, %s4958_s28  ;;  %p4963_p8 = scmp.lt.s32.totalorder %s3492_s15, %s6468_s22 }
0x154a   : > { %p4964_p6 = scmp.lt.s32.totalorder %s4962_s6, %s4958_s28 }
0x154b   : > { %p4960_p0 = pnand %p4959_p7, %p6470_p3 }
0x154c   : > { %p4965_p4 = por %p4964_p6, %p4963_p8 }
0x154d   : > { %p4961_p11 = pneg %p4960_p0 }
0x154f   : > { %p4966_p13 = pnand %p4965_p4, %p4961_p11 }
0x1551   : > { %4969 = shalt.err (!%p4966_p13)
}
0x1552   : > { %s6471_s7 = sld [smem:[#allocation37_spill]]  ;;  %s3509_s30 = sshll.u32 %s5623_s20, 4  ;;  %s6254_s30 = int_to_ptr.vmem [resolvable:$true] %s3509_s30 }
0x1553   : > { %s6472_s1 = sld [smem:[#allocation31_spill]]  ;;  %s4970_s6 = scalar_lea.vmem %s6254_s30, 3072 }
0x1554   : > { %s6473_s13 = sld [smem:[#allocation49_spill]]  ;;  %p4971_p2 = scmp.ne.s32.totalorder %s6254_s30, %s4970_s6 }
0x1555   : > { %4392 = dma.vmem_to_hbm [thread:$0]  (%p6470_p3), %s3495_s5, 16, %s3492_s15, %s3477_s2  }
0x1556   : > { %s6474_s24 = sld [smem:[#allocation63_spill]]  ;;  %s5174_s20 = smov [#allocation20]  }
0x1558   : > { %s3950_s17 = sshll.u32 %s6471_s7, 1 }
0x1559   : > { %s3502_s19 = sadd.s32 %s6466_s11, %s3950_s17  ;;  %s6476_s25 = sand.u32 1, %s6472_s1  }
0x155a   : > { %s4369_s14 = smul.u32 3072, %s3502_s19  ;;  %s6263_s16 = scalar_lea.sflag [#allocation21], %s6476_s25 }
0x155b   : > { %p6477_p3 = scmp.ne.s32.totalorder %s6473_s13, 0  ;;  %s4974_s11 = sshll.u32 %s5174_s20, 4  ;;  %s4975_s11 = int_to_ptr.vmem [resolvable:$false] %s4974_s11 }
0x155c   : > { %s6475_s8 = smov %s6474_s24  ;;  %s6259_s28 = scalar_lea.hbm %s6474_s24, %s4369_s14 }
0x155d   : > { %p4972_p5 = pnand %p4971_p2, %p6477_p3  ;;  %s4976_s15 = scalar_lea.vmem %s4975_s11, 6144 }
0x155e   : > { %p4977_p9 = scmp.lt.s32.totalorder %s6254_s30, %s4975_s11  ;;  %p4978_p10 = scmp.lt.s32.totalorder %s4976_s15, %s4970_s6 }
0x155f   : > { %p4973_p1 = pneg %p4972_p5 }
0x1560   : > { %p4979_p12 = por %p4978_p10, %p4977_p9 }
0x1562   : > { %p4980_p7 = pnand %p4979_p12, %p4973_p1 }
0x1564   : > { %4983 = shalt.err (!%p4980_p7)
}
0x1565   : > { %s4984_s5 = scalar_lea.hbm %s6259_s28, 3072  ;;  %s4988_s23 = scalar_lea.hbm %s6475_s8, 36864 }
0x1566   : > { %p4985_p0 = scmp.ne.s32.totalorder %s6259_s28, %s4984_s5  ;;  %p4989_p6 = scmp.lt.s32.totalorder %s6259_s28, %s6475_s8 }
0x1567   : > { %p4990_p4 = scmp.lt.s32.totalorder %s4988_s23, %s4984_s5 }
0x1568   : > { %p4986_p11 = pnand %p4985_p0, %p6477_p3 }
0x1569   : > { %p4991_p13 = por %p4990_p4, %p4989_p6 }
0x156a   : > { %p4987_p8 = pneg %p4986_p11 }
0x156c   : > { %p4992_p2 = pnand %p4991_p13, %p4987_p8 }
0x156e   : > { %4995 = shalt.err (!%p4992_p2)
}
0x156f   : > { %s5175_s17 = smov 128  }
0x1570   : > { %4393 = dma.vmem_to_hbm [thread:$0]  (%p6477_p3), %s6254_s30, 3072, %s6259_s28, %s6263_s16, %s5175_s17, %s5175_s17, %s5165_s21  }
0x1571 PF: > { %s6478_s19 = sld [smem:[#allocation40_spill]] }
0x1572   : > { %s6479_s14 = sld [smem:[#allocation33_spill]] }
0x1573   : > { %s6480_s29 = sld [smem:[#allocation47_spill]] }
0x1577   : > { %p4437_p5 = scmp.ge.s32.totalorder %s6478_s19, 2 }
0x1578   : > { %s3524_s27 = sand.u32 1, %s6479_s14  }
0x1579   : > { %p6481_p1 = scmp.ne.s32.totalorder %s6480_s29, 0  ;;  %s3525_s24 = scalar_lea.sflag [#allocation6], %s3524_s27 }
0x157b   : > { %p4426_p9 = pnand %p4437_p5, %p6481_p1 }
0x157d   : > { %p4427_p10 = pneg %p4426_p9 }
0x157f   : > { %5077 = dma.done.wait (%p4427_p10), %s3525_s24, 16  }
0x1580   : > { %5079 = vsyncadd (%p4427_p10), %s3525_s24, 4294967280  ;;  %s6482_s25 = sld [smem:[#allocation30_spill]] }
0x1581   : > { %s6483_s6 = sld [smem:[#allocation50_spill]] }
0x1586   : > { %s3532_s13 = sand.u32 1, %s6482_s25  }
0x1587   : > { %p6484_p12 = scmp.ne.s32.totalorder %s6483_s6, 0  ;;  %s3533_s20 = scalar_lea.sflag [#allocation21], %s3532_s13 }
0x1589   : > { %p4429_p7 = pnand %p4437_p5, %p6484_p12 }
0x158b   : > { %p4430_p0 = pneg %p4429_p7 }
0x158d   : > { %5081 = dma.done.wait (%p4430_p0), %s3533_s20, 3072  }
0x158e   : > { %5083 = vsyncadd (%p4430_p0), %s3533_s20, 4294964224  ;;  %s48_s20 = sadd.s32 1, %s6478_s19   ;;  %s6486_s23 = sld [smem:[#allocation31_spill]] }
0x158f   : > { %p6295_p3 = scmp.ge.s32.totalorder %s48_s20, 14   ;;  %s6487_s24 = sld [smem:[#allocation32_spill]] }
0x1590   : > { %s6488_s25 = sld [smem:[#allocation48_spill]]  ;;  %s6497_s14 = smov %s5102_s26 }
0x1591   : > { %s6489_s30 = sld [smem:[#allocation34_spill]]  ;;  %s6500_s0 = smov %s5130_s18 }
0x1592   : > { %s6490_s27 = sld [smem:[#allocation45_spill]] }
0x1593   : > { %s6491_s28 = sld [smem:[#allocation35_spill]] }
0x1594   : > { %s6492_s29 = sld [smem:[#allocation36_spill]] }
0x1595   : > { %s6493_s16 = sld [smem:[#allocation43_spill]] }
0x1596   : > { %s6494_s17 = sld [smem:[#allocation39_spill]] }
0x1597   : > { %s6495_s11 = sld [smem:[#allocation41_spill]]  ;;  %s6498_s26 = smov %s6489_s30 }
0x1598   : > { %s6496_s19 = sld [smem:[#allocation42_spill]] }
0x1599   :  { %47 = sbr.rel (!%p6295_p3) target bundleno = 33 (0x21), region = 245 }
0x159b   : > { %s6499_s30 = smov %s6493_s16 }
0x159d   : > { %s6501_s18 = smov %s6495_s11 }
0x159e   :  { %3538 = vsyncpa [#allocation5], 1 }
0x159f   :  { %3540 = vsyncpa [#allocation5 + $0x1], 1 }
0x15a0   :  { %3541 = vsyncpa [#allocation8], 1 }
0x15a1   :  { %3543 = vsyncpa [#allocation8 + $0x1], 1 }
0x15a2   :  { %3544 = vsyncpa [#allocation11], 1 }
0x15a3   :  { %3546 = vsyncpa [#allocation11 + $0x1], 1 }
0x15a4   :  { %3547 = vsyncpa [#allocation14], 1 }
0x15a5   :  { %3549 = vsyncpa [#allocation14 + $0x1], 1 }
0x15a6   :  { %3550 = vsyncpa [#allocation17], 1 }
0x15a7   :  { %3552 = vsyncpa [#allocation17 + $0x1], 1 }
0x15a8   :  { %3553 = vsyncpa [#allocation6], 1 }
0x15a9   :  { %3555 = vsyncpa [#allocation6 + $0x1], 1 }
0x15aa   :  { %3556 = vsyncpa [#allocation21], 1 }
0x15ab   :  { %3558 = vsyncpa [#allocation21 + $0x1], 1 }

</bundles_post_ra>
